<compile_context>
chip_gen: v7x
topology: tpu7x:2x2x1
jax: 0.10.0
libtpu: 0.0.40
codegen_flags: <defaults>
</compile_context>

<pallas_src>
import math

import jax
import jax.numpy as jnp
from jax.experimental import pallas as pl
from jax.experimental.pallas import tpu as pltpu

# DECOLLE LIF dynamics constants (defaults from decolle LIFLayer).
ALPHA = 0.9
BETA = 0.85
ALPHARP = 0.65
WRP = 1.0
TAU_M = 1.0 / (1.0 - ALPHA)
TAU_S = 1.0 / (1.0 - BETA)
LC_AMPL = 0.5


def _round_up(x, m):
    return ((x + m - 1) // m) * m


def _make_decolle_kernel(layer_out, ro_pad, steps_per_block, emit_sequences):
    """Fused kernel: TT timesteps x all LIF layers (+ readouts) per grid step.

    Ref order:
      inputs : x(TT,Bp,F0), [P,Q,R,S]_in * L, [W,b,Wr,br] * L
      outputs: [packed (S|U|RO) slab (TT,Bp,wtot)] * L   (only if emit_sequences),
               [P,Q,R,S]_final * L  (constant-index VMEM-resident accumulators)
    """
    L = len(layer_out)
    TT = steps_per_block

    def kernel(*refs):
        pos = 0
        x_ref = refs[pos]
        pos += 1
        st_in = [refs[pos + 4 * l: pos + 4 * l + 4] for l in range(L)]
        pos += 4 * L
        prm = [refs[pos + 4 * l: pos + 4 * l + 4] for l in range(L)]
        pos += 4 * L
        if emit_sequences:
            seq_o = [refs[pos + l] for l in range(L)]
            pos += L
        else:
            seq_o = [None] * L
        st_o = [refs[pos + 4 * l: pos + 4 * l + 4] for l in range(L)]
        pos += 4 * L

        # Seed the live recurrent state (held in the final-state output refs,
        # which are VMEM-resident across the whole grid) from the carried-in
        # state, once, at the first chunk.
        @pl.when(pl.program_id(0) == 0)
        def _seed_state():
            for l in range(L):
                for k in range(4):
                    st_o[l][k][...] = st_in[l][k][...]

        # Unrolled loop over the TT timesteps of this chunk; LIF recurrence is
        # serial inside the chunk, spikes feed the next layer in-register.
        for tt in range(TT):
            layer_in = x_ref[tt]                     # (Bp, F_l)
            for l in range(L):
                nout = layer_out[l]
                w_s = _round_up(nout, 128)           # 128-aligned lane section
                P_o, Q_o, R_o, S_o = st_o[l]
                W_r, b_r, Wr_r, br_r = prm[l]

                # LIF traces (f32, VPU).
                q_new = BETA * Q_o[...] + TAU_S * layer_in
                p_new = ALPHA * P_o[...] + TAU_M * q_new
                r_new = ALPHARP * R_o[...] - WRP * S_o[...]

                # Membrane potential: dense layer on P (bf16 MXU, f32 acc).
                # Bias is already (Bp, nout) -> no per-step broadcast.
                u = (jnp.dot(p_new.astype(jnp.bfloat16), W_r[...],
                             preferred_element_type=jnp.float32)
                     + b_r[...] + r_new)
                s_new = (u > 0.0).astype(jnp.float32)

                # In-place state update (state lives in the output refs).
                Q_o[...] = q_new
                P_o[...] = p_new
                R_o[...] = r_new
                S_o[...] = s_new

                if emit_sequences:
                    # Local readout on the smoothed "detached" spike signal
                    # (EUP sigmoid + bf16 MXU, lane-padded readout width).
                    sd = jax.nn.sigmoid(u)
                    ro = (jnp.dot(sd.astype(jnp.bfloat16), Wr_r[...],
                                  preferred_element_type=jnp.float32)
                          + br_r[...])
                    seq_ref = seq_o[l]
                    # Packed (S | U | RO) slab, 128-aligned lane offsets.
                    seq_ref[tt, :, 0:nout] = s_new
                    seq_ref[tt, :, w_s:w_s + nout] = u
                    seq_ref[tt, :, 2 * w_s:2 * w_s + ro_pad] = ro

                layer_in = s_new

    return kernel


class DECOLLEDense:
    """JAX realization of DECOLLEBase with dense LIF layers + linear readouts."""

    requires_init = True

    def __init__(self, key, in_features, hidden_sizes, ro_features):
        self.layer_in = [in_features] + list(hidden_sizes[:-1])
        self.layer_out = list(hidden_sizes)
        self.ro_features = ro_features
        # Lane-pad the readout width to a multiple of 128 for dense stores.
        self.ro_pad = _round_up(max(ro_features, 128), 128)

        self.params = []
        keys = jax.random.split(key, 3 * len(hidden_sizes))
        for i, (nin, nout) in enumerate(zip(self.layer_in, self.layer_out)):
            k_w, k_rw, k_rb = keys[3 * i], keys[3 * i + 1], keys[3 * i + 2]
            stdv = 1.0 / math.sqrt(nin)
            W = jax.random.uniform(k_w, (nin, nout), jnp.float32, -stdv, stdv)
            W = W.astype(jnp.bfloat16)                    # MXU-native dtype
            b = jnp.zeros((nout,), jnp.float32)
            # reset_lc_parameters semantics: uniform(-lc_ampl/sqrt(fan_in), +).
            ro_stdv = LC_AMPL / math.sqrt(nout)
            Wr = jax.random.uniform(k_rw, (nout, ro_features), jnp.float32,
                                    -ro_stdv, ro_stdv)
            Wr = jnp.pad(Wr, ((0, 0), (0, self.ro_pad - ro_features)))
            Wr = Wr.astype(jnp.bfloat16)
            br = jax.random.uniform(k_rb, (ro_features,), jnp.float32,
                                    -ro_stdv, ro_stdv)
            br = jnp.pad(br, ((0, self.ro_pad - ro_features),))
            self.params.append((W, b, Wr, br))

    def __len__(self):
        return len(self.params)

    # ------------------------------------------------------------------ utils
    @staticmethod
    def _pad_batch(batch):
        return max(8, _round_up(batch, 8))   # sublane-align the batch

    @staticmethod
    def _steps_per_block(T, target=8):
        # Largest divisor of T that is <= target (keeps padded-time junk out
        # of the carried state; falls back to 1 for awkward T).
        return max(d for d in range(1, min(T, target) + 1) if T % d == 0)

    def _to_slab(self, data_batch):
        """(B, T, C, H, W) -> (T, Bpad, C*H*W) f32 slab."""
        B, T = data_batch.shape[0], data_batch.shape[1]
        flat = data_batch.reshape(B, T, -1).astype(jnp.float32)
        slab = jnp.transpose(flat, (1, 0, 2))            # (T, B, F)
        Bp = self._pad_batch(B)
        if Bp != B:
            slab = jnp.pad(slab, ((0, 0), (0, Bp - B), (0, 0)))
        return slab, B, Bp

    def zero_states(self, batch_pad):
        states = []
        for nin, nout in zip(self.layer_in, self.layer_out):
            states.append((
                jnp.zeros((batch_pad, nin), jnp.float32),   # P
                jnp.zeros((batch_pad, nin), jnp.float32),   # Q
                jnp.zeros((batch_pad, nout), jnp.float32),  # R
                jnp.zeros((batch_pad, nout), jnp.float32),  # S
            ))
        return states

    def _vmem_limit_bytes(self, TT, Bp, F0, emit_sequences):
        """Explicit VMEM budget from actual buffer accounting (review item)."""
        need = 2 * TT * Bp * F0 * 4                      # input chunk, 2 bufs
        for nin, nout in zip(self.layer_in, self.layer_out):
            w_s = _round_up(nout, 128)
            if emit_sequences:
                need += 2 * TT * Bp * (2 * w_s + self.ro_pad) * 4  # seq slab
            need += nin * nout * 2 + Bp * nout * 4       # W (bf16, 1 buf) + b
            need += nout * self.ro_pad * 2 + Bp * self.ro_pad * 4  # Wr + br
            state = (2 * Bp * nin + 2 * Bp * nout) * 4
            need += state                                # state in (1 buf)
            need += 2 * state                            # state out (be safe)
        need += 4 * 1024 * 1024                          # compiler headroom
        # Cap at 56 MiB so the same budget is legal on v7x (64 MiB physical);
        # v5e/v6e (128 MiB) could raise the cap for larger hidden sizes.
        return int(min(max(need, 32 * 1024 * 1024), 56 * 1024 * 1024))

    # ------------------------------------------------------------- the kernel
    def _run(self, slab, states, emit_sequences=True):
        """Run all layers over all timesteps of `slab` in one pallas_call."""
        T, Bp, F0 = slab.shape
        L = len(self)
        TT = self._steps_per_block(T)
        n_chunks = T // TT

        const2 = lambda c: (0, 0)      # VMEM-resident across the whole grid
        step3 = lambda c: (c, 0, 0)    # per-chunk block
        resident = pl.Buffered(1)      # never changes -> single buffer

        in_specs = [pl.BlockSpec((TT, Bp, F0), step3)]
        inputs = [slab]
        for st in states:
            for arr in st:
                in_specs.append(
                    pl.BlockSpec(arr.shape, const2, pipeline_mode=resident))
                inputs.append(arr)
        for (W, b, Wr, br), nout in zip(self.params, self.layer_out):
            b_b = jnp.broadcast_to(b[None, :], (Bp, nout))          # hoist bias
            br_b = jnp.broadcast_to(br[None, :], (Bp, self.ro_pad))  # broadcast
            for arr in (W, b_b, Wr, br_b):
                in_specs.append(
                    pl.BlockSpec(arr.shape, const2, pipeline_mode=resident))
                inputs.append(arr)

        out_shapes, out_specs = [], []
        if emit_sequences:
            # One packed (S | U | RO) slab per layer per chunk.
            for nout in self.layer_out:
                wtot = 2 * _round_up(nout, 128) + self.ro_pad
                out_shapes.append(
                    jax.ShapeDtypeStruct((T, Bp, wtot), jnp.float32))
                out_specs.append(pl.BlockSpec((TT, Bp, wtot), step3))
        # Final carried state: constant-index blocks double as the live state.
        for nin, nout in zip(self.layer_in, self.layer_out):
            for shape in ((Bp, nin), (Bp, nin), (Bp, nout), (Bp, nout)):
                out_shapes.append(jax.ShapeDtypeStruct(shape, jnp.float32))
                out_specs.append(pl.BlockSpec(shape, const2))

        outs = pl.pallas_call(
            _make_decolle_kernel(self.layer_out, self.ro_pad, TT,
                                 emit_sequences),
            out_shape=tuple(out_shapes),
            grid_spec=pltpu.PrefetchScalarGridSpec(
                num_scalar_prefetch=0,
                grid=(n_chunks,),
                in_specs=in_specs,
                out_specs=tuple(out_specs)),
            compiler_params=pltpu.CompilerParams(
                dimension_semantics=("arbitrary",),
                vmem_limit_bytes=self._vmem_limit_bytes(
                    TT, Bp, F0, emit_sequences)),
        )(*inputs)
        outs = list(outs)

        idx = 0
        seq = None
        if emit_sequences:
            seq = []
            for nout in self.layer_out:
                slab_o = outs[idx]
                idx += 1
                w_s = _round_up(nout, 128)
                seq.append((slab_o[:, :, :nout],                       # S_seq
                            slab_o[:, :, w_s:w_s + nout],              # U_seq
                            slab_o[:, :, 2 * w_s:2 * w_s + self.ro_features]))
        new_states = []
        for _ in range(L):
            new_states.append(tuple(outs[idx: idx + 4]))  # (P, Q, R, S)
            idx += 4
        return seq, new_states

    # ------------------------------------------------------ DECOLLEBase API
    def init(self, data_batch, burnin):
        """DECOLLEBase.init: reset states, burn in on the first timesteps.

        Burn-in uses the sequence-free kernel variant: only the carried state
        is produced (no S/U/RO writebacks during burn-in).
        """
        if self.requires_init is False:
            return None
        slab, _, Bp = self._to_slab(data_batch)
        n_init = max(len(self), burnin)   # matches reference loop bound
        states = self.zero_states(Bp)     # l.state = None -> fresh zero state
        _, states = self._run(slab[:n_init], states, emit_sequences=False)
        return states

    def forward_sequence(self, data_batch, t_start, states):
        """Run timesteps [t_start, T) through all layers; return readouts."""
        slab, B, _ = self._to_slab(data_batch)
        seq, new_states = self._run(slab[t_start:], states,
                                    emit_sequences=True)
        # Last layer's readout, un-padded: (T', B, ro) -> (B, T', ro).
        ro_last = seq[-1][2][:, :B, :]
        readouts = jnp.transpose(ro_last, (1, 0, 2))
        return seq, new_states, readouts

    # TODO(synk): get_trainable_parameters / init_parameters / optimizer wiring
    # and device-query helpers (get_input_layer_device etc.) are framework
    # plumbing with no Pallas equivalent; intentionally not implemented.


if __name__ == "__main__":
    key = jax.random.PRNGKey(0)
    k_data, k_net = jax.random.split(key)

    B, T, C, H, W = 2, 8, 4, 16, 16
    hidden = [128, 128]
    n_readout = 16
    burnin = 4

    # Synthetic spike-like input.
    data_batch = (jax.random.uniform(k_data, (B, T, C, H, W), jnp.float32)
                  < 0.3).astype(jnp.float32)

    net = DECOLLEDense(k_net, in_features=C * H * W, hidden_sizes=hidden,
                       ro_features=n_readout)

    # DECOLLEBase.init: burn-in over the leading timesteps (one kernel call,
    # sequence outputs skipped).
    states = net.init(data_batch, burnin)

    # Remaining timesteps (one kernel call), collect last-layer readouts.
    seq, states, readouts = net.forward_sequence(data_batch, burnin, states)

    jax.block_until_ready(readouts)
    assert readouts.shape == (B, T - burnin, n_readout)
    assert bool(jnp.all(jnp.isfinite(readouts)))
    assert seq[-1][0].shape == (T - burnin, net._pad_batch(B), hidden[-1])
    print("KERNEL_OK")
</pallas_src>

<mosaic_0001>
module attributes {stable_mosaic.version = 11 : i64} {
  func.func @kernel(%arg0: i32, %arg1: memref<4x8x1024xf32, #tpu.memory_space<vmem>>, %arg2: memref<8x1024xf32, #tpu.memory_space<vmem>>, %arg3: memref<8x1024xf32, #tpu.memory_space<vmem>>, %arg4: memref<8x128xf32, #tpu.memory_space<vmem>>, %arg5: memref<8x128xf32, #tpu.memory_space<vmem>>, %arg6: memref<8x128xf32, #tpu.memory_space<vmem>>, %arg7: memref<8x128xf32, #tpu.memory_space<vmem>>, %arg8: memref<8x128xf32, #tpu.memory_space<vmem>>, %arg9: memref<8x128xf32, #tpu.memory_space<vmem>>, %arg10: memref<1024x128xbf16, #tpu.memory_space<vmem>>, %arg11: memref<8x128xf32, #tpu.memory_space<vmem>>, %arg12: memref<128x128xbf16, #tpu.memory_space<vmem>>, %arg13: memref<8x128xf32, #tpu.memory_space<vmem>>, %arg14: memref<128x128xbf16, #tpu.memory_space<vmem>>, %arg15: memref<8x128xf32, #tpu.memory_space<vmem>>, %arg16: memref<128x128xbf16, #tpu.memory_space<vmem>>, %arg17: memref<8x128xf32, #tpu.memory_space<vmem>>, %arg18: memref<8x1024xf32, #tpu.memory_space<vmem>>, %arg19: memref<8x1024xf32, #tpu.memory_space<vmem>>, %arg20: memref<8x128xf32, #tpu.memory_space<vmem>>, %arg21: memref<8x128xf32, #tpu.memory_space<vmem>>, %arg22: memref<8x128xf32, #tpu.memory_space<vmem>>, %arg23: memref<8x128xf32, #tpu.memory_space<vmem>>, %arg24: memref<8x128xf32, #tpu.memory_space<vmem>>, %arg25: memref<8x128xf32, #tpu.memory_space<vmem>>) attributes {dimension_semantics = [#tpu.dimension_semantics<arbitrary>], iteration_bounds = array<i64: 1>, scalar_prefetch = 0 : i64, scratch_operands = 0 : i64, tpu.core_type = #tpu.core_type<tc>, window_params = [{transform_indices = @transform_0, window_bounds = array<i64: 4, 8, 1024>}, {pipeline_mode = #tpu.pipeline_mode<synchronous>, transform_indices = @transform_1, window_bounds = array<i64: 8, 1024>}, {pipeline_mode = #tpu.pipeline_mode<synchronous>, transform_indices = @transform_2, window_bounds = array<i64: 8, 1024>}, {pipeline_mode = #tpu.pipeline_mode<synchronous>, transform_indices = @transform_3, window_bounds = array<i64: 8, 128>}, {pipeline_mode = #tpu.pipeline_mode<synchronous>, transform_indices = @transform_4, window_bounds = array<i64: 8, 128>}, {pipeline_mode = #tpu.pipeline_mode<synchronous>, transform_indices = @transform_5, window_bounds = array<i64: 8, 128>}, {pipeline_mode = #tpu.pipeline_mode<synchronous>, transform_indices = @transform_6, window_bounds = array<i64: 8, 128>}, {pipeline_mode = #tpu.pipeline_mode<synchronous>, transform_indices = @transform_7, window_bounds = array<i64: 8, 128>}, {pipeline_mode = #tpu.pipeline_mode<synchronous>, transform_indices = @transform_8, window_bounds = array<i64: 8, 128>}, {pipeline_mode = #tpu.pipeline_mode<synchronous>, transform_indices = @transform_9, window_bounds = array<i64: 1024, 128>}, {pipeline_mode = #tpu.pipeline_mode<synchronous>, transform_indices = @transform_10, window_bounds = array<i64: 8, 128>}, {pipeline_mode = #tpu.pipeline_mode<synchronous>, transform_indices = @transform_11, window_bounds = array<i64: 128, 128>}, {pipeline_mode = #tpu.pipeline_mode<synchronous>, transform_indices = @transform_12, window_bounds = array<i64: 8, 128>}, {pipeline_mode = #tpu.pipeline_mode<synchronous>, transform_indices = @transform_13, window_bounds = array<i64: 128, 128>}, {pipeline_mode = #tpu.pipeline_mode<synchronous>, transform_indices = @transform_14, window_bounds = array<i64: 8, 128>}, {pipeline_mode = #tpu.pipeline_mode<synchronous>, transform_indices = @transform_15, window_bounds = array<i64: 128, 128>}, {pipeline_mode = #tpu.pipeline_mode<synchronous>, transform_indices = @transform_16, window_bounds = array<i64: 8, 128>}, {pipeline_mode = #tpu.pipeline_mode<synchronous>, transform_indices = @transform_17, window_bounds = array<i64: 8, 1024>}, {pipeline_mode = #tpu.pipeline_mode<synchronous>, transform_indices = @transform_18, window_bounds = array<i64: 8, 1024>}, {pipeline_mode = #tpu.pipeline_mode<synchronous>, transform_indices = @transform_19, window_bounds = array<i64: 8, 128>}, {pipeline_mode = #tpu.pipeline_mode<synchronous>, transform_indices = @transform_20, window_bounds = array<i64: 8, 128>}, {pipeline_mode = #tpu.pipeline_mode<synchronous>, transform_indices = @transform_21, window_bounds = array<i64: 8, 128>}, {pipeline_mode = #tpu.pipeline_mode<synchronous>, transform_indices = @transform_22, window_bounds = array<i64: 8, 128>}, {pipeline_mode = #tpu.pipeline_mode<synchronous>, transform_indices = @transform_23, window_bounds = array<i64: 8, 128>}, {pipeline_mode = #tpu.pipeline_mode<synchronous>, transform_indices = @transform_24, window_bounds = array<i64: 8, 128>}]} {
    %c0_i32 = arith.constant 0 : i32
    %0 = arith.cmpi eq, %arg0, %c0_i32 : i32
    %1 = arith.extui %0 : i1 to i32
    %c0_i32_0 = arith.constant 0 : i32
    %2 = arith.cmpi ne, %1, %c0_i32_0 : i32
    scf.if %2 {
      %c0_232 = arith.constant 0 : index
      %c0_233 = arith.constant 0 : index
      %275 = vector.load %arg2[%c0_232, %c0_233] : memref<8x1024xf32, #tpu.memory_space<vmem>>, vector<8x1024xf32>
      %c0_234 = arith.constant 0 : index
      %c0_235 = arith.constant 0 : index
      %276 = vector.load %arg18[%c0_234, %c0_235] : memref<8x1024xf32, #tpu.memory_space<vmem>>, vector<8x1024xf32>
      tpu.vector_store %arg18[%c0_234, %c0_235], %275 {strides = array<i32>} : memref<8x1024xf32, #tpu.memory_space<vmem>>, vector<8x1024xf32>,
      %c0_236 = arith.constant 0 : index
      %c0_237 = arith.constant 0 : index
      %277 = vector.load %arg3[%c0_236, %c0_237] : memref<8x1024xf32, #tpu.memory_space<vmem>>, vector<8x1024xf32>
      %c0_238 = arith.constant 0 : index
      %c0_239 = arith.constant 0 : index
      %278 = vector.load %arg19[%c0_238, %c0_239] : memref<8x1024xf32, #tpu.memory_space<vmem>>, vector<8x1024xf32>
      tpu.vector_store %arg19[%c0_238, %c0_239], %277 {strides = array<i32>} : memref<8x1024xf32, #tpu.memory_space<vmem>>, vector<8x1024xf32>,
      %c0_240 = arith.constant 0 : index
      %c0_241 = arith.constant 0 : index
      %279 = vector.load %arg4[%c0_240, %c0_241] : memref<8x128xf32, #tpu.memory_space<vmem>>, vector<8x128xf32>
      %c0_242 = arith.constant 0 : index
      %c0_243 = arith.constant 0 : index
      %280 = vector.load %arg20[%c0_242, %c0_243] : memref<8x128xf32, #tpu.memory_space<vmem>>, vector<8x128xf32>
      tpu.vector_store %arg20[%c0_242, %c0_243], %279 {strides = array<i32>} : memref<8x128xf32, #tpu.memory_space<vmem>>, vector<8x128xf32>,
      %c0_244 = arith.constant 0 : index
      %c0_245 = arith.constant 0 : index
      %281 = vector.load %arg5[%c0_244, %c0_245] : memref<8x128xf32, #tpu.memory_space<vmem>>, vector<8x128xf32>
      %c0_246 = arith.constant 0 : index
      %c0_247 = arith.constant 0 : index
      %282 = vector.load %arg21[%c0_246, %c0_247] : memref<8x128xf32, #tpu.memory_space<vmem>>, vector<8x128xf32>
      tpu.vector_store %arg21[%c0_246, %c0_247], %281 {strides = array<i32>} : memref<8x128xf32, #tpu.memory_space<vmem>>, vector<8x128xf32>,
      %c0_248 = arith.constant 0 : index
      %c0_249 = arith.constant 0 : index
      %283 = vector.load %arg6[%c0_248, %c0_249] : memref<8x128xf32, #tpu.memory_space<vmem>>, vector<8x128xf32>
      %c0_250 = arith.constant 0 : index
      %c0_251 = arith.constant 0 : index
      %284 = vector.load %arg22[%c0_250, %c0_251] : memref<8x128xf32, #tpu.memory_space<vmem>>, vector<8x128xf32>
      tpu.vector_store %arg22[%c0_250, %c0_251], %283 {strides = array<i32>} : memref<8x128xf32, #tpu.memory_space<vmem>>, vector<8x128xf32>,
      %c0_252 = arith.constant 0 : index
      %c0_253 = arith.constant 0 : index
      %285 = vector.load %arg7[%c0_252, %c0_253] : memref<8x128xf32, #tpu.memory_space<vmem>>, vector<8x128xf32>
      %c0_254 = arith.constant 0 : index
      %c0_255 = arith.constant 0 : index
      %286 = vector.load %arg23[%c0_254, %c0_255] : memref<8x128xf32, #tpu.memory_space<vmem>>, vector<8x128xf32>
      tpu.vector_store %arg23[%c0_254, %c0_255], %285 {strides = array<i32>} : memref<8x128xf32, #tpu.memory_space<vmem>>, vector<8x128xf32>,
      %c0_256 = arith.constant 0 : index
      %c0_257 = arith.constant 0 : index
      %287 = vector.load %arg8[%c0_256, %c0_257] : memref<8x128xf32, #tpu.memory_space<vmem>>, vector<8x128xf32>
      %c0_258 = arith.constant 0 : index
      %c0_259 = arith.constant 0 : index
      %288 = vector.load %arg24[%c0_258, %c0_259] : memref<8x128xf32, #tpu.memory_space<vmem>>, vector<8x128xf32>
      tpu.vector_store %arg24[%c0_258, %c0_259], %287 {strides = array<i32>} : memref<8x128xf32, #tpu.memory_space<vmem>>, vector<8x128xf32>,
      %c0_260 = arith.constant 0 : index
      %c0_261 = arith.constant 0 : index
      %289 = vector.load %arg9[%c0_260, %c0_261] : memref<8x128xf32, #tpu.memory_space<vmem>>, vector<8x128xf32>
      %c0_262 = arith.constant 0 : index
      %c0_263 = arith.constant 0 : index
      %290 = vector.load %arg25[%c0_262, %c0_263] : memref<8x128xf32, #tpu.memory_space<vmem>>, vector<8x128xf32>
      tpu.vector_store %arg25[%c0_262, %c0_263], %289 {strides = array<i32>} : memref<8x128xf32, #tpu.memory_space<vmem>>, vector<8x128xf32>,
    } else {
    }
    %c0 = arith.constant 0 : index
    %c0_1 = arith.constant 0 : index
    %c0_2 = arith.constant 0 : index
    %3 = vector.load %arg1[%c0, %c0_1, %c0_2] : memref<4x8x1024xf32, #tpu.memory_space<vmem>>, vector<1x8x1024xf32>
    %4 = vector.shape_cast %3 : vector<1x8x1024xf32> to vector<8x1024xf32>
    %c0_3 = arith.constant 0 : index
    %c0_4 = arith.constant 0 : index
    %5 = vector.load %arg19[%c0_3, %c0_4] : memref<8x1024xf32, #tpu.memory_space<vmem>>, vector<8x1024xf32>
    %cst = arith.constant 8.500000e-01 : f32
    %6 = vector.broadcast %cst : f32 to vector<8x1024xf32>
    %7 = arith.mulf %6, %5 : vector<8x1024xf32>
    %cst_5 = arith.constant 6.66666651 : f32
    %8 = vector.broadcast %cst_5 : f32 to vector<8x1024xf32>
    %9 = arith.mulf %8, %4 : vector<8x1024xf32>
    %10 = arith.addf %7, %9 : vector<8x1024xf32>
    %c0_6 = arith.constant 0 : index
    %c0_7 = arith.constant 0 : index
    %11 = vector.load %arg18[%c0_6, %c0_7] : memref<8x1024xf32, #tpu.memory_space<vmem>>, vector<8x1024xf32>
    %cst_8 = arith.constant 0.899999976 : f32
    %12 = vector.broadcast %cst_8 : f32 to vector<8x1024xf32>
    %13 = arith.mulf %12, %11 : vector<8x1024xf32>
    %cst_9 = arith.constant 1.000000e+01 : f32
    %14 = vector.broadcast %cst_9 : f32 to vector<8x1024xf32>
    %15 = arith.mulf %14, %10 : vector<8x1024xf32>
    %16 = arith.addf %13, %15 : vector<8x1024xf32>
    %c0_10 = arith.constant 0 : index
    %c0_11 = arith.constant 0 : index
    %17 = vector.load %arg20[%c0_10, %c0_11] : memref<8x128xf32, #tpu.memory_space<vmem>>, vector<8x128xf32>
    %cst_12 = arith.constant 6.500000e-01 : f32
    %18 = vector.broadcast %cst_12 : f32 to vector<8x128xf32>
    %19 = arith.mulf %18, %17 : vector<8x128xf32>
    %c0_13 = arith.constant 0 : index
    %c0_14 = arith.constant 0 : index
    %20 = vector.load %arg21[%c0_13, %c0_14] : memref<8x128xf32, #tpu.memory_space<vmem>>, vector<8x128xf32>
    %cst_15 = arith.constant 1.000000e+00 : f32
    %21 = vector.broadcast %cst_15 : f32 to vector<8x128xf32>
    %22 = arith.mulf %21, %20 : vector<8x128xf32>
    %23 = arith.subf %19, %22 : vector<8x128xf32>
    %24 = arith.truncf %16 : vector<8x1024xf32> to vector<8x1024xbf16>
    %c0_16 = arith.constant 0 : index
    %c0_17 = arith.constant 0 : index
    %25 = vector.load %arg10[%c0_16, %c0_17] : memref<1024x128xbf16, #tpu.memory_space<vmem>>, vector<1024x128xbf16>
    %cst_18 = arith.constant dense<0.000000e+00> : vector<8x128xf32>
    %26 = tpu.matmul %24, %25, %cst_18 {dimension_numbers = #tpu.dot_dimension_numbers<[1], [0], [0], [1], [0, 0, 1, 1], [], []>} : vector<8x1024xbf16>, vector<1024x128xbf16>, vector<8x128xf32> -> vector<8x128xf32>
    %c0_19 = arith.constant 0 : index
    %c0_20 = arith.constant 0 : index
    %27 = vector.load %arg11[%c0_19, %c0_20] : memref<8x128xf32, #tpu.memory_space<vmem>>, vector<8x128xf32>
    %28 = arith.addf %26, %27 : vector<8x128xf32>
    %29 = arith.addf %28, %23 : vector<8x128xf32>
    %cst_21 = arith.constant 0.000000e+00 : f32
    %30 = vector.broadcast %cst_21 : f32 to vector<8x128xf32>
    %31 = arith.cmpf ogt, %29, %30 : vector<8x128xf32>
    %32 = arith.extui %31 : vector<8x128xi1> to vector<8x128xi32>
    %33 = arith.sitofp %32 : vector<8x128xi32> to vector<8x128xf32>
    %c0_22 = arith.constant 0 : index
    %c0_23 = arith.constant 0 : index
    %34 = vector.load %arg19[%c0_22, %c0_23] : memref<8x1024xf32, #tpu.memory_space<vmem>>, vector<8x1024xf32>
    tpu.vector_store %arg19[%c0_22, %c0_23], %10 {strides = array<i32>} : memref<8x1024xf32, #tpu.memory_space<vmem>>, vector<8x1024xf32>,
    %c0_24 = arith.constant 0 : index
    %c0_25 = arith.constant 0 : index
    %35 = vector.load %arg18[%c0_24, %c0_25] : memref<8x1024xf32, #tpu.memory_space<vmem>>, vector<8x1024xf32>
    tpu.vector_store %arg18[%c0_24, %c0_25], %16 {strides = array<i32>} : memref<8x1024xf32, #tpu.memory_space<vmem>>, vector<8x1024xf32>,
    %c0_26 = arith.constant 0 : index
    %c0_27 = arith.constant 0 : index
    %36 = vector.load %arg20[%c0_26, %c0_27] : memref<8x128xf32, #tpu.memory_space<vmem>>, vector<8x128xf32>
    tpu.vector_store %arg20[%c0_26, %c0_27], %23 {strides = array<i32>} : memref<8x128xf32, #tpu.memory_space<vmem>>, vector<8x128xf32>,
    %c0_28 = arith.constant 0 : index
    %c0_29 = arith.constant 0 : index
    %37 = vector.load %arg21[%c0_28, %c0_29] : memref<8x128xf32, #tpu.memory_space<vmem>>, vector<8x128xf32>
    tpu.vector_store %arg21[%c0_28, %c0_29], %33 {strides = array<i32>} : memref<8x128xf32, #tpu.memory_space<vmem>>, vector<8x128xf32>,
    %c0_30 = arith.constant 0 : index
    %c0_31 = arith.constant 0 : index
    %38 = vector.load %arg23[%c0_30, %c0_31] : memref<8x128xf32, #tpu.memory_space<vmem>>, vector<8x128xf32>
    %cst_32 = arith.constant 8.500000e-01 : f32
    %39 = vector.broadcast %cst_32 : f32 to vector<8x128xf32>
    %40 = arith.mulf %39, %38 : vector<8x128xf32>
    %cst_33 = arith.constant 6.66666651 : f32
    %41 = vector.broadcast %cst_33 : f32 to vector<8x128xf32>
    %42 = arith.mulf %41, %33 : vector<8x128xf32>
    %43 = arith.addf %40, %42 : vector<8x128xf32>
    %c0_34 = arith.constant 0 : index
    %c0_35 = arith.constant 0 : index
    %44 = vector.load %arg22[%c0_34, %c0_35] : memref<8x128xf32, #tpu.memory_space<vmem>>, vector<8x128xf32>
    %cst_36 = arith.constant 0.899999976 : f32
    %45 = vector.broadcast %cst_36 : f32 to vector<8x128xf32>
    %46 = arith.mulf %45, %44 : vector<8x128xf32>
    %cst_37 = arith.constant 1.000000e+01 : f32
    %47 = vector.broadcast %cst_37 : f32 to vector<8x128xf32>
    %48 = arith.mulf %47, %43 : vector<8x128xf32>
    %49 = arith.addf %46, %48 : vector<8x128xf32>
    %c0_38 = arith.constant 0 : index
    %c0_39 = arith.constant 0 : index
    %50 = vector.load %arg24[%c0_38, %c0_39] : memref<8x128xf32, #tpu.memory_space<vmem>>, vector<8x128xf32>
    %cst_40 = arith.constant 6.500000e-01 : f32
    %51 = vector.broadcast %cst_40 : f32 to vector<8x128xf32>
    %52 = arith.mulf %51, %50 : vector<8x128xf32>
    %c0_41 = arith.constant 0 : index
    %c0_42 = arith.constant 0 : index
    %53 = vector.load %arg25[%c0_41, %c0_42] : memref<8x128xf32, #tpu.memory_space<vmem>>, vector<8x128xf32>
    %cst_43 = arith.constant 1.000000e+00 : f32
    %54 = vector.broadcast %cst_43 : f32 to vector<8x128xf32>
    %55 = arith.mulf %54, %53 : vector<8x128xf32>
    %56 = arith.subf %52, %55 : vector<8x128xf32>
    %57 = arith.truncf %49 : vector<8x128xf32> to vector<8x128xbf16>
    %c0_44 = arith.constant 0 : index
    %c0_45 = arith.constant 0 : index
    %58 = vector.load %arg14[%c0_44, %c0_45] : memref<128x128xbf16, #tpu.memory_space<vmem>>, vector<128x128xbf16>
    %cst_46 = arith.constant dense<0.000000e+00> : vector<8x128xf32>
    %59 = tpu.matmul %57, %58, %cst_46 {dimension_numbers = #tpu.dot_dimension_numbers<[1], [0], [0], [1], [0, 0, 1, 1], [], []>} : vector<8x128xbf16>, vector<128x128xbf16>, vector<8x128xf32> -> vector<8x128xf32>
    %c0_47 = arith.constant 0 : index
    %c0_48 = arith.constant 0 : index
    %60 = vector.load %arg15[%c0_47, %c0_48] : memref<8x128xf32, #tpu.memory_space<vmem>>, vector<8x128xf32>
    %61 = arith.addf %59, %60 : vector<8x128xf32>
    %62 = arith.addf %61, %56 : vector<8x128xf32>
    %cst_49 = arith.constant 0.000000e+00 : f32
    %63 = vector.broadcast %cst_49 : f32 to vector<8x128xf32>
    %64 = arith.cmpf ogt, %62, %63 : vector<8x128xf32>
    %65 = arith.extui %64 : vector<8x128xi1> to vector<8x128xi32>
    %66 = arith.sitofp %65 : vector<8x128xi32> to vector<8x128xf32>
    %c0_50 = arith.constant 0 : index
    %c0_51 = arith.constant 0 : index
    %67 = vector.load %arg23[%c0_50, %c0_51] : memref<8x128xf32, #tpu.memory_space<vmem>>, vector<8x128xf32>
    tpu.vector_store %arg23[%c0_50, %c0_51], %43 {strides = array<i32>} : memref<8x128xf32, #tpu.memory_space<vmem>>, vector<8x128xf32>,
    %c0_52 = arith.constant 0 : index
    %c0_53 = arith.constant 0 : index
    %68 = vector.load %arg22[%c0_52, %c0_53] : memref<8x128xf32, #tpu.memory_space<vmem>>, vector<8x128xf32>
    tpu.vector_store %arg22[%c0_52, %c0_53], %49 {strides = array<i32>} : memref<8x128xf32, #tpu.memory_space<vmem>>, vector<8x128xf32>,
    %c0_54 = arith.constant 0 : index
    %c0_55 = arith.constant 0 : index
    %69 = vector.load %arg24[%c0_54, %c0_55] : memref<8x128xf32, #tpu.memory_space<vmem>>, vector<8x128xf32>
    tpu.vector_store %arg24[%c0_54, %c0_55], %56 {strides = array<i32>} : memref<8x128xf32, #tpu.memory_space<vmem>>, vector<8x128xf32>,
    %c0_56 = arith.constant 0 : index
    %c0_57 = arith.constant 0 : index
    %70 = vector.load %arg25[%c0_56, %c0_57] : memref<8x128xf32, #tpu.memory_space<vmem>>, vector<8x128xf32>
    tpu.vector_store %arg25[%c0_56, %c0_57], %66 {strides = array<i32>} : memref<8x128xf32, #tpu.memory_space<vmem>>, vector<8x128xf32>,
    %c1 = arith.constant 1 : index
    %c0_58 = arith.constant 0 : index
    %c0_59 = arith.constant 0 : index
    %71 = vector.load %arg1[%c1, %c0_58, %c0_59] : memref<4x8x1024xf32, #tpu.memory_space<vmem>>, vector<1x8x1024xf32>
    %72 = vector.shape_cast %71 : vector<1x8x1024xf32> to vector<8x1024xf32>
    %c0_60 = arith.constant 0 : index
    %c0_61 = arith.constant 0 : index
    %73 = vector.load %arg19[%c0_60, %c0_61] : memref<8x1024xf32, #tpu.memory_space<vmem>>, vector<8x1024xf32>
    %cst_62 = arith.constant 8.500000e-01 : f32
    %74 = vector.broadcast %cst_62 : f32 to vector<8x1024xf32>
    %75 = arith.mulf %74, %73 : vector<8x1024xf32>
    %cst_63 = arith.constant 6.66666651 : f32
    %76 = vector.broadcast %cst_63 : f32 to vector<8x1024xf32>
    %77 = arith.mulf %76, %72 : vector<8x1024xf32>
    %78 = arith.addf %75, %77 : vector<8x1024xf32>
    %c0_64 = arith.constant 0 : index
    %c0_65 = arith.constant 0 : index
    %79 = vector.load %arg18[%c0_64, %c0_65] : memref<8x1024xf32, #tpu.memory_space<vmem>>, vector<8x1024xf32>
    %cst_66 = arith.constant 0.899999976 : f32
    %80 = vector.broadcast %cst_66 : f32 to vector<8x1024xf32>
    %81 = arith.mulf %80, %79 : vector<8x1024xf32>
    %cst_67 = arith.constant 1.000000e+01 : f32
    %82 = vector.broadcast %cst_67 : f32 to vector<8x1024xf32>
    %83 = arith.mulf %82, %78 : vector<8x1024xf32>
    %84 = arith.addf %81, %83 : vector<8x1024xf32>
    %c0_68 = arith.constant 0 : index
    %c0_69 = arith.constant 0 : index
    %85 = vector.load %arg20[%c0_68, %c0_69] : memref<8x128xf32, #tpu.memory_space<vmem>>, vector<8x128xf32>
    %cst_70 = arith.constant 6.500000e-01 : f32
    %86 = vector.broadcast %cst_70 : f32 to vector<8x128xf32>
    %87 = arith.mulf %86, %85 : vector<8x128xf32>
    %c0_71 = arith.constant 0 : index
    %c0_72 = arith.constant 0 : index
    %88 = vector.load %arg21[%c0_71, %c0_72] : memref<8x128xf32, #tpu.memory_space<vmem>>, vector<8x128xf32>
    %cst_73 = arith.constant 1.000000e+00 : f32
    %89 = vector.broadcast %cst_73 : f32 to vector<8x128xf32>
    %90 = arith.mulf %89, %88 : vector<8x128xf32>
    %91 = arith.subf %87, %90 : vector<8x128xf32>
    %92 = arith.truncf %84 : vector<8x1024xf32> to vector<8x1024xbf16>
    %c0_74 = arith.constant 0 : index
    %c0_75 = arith.constant 0 : index
    %93 = vector.load %arg10[%c0_74, %c0_75] : memref<1024x128xbf16, #tpu.memory_space<vmem>>, vector<1024x128xbf16>
    %cst_76 = arith.constant dense<0.000000e+00> : vector<8x128xf32>
    %94 = tpu.matmul %92, %93, %cst_76 {dimension_numbers = #tpu.dot_dimension_numbers<[1], [0], [0], [1], [0, 0, 1, 1], [], []>} : vector<8x1024xbf16>, vector<1024x128xbf16>, vector<8x128xf32> -> vector<8x128xf32>
    %c0_77 = arith.constant 0 : index
    %c0_78 = arith.constant 0 : index
    %95 = vector.load %arg11[%c0_77, %c0_78] : memref<8x128xf32, #tpu.memory_space<vmem>>, vector<8x128xf32>
    %96 = arith.addf %94, %95 : vector<8x128xf32>
    %97 = arith.addf %96, %91 : vector<8x128xf32>
    %cst_79 = arith.constant 0.000000e+00 : f32
    %98 = vector.broadcast %cst_79 : f32 to vector<8x128xf32>
    %99 = arith.cmpf ogt, %97, %98 : vector<8x128xf32>
    %100 = arith.extui %99 : vector<8x128xi1> to vector<8x128xi32>
    %101 = arith.sitofp %100 : vector<8x128xi32> to vector<8x128xf32>
    %c0_80 = arith.constant 0 : index
    %c0_81 = arith.constant 0 : index
    %102 = vector.load %arg19[%c0_80, %c0_81] : memref<8x1024xf32, #tpu.memory_space<vmem>>, vector<8x1024xf32>
    tpu.vector_store %arg19[%c0_80, %c0_81], %78 {strides = array<i32>} : memref<8x1024xf32, #tpu.memory_space<vmem>>, vector<8x1024xf32>,
    %c0_82 = arith.constant 0 : index
    %c0_83 = arith.constant 0 : index
    %103 = vector.load %arg18[%c0_82, %c0_83] : memref<8x1024xf32, #tpu.memory_space<vmem>>, vector<8x1024xf32>
    tpu.vector_store %arg18[%c0_82, %c0_83], %84 {strides = array<i32>} : memref<8x1024xf32, #tpu.memory_space<vmem>>, vector<8x1024xf32>,
    %c0_84 = arith.constant 0 : index
    %c0_85 = arith.constant 0 : index
    %104 = vector.load %arg20[%c0_84, %c0_85] : memref<8x128xf32, #tpu.memory_space<vmem>>, vector<8x128xf32>
    tpu.vector_store %arg20[%c0_84, %c0_85], %91 {strides = array<i32>} : memref<8x128xf32, #tpu.memory_space<vmem>>, vector<8x128xf32>,
    %c0_86 = arith.constant 0 : index
    %c0_87 = arith.constant 0 : index
    %105 = vector.load %arg21[%c0_86, %c0_87] : memref<8x128xf32, #tpu.memory_space<vmem>>, vector<8x128xf32>
    tpu.vector_store %arg21[%c0_86, %c0_87], %101 {strides = array<i32>} : memref<8x128xf32, #tpu.memory_space<vmem>>, vector<8x128xf32>,
    %c0_88 = arith.constant 0 : index
    %c0_89 = arith.constant 0 : index
    %106 = vector.load %arg23[%c0_88, %c0_89] : memref<8x128xf32, #tpu.memory_space<vmem>>, vector<8x128xf32>
    %cst_90 = arith.constant 8.500000e-01 : f32
    %107 = vector.broadcast %cst_90 : f32 to vector<8x128xf32>
    %108 = arith.mulf %107, %106 : vector<8x128xf32>
    %cst_91 = arith.constant 6.66666651 : f32
    %109 = vector.broadcast %cst_91 : f32 to vector<8x128xf32>
    %110 = arith.mulf %109, %101 : vector<8x128xf32>
    %111 = arith.addf %108, %110 : vector<8x128xf32>
    %c0_92 = arith.constant 0 : index
    %c0_93 = arith.constant 0 : index
    %112 = vector.load %arg22[%c0_92, %c0_93] : memref<8x128xf32, #tpu.memory_space<vmem>>, vector<8x128xf32>
    %cst_94 = arith.constant 0.899999976 : f32
    %113 = vector.broadcast %cst_94 : f32 to vector<8x128xf32>
    %114 = arith.mulf %113, %112 : vector<8x128xf32>
    %cst_95 = arith.constant 1.000000e+01 : f32
    %115 = vector.broadcast %cst_95 : f32 to vector<8x128xf32>
    %116 = arith.mulf %115, %111 : vector<8x128xf32>
    %117 = arith.addf %114, %116 : vector<8x128xf32>
    %c0_96 = arith.constant 0 : index
    %c0_97 = arith.constant 0 : index
    %118 = vector.load %arg24[%c0_96, %c0_97] : memref<8x128xf32, #tpu.memory_space<vmem>>, vector<8x128xf32>
    %cst_98 = arith.constant 6.500000e-01 : f32
    %119 = vector.broadcast %cst_98 : f32 to vector<8x128xf32>
    %120 = arith.mulf %119, %118 : vector<8x128xf32>
    %c0_99 = arith.constant 0 : index
    %c0_100 = arith.constant 0 : index
    %121 = vector.load %arg25[%c0_99, %c0_100] : memref<8x128xf32, #tpu.memory_space<vmem>>, vector<8x128xf32>
    %cst_101 = arith.constant 1.000000e+00 : f32
    %122 = vector.broadcast %cst_101 : f32 to vector<8x128xf32>
    %123 = arith.mulf %122, %121 : vector<8x128xf32>
    %124 = arith.subf %120, %123 : vector<8x128xf32>
    %125 = arith.truncf %117 : vector<8x128xf32> to vector<8x128xbf16>
    %c0_102 = arith.constant 0 : index
    %c0_103 = arith.constant 0 : index
    %126 = vector.load %arg14[%c0_102, %c0_103] : memref<128x128xbf16, #tpu.memory_space<vmem>>, vector<128x128xbf16>
    %cst_104 = arith.constant dense<0.000000e+00> : vector<8x128xf32>
    %127 = tpu.matmul %125, %126, %cst_104 {dimension_numbers = #tpu.dot_dimension_numbers<[1], [0], [0], [1], [0, 0, 1, 1], [], []>} : vector<8x128xbf16>, vector<128x128xbf16>, vector<8x128xf32> -> vector<8x128xf32>
    %c0_105 = arith.constant 0 : index
    %c0_106 = arith.constant 0 : index
    %128 = vector.load %arg15[%c0_105, %c0_106] : memref<8x128xf32, #tpu.memory_space<vmem>>, vector<8x128xf32>
    %129 = arith.addf %127, %128 : vector<8x128xf32>
    %130 = arith.addf %129, %124 : vector<8x128xf32>
    %cst_107 = arith.constant 0.000000e+00 : f32
    %131 = vector.broadcast %cst_107 : f32 to vector<8x128xf32>
    %132 = arith.cmpf ogt, %130, %131 : vector<8x128xf32>
    %133 = arith.extui %132 : vector<8x128xi1> to vector<8x128xi32>
    %134 = arith.sitofp %133 : vector<8x128xi32> to vector<8x128xf32>
    %c0_108 = arith.constant 0 : index
    %c0_109 = arith.constant 0 : index
    %135 = vector.load %arg23[%c0_108, %c0_109] : memref<8x128xf32, #tpu.memory_space<vmem>>, vector<8x128xf32>
    tpu.vector_store %arg23[%c0_108, %c0_109], %111 {strides = array<i32>} : memref<8x128xf32, #tpu.memory_space<vmem>>, vector<8x128xf32>,
    %c0_110 = arith.constant 0 : index
    %c0_111 = arith.constant 0 : index
    %136 = vector.load %arg22[%c0_110, %c0_111] : memref<8x128xf32, #tpu.memory_space<vmem>>, vector<8x128xf32>
    tpu.vector_store %arg22[%c0_110, %c0_111], %117 {strides = array<i32>} : memref<8x128xf32, #tpu.memory_space<vmem>>, vector<8x128xf32>,
    %c0_112 = arith.constant 0 : index
    %c0_113 = arith.constant 0 : index
    %137 = vector.load %arg24[%c0_112, %c0_113] : memref<8x128xf32, #tpu.memory_space<vmem>>, vector<8x128xf32>
    tpu.vector_store %arg24[%c0_112, %c0_113], %124 {strides = array<i32>} : memref<8x128xf32, #tpu.memory_space<vmem>>, vector<8x128xf32>,
    %c0_114 = arith.constant 0 : index
    %c0_115 = arith.constant 0 : index
    %138 = vector.load %arg25[%c0_114, %c0_115] : memref<8x128xf32, #tpu.memory_space<vmem>>, vector<8x128xf32>
    tpu.vector_store %arg25[%c0_114, %c0_115], %134 {strides = array<i32>} : memref<8x128xf32, #tpu.memory_space<vmem>>, vector<8x128xf32>,
    %c2 = arith.constant 2 : index
    %c0_116 = arith.constant 0 : index
    %c0_117 = arith.constant 0 : index
    %139 = vector.load %arg1[%c2, %c0_116, %c0_117] : memref<4x8x1024xf32, #tpu.memory_space<vmem>>, vector<1x8x1024xf32>
    %140 = vector.shape_cast %139 : vector<1x8x1024xf32> to vector<8x1024xf32>
    %c0_118 = arith.constant 0 : index
    %c0_119 = arith.constant 0 : index
    %141 = vector.load %arg19[%c0_118, %c0_119] : memref<8x1024xf32, #tpu.memory_space<vmem>>, vector<8x1024xf32>
    %cst_120 = arith.constant 8.500000e-01 : f32
    %142 = vector.broadcast %cst_120 : f32 to vector<8x1024xf32>
    %143 = arith.mulf %142, %141 : vector<8x1024xf32>
    %cst_121 = arith.constant 6.66666651 : f32
    %144 = vector.broadcast %cst_121 : f32 to vector<8x1024xf32>
    %145 = arith.mulf %144, %140 : vector<8x1024xf32>
    %146 = arith.addf %143, %145 : vector<8x1024xf32>
    %c0_122 = arith.constant 0 : index
    %c0_123 = arith.constant 0 : index
    %147 = vector.load %arg18[%c0_122, %c0_123] : memref<8x1024xf32, #tpu.memory_space<vmem>>, vector<8x1024xf32>
    %cst_124 = arith.constant 0.899999976 : f32
    %148 = vector.broadcast %cst_124 : f32 to vector<8x1024xf32>
    %149 = arith.mulf %148, %147 : vector<8x1024xf32>
    %cst_125 = arith.constant 1.000000e+01 : f32
    %150 = vector.broadcast %cst_125 : f32 to vector<8x1024xf32>
    %151 = arith.mulf %150, %146 : vector<8x1024xf32>
    %152 = arith.addf %149, %151 : vector<8x1024xf32>
    %c0_126 = arith.constant 0 : index
    %c0_127 = arith.constant 0 : index
    %153 = vector.load %arg20[%c0_126, %c0_127] : memref<8x128xf32, #tpu.memory_space<vmem>>, vector<8x128xf32>
    %cst_128 = arith.constant 6.500000e-01 : f32
    %154 = vector.broadcast %cst_128 : f32 to vector<8x128xf32>
    %155 = arith.mulf %154, %153 : vector<8x128xf32>
    %c0_129 = arith.constant 0 : index
    %c0_130 = arith.constant 0 : index
    %156 = vector.load %arg21[%c0_129, %c0_130] : memref<8x128xf32, #tpu.memory_space<vmem>>, vector<8x128xf32>
    %cst_131 = arith.constant 1.000000e+00 : f32
    %157 = vector.broadcast %cst_131 : f32 to vector<8x128xf32>
    %158 = arith.mulf %157, %156 : vector<8x128xf32>
    %159 = arith.subf %155, %158 : vector<8x128xf32>
    %160 = arith.truncf %152 : vector<8x1024xf32> to vector<8x1024xbf16>
    %c0_132 = arith.constant 0 : index
    %c0_133 = arith.constant 0 : index
    %161 = vector.load %arg10[%c0_132, %c0_133] : memref<1024x128xbf16, #tpu.memory_space<vmem>>, vector<1024x128xbf16>
    %cst_134 = arith.constant dense<0.000000e+00> : vector<8x128xf32>
    %162 = tpu.matmul %160, %161, %cst_134 {dimension_numbers = #tpu.dot_dimension_numbers<[1], [0], [0], [1], [0, 0, 1, 1], [], []>} : vector<8x1024xbf16>, vector<1024x128xbf16>, vector<8x128xf32> -> vector<8x128xf32>
    %c0_135 = arith.constant 0 : index
    %c0_136 = arith.constant 0 : index
    %163 = vector.load %arg11[%c0_135, %c0_136] : memref<8x128xf32, #tpu.memory_space<vmem>>, vector<8x128xf32>
    %164 = arith.addf %162, %163 : vector<8x128xf32>
    %165 = arith.addf %164, %159 : vector<8x128xf32>
    %cst_137 = arith.constant 0.000000e+00 : f32
    %166 = vector.broadcast %cst_137 : f32 to vector<8x128xf32>
    %167 = arith.cmpf ogt, %165, %166 : vector<8x128xf32>
    %168 = arith.extui %167 : vector<8x128xi1> to vector<8x128xi32>
    %169 = arith.sitofp %168 : vector<8x128xi32> to vector<8x128xf32>
    %c0_138 = arith.constant 0 : index
    %c0_139 = arith.constant 0 : index
    %170 = vector.load %arg19[%c0_138, %c0_139] : memref<8x1024xf32, #tpu.memory_space<vmem>>, vector<8x1024xf32>
    tpu.vector_store %arg19[%c0_138, %c0_139], %146 {strides = array<i32>} : memref<8x1024xf32, #tpu.memory_space<vmem>>, vector<8x1024xf32>,
    %c0_140 = arith.constant 0 : index
    %c0_141 = arith.constant 0 : index
    %171 = vector.load %arg18[%c0_140, %c0_141] : memref<8x1024xf32, #tpu.memory_space<vmem>>, vector<8x1024xf32>
    tpu.vector_store %arg18[%c0_140, %c0_141], %152 {strides = array<i32>} : memref<8x1024xf32, #tpu.memory_space<vmem>>, vector<8x1024xf32>,
    %c0_142 = arith.constant 0 : index
    %c0_143 = arith.constant 0 : index
    %172 = vector.load %arg20[%c0_142, %c0_143] : memref<8x128xf32, #tpu.memory_space<vmem>>, vector<8x128xf32>
    tpu.vector_store %arg20[%c0_142, %c0_143], %159 {strides = array<i32>} : memref<8x128xf32, #tpu.memory_space<vmem>>, vector<8x128xf32>,
    %c0_144 = arith.constant 0 : index
    %c0_145 = arith.constant 0 : index
    %173 = vector.load %arg21[%c0_144, %c0_145] : memref<8x128xf32, #tpu.memory_space<vmem>>, vector<8x128xf32>
    tpu.vector_store %arg21[%c0_144, %c0_145], %169 {strides = array<i32>} : memref<8x128xf32, #tpu.memory_space<vmem>>, vector<8x128xf32>,
    %c0_146 = arith.constant 0 : index
    %c0_147 = arith.constant 0 : index
    %174 = vector.load %arg23[%c0_146, %c0_147] : memref<8x128xf32, #tpu.memory_space<vmem>>, vector<8x128xf32>
    %cst_148 = arith.constant 8.500000e-01 : f32
    %175 = vector.broadcast %cst_148 : f32 to vector<8x128xf32>
    %176 = arith.mulf %175, %174 : vector<8x128xf32>
    %cst_149 = arith.constant 6.66666651 : f32
    %177 = vector.broadcast %cst_149 : f32 to vector<8x128xf32>
    %178 = arith.mulf %177, %169 : vector<8x128xf32>
    %179 = arith.addf %176, %178 : vector<8x128xf32>
    %c0_150 = arith.constant 0 : index
    %c0_151 = arith.constant 0 : index
    %180 = vector.load %arg22[%c0_150, %c0_151] : memref<8x128xf32, #tpu.memory_space<vmem>>, vector<8x128xf32>
    %cst_152 = arith.constant 0.899999976 : f32
    %181 = vector.broadcast %cst_152 : f32 to vector<8x128xf32>
    %182 = arith.mulf %181, %180 : vector<8x128xf32>
    %cst_153 = arith.constant 1.000000e+01 : f32
    %183 = vector.broadcast %cst_153 : f32 to vector<8x128xf32>
    %184 = arith.mulf %183, %179 : vector<8x128xf32>
    %185 = arith.addf %182, %184 : vector<8x128xf32>
    %c0_154 = arith.constant 0 : index
    %c0_155 = arith.constant 0 : index
    %186 = vector.load %arg24[%c0_154, %c0_155] : memref<8x128xf32, #tpu.memory_space<vmem>>, vector<8x128xf32>
    %cst_156 = arith.constant 6.500000e-01 : f32
    %187 = vector.broadcast %cst_156 : f32 to vector<8x128xf32>
    %188 = arith.mulf %187, %186 : vector<8x128xf32>
    %c0_157 = arith.constant 0 : index
    %c0_158 = arith.constant 0 : index
    %189 = vector.load %arg25[%c0_157, %c0_158] : memref<8x128xf32, #tpu.memory_space<vmem>>, vector<8x128xf32>
    %cst_159 = arith.constant 1.000000e+00 : f32
    %190 = vector.broadcast %cst_159 : f32 to vector<8x128xf32>
    %191 = arith.mulf %190, %189 : vector<8x128xf32>
    %192 = arith.subf %188, %191 : vector<8x128xf32>
    %193 = arith.truncf %185 : vector<8x128xf32> to vector<8x128xbf16>
    %c0_160 = arith.constant 0 : index
    %c0_161 = arith.constant 0 : index
    %194 = vector.load %arg14[%c0_160, %c0_161] : memref<128x128xbf16, #tpu.memory_space<vmem>>, vector<128x128xbf16>
    %cst_162 = arith.constant dense<0.000000e+00> : vector<8x128xf32>
    %195 = tpu.matmul %193, %194, %cst_162 {dimension_numbers = #tpu.dot_dimension_numbers<[1], [0], [0], [1], [0, 0, 1, 1], [], []>} : vector<8x128xbf16>, vector<128x128xbf16>, vector<8x128xf32> -> vector<8x128xf32>
    %c0_163 = arith.constant 0 : index
    %c0_164 = arith.constant 0 : index
    %196 = vector.load %arg15[%c0_163, %c0_164] : memref<8x128xf32, #tpu.memory_space<vmem>>, vector<8x128xf32>
    %197 = arith.addf %195, %196 : vector<8x128xf32>
    %198 = arith.addf %197, %192 : vector<8x128xf32>
    %cst_165 = arith.constant 0.000000e+00 : f32
    %199 = vector.broadcast %cst_165 : f32 to vector<8x128xf32>
    %200 = arith.cmpf ogt, %198, %199 : vector<8x128xf32>
    %201 = arith.extui %200 : vector<8x128xi1> to vector<8x128xi32>
    %202 = arith.sitofp %201 : vector<8x128xi32> to vector<8x128xf32>
    %c0_166 = arith.constant 0 : index
    %c0_167 = arith.constant 0 : index
    %203 = vector.load %arg23[%c0_166, %c0_167] : memref<8x128xf32, #tpu.memory_space<vmem>>, vector<8x128xf32>
    tpu.vector_store %arg23[%c0_166, %c0_167], %179 {strides = array<i32>} : memref<8x128xf32, #tpu.memory_space<vmem>>, vector<8x128xf32>,
    %c0_168 = arith.constant 0 : index
    %c0_169 = arith.constant 0 : index
    %204 = vector.load %arg22[%c0_168, %c0_169] : memref<8x128xf32, #tpu.memory_space<vmem>>, vector<8x128xf32>
    tpu.vector_store %arg22[%c0_168, %c0_169], %185 {strides = array<i32>} : memref<8x128xf32, #tpu.memory_space<vmem>>, vector<8x128xf32>,
    %c0_170 = arith.constant 0 : index
    %c0_171 = arith.constant 0 : index
    %205 = vector.load %arg24[%c0_170, %c0_171] : memref<8x128xf32, #tpu.memory_space<vmem>>, vector<8x128xf32>
    tpu.vector_store %arg24[%c0_170, %c0_171], %192 {strides = array<i32>} : memref<8x128xf32, #tpu.memory_space<vmem>>, vector<8x128xf32>,
    %c0_172 = arith.constant 0 : index
    %c0_173 = arith.constant 0 : index
    %206 = vector.load %arg25[%c0_172, %c0_173] : memref<8x128xf32, #tpu.memory_space<vmem>>, vector<8x128xf32>
    tpu.vector_store %arg25[%c0_172, %c0_173], %202 {strides = array<i32>} : memref<8x128xf32, #tpu.memory_space<vmem>>, vector<8x128xf32>,
    %c3 = arith.constant 3 : index
    %c0_174 = arith.constant 0 : index
    %c0_175 = arith.constant 0 : index
    %207 = vector.load %arg1[%c3, %c0_174, %c0_175] : memref<4x8x1024xf32, #tpu.memory_space<vmem>>, vector<1x8x1024xf32>
    %208 = vector.shape_cast %207 : vector<1x8x1024xf32> to vector<8x1024xf32>
    %c0_176 = arith.constant 0 : index
    %c0_177 = arith.constant 0 : index
    %209 = vector.load %arg19[%c0_176, %c0_177] : memref<8x1024xf32, #tpu.memory_space<vmem>>, vector<8x1024xf32>
    %cst_178 = arith.constant 8.500000e-01 : f32
    %210 = vector.broadcast %cst_178 : f32 to vector<8x1024xf32>
    %211 = arith.mulf %210, %209 : vector<8x1024xf32>
    %cst_179 = arith.constant 6.66666651 : f32
    %212 = vector.broadcast %cst_179 : f32 to vector<8x1024xf32>
    %213 = arith.mulf %212, %208 : vector<8x1024xf32>
    %214 = arith.addf %211, %213 : vector<8x1024xf32>
    %c0_180 = arith.constant 0 : index
    %c0_181 = arith.constant 0 : index
    %215 = vector.load %arg18[%c0_180, %c0_181] : memref<8x1024xf32, #tpu.memory_space<vmem>>, vector<8x1024xf32>
    %cst_182 = arith.constant 0.899999976 : f32
    %216 = vector.broadcast %cst_182 : f32 to vector<8x1024xf32>
    %217 = arith.mulf %216, %215 : vector<8x1024xf32>
    %cst_183 = arith.constant 1.000000e+01 : f32
    %218 = vector.broadcast %cst_183 : f32 to vector<8x1024xf32>
    %219 = arith.mulf %218, %214 : vector<8x1024xf32>
    %220 = arith.addf %217, %219 : vector<8x1024xf32>
    %c0_184 = arith.constant 0 : index
    %c0_185 = arith.constant 0 : index
    %221 = vector.load %arg20[%c0_184, %c0_185] : memref<8x128xf32, #tpu.memory_space<vmem>>, vector<8x128xf32>
    %cst_186 = arith.constant 6.500000e-01 : f32
    %222 = vector.broadcast %cst_186 : f32 to vector<8x128xf32>
    %223 = arith.mulf %222, %221 : vector<8x128xf32>
    %c0_187 = arith.constant 0 : index
    %c0_188 = arith.constant 0 : index
    %224 = vector.load %arg21[%c0_187, %c0_188] : memref<8x128xf32, #tpu.memory_space<vmem>>, vector<8x128xf32>
    %cst_189 = arith.constant 1.000000e+00 : f32
    %225 = vector.broadcast %cst_189 : f32 to vector<8x128xf32>
    %226 = arith.mulf %225, %224 : vector<8x128xf32>
    %227 = arith.subf %223, %226 : vector<8x128xf32>
    %228 = arith.truncf %220 : vector<8x1024xf32> to vector<8x1024xbf16>
    %c0_190 = arith.constant 0 : index
    %c0_191 = arith.constant 0 : index
    %229 = vector.load %arg10[%c0_190, %c0_191] : memref<1024x128xbf16, #tpu.memory_space<vmem>>, vector<1024x128xbf16>
    %cst_192 = arith.constant dense<0.000000e+00> : vector<8x128xf32>
    %230 = tpu.matmul %228, %229, %cst_192 {dimension_numbers = #tpu.dot_dimension_numbers<[1], [0], [0], [1], [0, 0, 1, 1], [], []>} : vector<8x1024xbf16>, vector<1024x128xbf16>, vector<8x128xf32> -> vector<8x128xf32>
    %c0_193 = arith.constant 0 : index
    %c0_194 = arith.constant 0 : index
    %231 = vector.load %arg11[%c0_193, %c0_194] : memref<8x128xf32, #tpu.memory_space<vmem>>, vector<8x128xf32>
    %232 = arith.addf %230, %231 : vector<8x128xf32>
    %233 = arith.addf %232, %227 : vector<8x128xf32>
    %cst_195 = arith.constant 0.000000e+00 : f32
    %234 = vector.broadcast %cst_195 : f32 to vector<8x128xf32>
    %235 = arith.cmpf ogt, %233, %234 : vector<8x128xf32>
    %236 = arith.extui %235 : vector<8x128xi1> to vector<8x128xi32>
    %237 = arith.sitofp %236 : vector<8x128xi32> to vector<8x128xf32>
    %c0_196 = arith.constant 0 : index
    %c0_197 = arith.constant 0 : index
    %238 = vector.load %arg19[%c0_196, %c0_197] : memref<8x1024xf32, #tpu.memory_space<vmem>>, vector<8x1024xf32>
    tpu.vector_store %arg19[%c0_196, %c0_197], %214 {strides = array<i32>} : memref<8x1024xf32, #tpu.memory_space<vmem>>, vector<8x1024xf32>,
    %c0_198 = arith.constant 0 : index
    %c0_199 = arith.constant 0 : index
    %239 = vector.load %arg18[%c0_198, %c0_199] : memref<8x1024xf32, #tpu.memory_space<vmem>>, vector<8x1024xf32>
    tpu.vector_store %arg18[%c0_198, %c0_199], %220 {strides = array<i32>} : memref<8x1024xf32, #tpu.memory_space<vmem>>, vector<8x1024xf32>,
    %c0_200 = arith.constant 0 : index
    %c0_201 = arith.constant 0 : index
    %240 = vector.load %arg20[%c0_200, %c0_201] : memref<8x128xf32, #tpu.memory_space<vmem>>, vector<8x128xf32>
    tpu.vector_store %arg20[%c0_200, %c0_201], %227 {strides = array<i32>} : memref<8x128xf32, #tpu.memory_space<vmem>>, vector<8x128xf32>,
    %c0_202 = arith.constant 0 : index
    %c0_203 = arith.constant 0 : index
    %241 = vector.load %arg21[%c0_202, %c0_203] : memref<8x128xf32, #tpu.memory_space<vmem>>, vector<8x128xf32>
    tpu.vector_store %arg21[%c0_202, %c0_203], %237 {strides = array<i32>} : memref<8x128xf32, #tpu.memory_space<vmem>>, vector<8x128xf32>,
    %c0_204 = arith.constant 0 : index
    %c0_205 = arith.constant 0 : index
    %242 = vector.load %arg23[%c0_204, %c0_205] : memref<8x128xf32, #tpu.memory_space<vmem>>, vector<8x128xf32>
    %cst_206 = arith.constant 8.500000e-01 : f32
    %243 = vector.broadcast %cst_206 : f32 to vector<8x128xf32>
    %244 = arith.mulf %243, %242 : vector<8x128xf32>
    %cst_207 = arith.constant 6.66666651 : f32
    %245 = vector.broadcast %cst_207 : f32 to vector<8x128xf32>
    %246 = arith.mulf %245, %237 : vector<8x128xf32>
    %247 = arith.addf %244, %246 : vector<8x128xf32>
    %c0_208 = arith.constant 0 : index
    %c0_209 = arith.constant 0 : index
    %248 = vector.load %arg22[%c0_208, %c0_209] : memref<8x128xf32, #tpu.memory_space<vmem>>, vector<8x128xf32>
    %cst_210 = arith.constant 0.899999976 : f32
    %249 = vector.broadcast %cst_210 : f32 to vector<8x128xf32>
    %250 = arith.mulf %249, %248 : vector<8x128xf32>
    %cst_211 = arith.constant 1.000000e+01 : f32
    %251 = vector.broadcast %cst_211 : f32 to vector<8x128xf32>
    %252 = arith.mulf %251, %247 : vector<8x128xf32>
    %253 = arith.addf %250, %252 : vector<8x128xf32>
    %c0_212 = arith.constant 0 : index
    %c0_213 = arith.constant 0 : index
    %254 = vector.load %arg24[%c0_212, %c0_213] : memref<8x128xf32, #tpu.memory_space<vmem>>, vector<8x128xf32>
    %cst_214 = arith.constant 6.500000e-01 : f32
    %255 = vector.broadcast %cst_214 : f32 to vector<8x128xf32>
    %256 = arith.mulf %255, %254 : vector<8x128xf32>
    %c0_215 = arith.constant 0 : index
    %c0_216 = arith.constant 0 : index
    %257 = vector.load %arg25[%c0_215, %c0_216] : memref<8x128xf32, #tpu.memory_space<vmem>>, vector<8x128xf32>
    %cst_217 = arith.constant 1.000000e+00 : f32
    %258 = vector.broadcast %cst_217 : f32 to vector<8x128xf32>
    %259 = arith.mulf %258, %257 : vector<8x128xf32>
    %260 = arith.subf %256, %259 : vector<8x128xf32>
    %261 = arith.truncf %253 : vector<8x128xf32> to vector<8x128xbf16>
    %c0_218 = arith.constant 0 : index
    %c0_219 = arith.constant 0 : index
    %262 = vector.load %arg14[%c0_218, %c0_219] : memref<128x128xbf16, #tpu.memory_space<vmem>>, vector<128x128xbf16>
    %cst_220 = arith.constant dense<0.000000e+00> : vector<8x128xf32>
    %263 = tpu.matmul %261, %262, %cst_220 {dimension_numbers = #tpu.dot_dimension_numbers<[1], [0], [0], [1], [0, 0, 1, 1], [], []>} : vector<8x128xbf16>, vector<128x128xbf16>, vector<8x128xf32> -> vector<8x128xf32>
    %c0_221 = arith.constant 0 : index
    %c0_222 = arith.constant 0 : index
    %264 = vector.load %arg15[%c0_221, %c0_222] : memref<8x128xf32, #tpu.memory_space<vmem>>, vector<8x128xf32>
    %265 = arith.addf %263, %264 : vector<8x128xf32>
    %266 = arith.addf %265, %260 : vector<8x128xf32>
    %cst_223 = arith.constant 0.000000e+00 : f32
    %267 = vector.broadcast %cst_223 : f32 to vector<8x128xf32>
    %268 = arith.cmpf ogt, %266, %267 : vector<8x128xf32>
    %269 = arith.extui %268 : vector<8x128xi1> to vector<8x128xi32>
    %270 = arith.sitofp %269 : vector<8x128xi32> to vector<8x128xf32>
    %c0_224 = arith.constant 0 : index
    %c0_225 = arith.constant 0 : index
    %271 = vector.load %arg23[%c0_224, %c0_225] : memref<8x128xf32, #tpu.memory_space<vmem>>, vector<8x128xf32>
    tpu.vector_store %arg23[%c0_224, %c0_225], %247 {strides = array<i32>} : memref<8x128xf32, #tpu.memory_space<vmem>>, vector<8x128xf32>,
    %c0_226 = arith.constant 0 : index
    %c0_227 = arith.constant 0 : index
    %272 = vector.load %arg22[%c0_226, %c0_227] : memref<8x128xf32, #tpu.memory_space<vmem>>, vector<8x128xf32>
    tpu.vector_store %arg22[%c0_226, %c0_227], %253 {strides = array<i32>} : memref<8x128xf32, #tpu.memory_space<vmem>>, vector<8x128xf32>,
    %c0_228 = arith.constant 0 : index
    %c0_229 = arith.constant 0 : index
    %273 = vector.load %arg24[%c0_228, %c0_229] : memref<8x128xf32, #tpu.memory_space<vmem>>, vector<8x128xf32>
    tpu.vector_store %arg24[%c0_228, %c0_229], %260 {strides = array<i32>} : memref<8x128xf32, #tpu.memory_space<vmem>>, vector<8x128xf32>,
    %c0_230 = arith.constant 0 : index
    %c0_231 = arith.constant 0 : index
    %274 = vector.load %arg25[%c0_230, %c0_231] : memref<8x128xf32, #tpu.memory_space<vmem>>, vector<8x128xf32>
    tpu.vector_store %arg25[%c0_230, %c0_231], %270 {strides = array<i32>} : memref<8x128xf32, #tpu.memory_space<vmem>>, vector<8x128xf32>,
    return
  }
  func.func @transform_0(%arg0: i32) -> (i32, i32, i32) {
    %c0_i32 = arith.constant 0 : i32
    %c0_i32_0 = arith.constant 0 : i32
    %c0_i32_1 = arith.constant 0 : i32
    return %arg0, %c0_i32, %c0_i32_0 : i32, i32, i32
  }
  func.func @transform_1(%arg0: i32) -> (i32, i32) {
    %c0_i32 = arith.constant 0 : i32
    %c0_i32_0 = arith.constant 0 : i32
    %c0_i32_1 = arith.constant 0 : i32
    return %c0_i32, %c0_i32_0 : i32, i32
  }
  func.func @transform_2(%arg0: i32) -> (i32, i32) {
    %c0_i32 = arith.constant 0 : i32
    %c0_i32_0 = arith.constant 0 : i32
    %c0_i32_1 = arith.constant 0 : i32
    return %c0_i32, %c0_i32_0 : i32, i32
  }
  func.func @transform_3(%arg0: i32) -> (i32, i32) {
    %c0_i32 = arith.constant 0 : i32
    %c0_i32_0 = arith.constant 0 : i32
    %c0_i32_1 = arith.constant 0 : i32
    return %c0_i32, %c0_i32_0 : i32, i32
  }
  func.func @transform_4(%arg0: i32) -> (i32, i32) {
    %c0_i32 = arith.constant 0 : i32
    %c0_i32_0 = arith.constant 0 : i32
    %c0_i32_1 = arith.constant 0 : i32
    return %c0_i32, %c0_i32_0 : i32, i32
  }
  func.func @transform_5(%arg0: i32) -> (i32, i32) {
    %c0_i32 = arith.constant 0 : i32
    %c0_i32_0 = arith.constant 0 : i32
    %c0_i32_1 = arith.constant 0 : i32
    return %c0_i32, %c0_i32_0 : i32, i32
  }
  func.func @transform_6(%arg0: i32) -> (i32, i32) {
    %c0_i32 = arith.constant 0 : i32
    %c0_i32_0 = arith.constant 0 : i32
    %c0_i32_1 = arith.constant 0 : i32
    return %c0_i32, %c0_i32_0 : i32, i32
  }
  func.func @transform_7(%arg0: i32) -> (i32, i32) {
    %c0_i32 = arith.constant 0 : i32
    %c0_i32_0 = arith.constant 0 : i32
    %c0_i32_1 = arith.constant 0 : i32
    return %c0_i32, %c0_i32_0 : i32, i32
  }
  func.func @transform_8(%arg0: i32) -> (i32, i32) {
    %c0_i32 = arith.constant 0 : i32
    %c0_i32_0 = arith.constant 0 : i32
    %c0_i32_1 = arith.constant 0 : i32
    return %c0_i32, %c0_i32_0 : i32, i32
  }
  func.func @transform_9(%arg0: i32) -> (i32, i32) {
    %c0_i32 = arith.constant 0 : i32
    %c0_i32_0 = arith.constant 0 : i32
    %c0_i32_1 = arith.constant 0 : i32
    return %c0_i32, %c0_i32_0 : i32, i32
  }
  func.func @transform_10(%arg0: i32) -> (i32, i32) {
    %c0_i32 = arith.constant 0 : i32
    %c0_i32_0 = arith.constant 0 : i32
    %c0_i32_1 = arith.constant 0 : i32
    return %c0_i32, %c0_i32_0 : i32, i32
  }
  func.func @transform_11(%arg0: i32) -> (i32, i32) {
    %c0_i32 = arith.constant 0 : i32
    %c0_i32_0 = arith.constant 0 : i32
    %c0_i32_1 = arith.constant 0 : i32
    return %c0_i32, %c0_i32_0 : i32, i32
  }
  func.func @transform_12(%arg0: i32) -> (i32, i32) {
    %c0_i32 = arith.constant 0 : i32
    %c0_i32_0 = arith.constant 0 : i32
    %c0_i32_1 = arith.constant 0 : i32
    return %c0_i32, %c0_i32_0 : i32, i32
  }
  func.func @transform_13(%arg0: i32) -> (i32, i32) {
    %c0_i32 = arith.constant 0 : i32
    %c0_i32_0 = arith.constant 0 : i32
    %c0_i32_1 = arith.constant 0 : i32
    return %c0_i32, %c0_i32_0 : i32, i32
  }
  func.func @transform_14(%arg0: i32) -> (i32, i32) {
    %c0_i32 = arith.constant 0 : i32
    %c0_i32_0 = arith.constant 0 : i32
    %c0_i32_1 = arith.constant 0 : i32
    return %c0_i32, %c0_i32_0 : i32, i32
  }
  func.func @transform_15(%arg0: i32) -> (i32, i32) {
    %c0_i32 = arith.constant 0 : i32
    %c0_i32_0 = arith.constant 0 : i32
    %c0_i32_1 = arith.constant 0 : i32
    return %c0_i32, %c0_i32_0 : i32, i32
  }
  func.func @transform_16(%arg0: i32) -> (i32, i32) {
    %c0_i32 = arith.constant 0 : i32
    %c0_i32_0 = arith.constant 0 : i32
    %c0_i32_1 = arith.constant 0 : i32
    return %c0_i32, %c0_i32_0 : i32, i32
  }
  func.func @transform_17(%arg0: i32) -> (i32, i32) {
    %c0_i32 = arith.constant 0 : i32
    %c0_i32_0 = arith.constant 0 : i32
    %c0_i32_1 = arith.constant 0 : i32
    return %c0_i32, %c0_i32_0 : i32, i32
  }
  func.func @transform_18(%arg0: i32) -> (i32, i32) {
    %c0_i32 = arith.constant 0 : i32
    %c0_i32_0 = arith.constant 0 : i32
    %c0_i32_1 = arith.constant 0 : i32
    return %c0_i32, %c0_i32_0 : i32, i32
  }
  func.func @transform_19(%arg0: i32) -> (i32, i32) {
    %c0_i32 = arith.constant 0 : i32
    %c0_i32_0 = arith.constant 0 : i32
    %c0_i32_1 = arith.constant 0 : i32
    return %c0_i32, %c0_i32_0 : i32, i32
  }
  func.func @transform_20(%arg0: i32) -> (i32, i32) {
    %c0_i32 = arith.constant 0 : i32
    %c0_i32_0 = arith.constant 0 : i32
    %c0_i32_1 = arith.constant 0 : i32
    return %c0_i32, %c0_i32_0 : i32, i32
  }
  func.func @transform_21(%arg0: i32) -> (i32, i32) {
    %c0_i32 = arith.constant 0 : i32
    %c0_i32_0 = arith.constant 0 : i32
    %c0_i32_1 = arith.constant 0 : i32
    return %c0_i32, %c0_i32_0 : i32, i32
  }
  func.func @transform_22(%arg0: i32) -> (i32, i32) {
    %c0_i32 = arith.constant 0 : i32
    %c0_i32_0 = arith.constant 0 : i32
    %c0_i32_1 = arith.constant 0 : i32
    return %c0_i32, %c0_i32_0 : i32, i32
  }
  func.func @transform_23(%arg0: i32) -> (i32, i32) {
    %c0_i32 = arith.constant 0 : i32
    %c0_i32_0 = arith.constant 0 : i32
    %c0_i32_1 = arith.constant 0 : i32
    return %c0_i32, %c0_i32_0 : i32, i32
  }
  func.func @transform_24(%arg0: i32) -> (i32, i32) {
    %c0_i32 = arith.constant 0 : i32
    %c0_i32_0 = arith.constant 0 : i32
    %c0_i32_1 = arith.constant 0 : i32
    return %c0_i32, %c0_i32_0 : i32, i32
  }
}

</mosaic_0001>

<bundles_post_ra>
// kernel: tpu_custom_call.1
= control target key start
LH: loop header
LB: loop body
LE: loop exit
PB: predicated region body
PF: predicated region fallthrough
CT: control target
= control target key end

     0   :  { %s6228_s0 = inlined_call_operand.hbm [shape: f32[4,8,1024], index: 0, kind: input, shape index: {}]   ;;  %s6229_s1 = inlined_call_operand.hbm [shape: f32[8,1024], index: 1, kind: input, shape index: {}]   ;;  %s6230_s2 = inlined_call_operand.hbm [shape: f32[8,1024], index: 2, kind: input, shape index: {}]   ;;  %s6231_s3 = inlined_call_operand.vmem [shape: f32[8,128], index: 3, kind: input, shape index: {}]   ;;  %s6232_s4 = inlined_call_operand.hbm [shape: f32[8,128], index: 4, kind: input, shape index: {}]   ;;  %s6233_s5 = inlined_call_operand.vmem [shape: f32[8,128], index: 5, kind: input, shape index: {}]   ;;  %s6234_s6 = inlined_call_operand.hbm [shape: f32[8,128], index: 6, kind: input, shape index: {}]   ;;  %s6235_s7 = inlined_call_operand.vmem [shape: f32[8,128], index: 7, kind: input, shape index: {}]   ;;  %s6236_s8 = inlined_call_operand.hbm [shape: f32[8,128], index: 8, kind: input, shape index: {}]   ;;  %s6237_s9 = inlined_call_operand.hbm [shape: bf16[1024,128], index: 9, kind: input, shape index: {}]   ;;  %s6238_s10 = inlined_call_operand.vmem [shape: f32[8,128], index: 10, kind: input, shape index: {}]   ;;  %s6239_s11 = inlined_call_operand.hbm [shape: bf16[128,128], index: 11, kind: input, shape index: {}]   ;;  %s6240_s12 = inlined_call_operand.vmem [shape: f32[8,128], index: 12, kind: input, shape index: {}]   ;;  %s6241_s13 = inlined_call_operand.hbm [shape: bf16[128,128], index: 13, kind: input, shape index: {}]   ;;  %s6242_s14 = inlined_call_operand.vmem [shape: f32[8,128], index: 14, kind: input, shape index: {}]   ;;  %s6243_s15 = inlined_call_operand.hbm [shape: bf16[128,128], index: 15, kind: input, shape index: {}]   ;;  %s6244_s16 = inlined_call_operand.vmem [shape: f32[8,128], index: 16, kind: input, shape index: {}]   ;;  %s6245_s17 = inlined_call_operand.hbm [shape: f32[8,1024], index: 17, kind: output, shape index: {0}]   ;;  %s6246_s18 = inlined_call_operand.hbm [shape: f32[8,1024], index: 18, kind: output, shape index: {1}]   ;;  %s6247_s19 = inlined_call_operand.hbm [shape: f32[8,128], index: 19, kind: output, shape index: {2}]   ;;  %s6248_s20 = inlined_call_operand.hbm [shape: f32[8,128], index: 20, kind: output, shape index: {3}]   ;;  %s6249_s21 = inlined_call_operand.hbm [shape: f32[8,128], index: 21, kind: output, shape index: {4}]   ;;  %s6250_s22 = inlined_call_operand.hbm [shape: f32[8,128], index: 22, kind: output, shape index: {5}]   ;;  %s6251_s23 = inlined_call_operand.hbm [shape: f32[8,128], index: 23, kind: output, shape index: {6}]   ;;  %s6252_s24 = inlined_call_operand.hbm [shape: f32[8,128], index: 24, kind: output, shape index: {7}]  }
   0x1   :  { %6261 = sst [smem:[#allocation42_spill]] %s6228_s0 }
   0x2   :  { %6262 = sst [smem:[#allocation43_spill]] %s6229_s1 }
   0x3   :  { %6263 = sst [smem:[#allocation44_spill]] %s6230_s2 }
   0x4   :  { %6264 = sst [smem:[#allocation45_spill]] %s6231_s3 }
   0x5   :  { %6265 = sst [smem:[#allocation46_spill]] %s6232_s4 }
   0x6   :  { %6266 = sst [smem:[#allocation47_spill]] %s6233_s5 }
   0x7   :  { %6267 = sst [smem:[#allocation48_spill]] %s6234_s6 }
   0x8   :  { %6268 = sst [smem:[#allocation49_spill]] %s6235_s7 }
   0x9   :  { %6269 = sst [smem:[#allocation50_spill]] %s6236_s8 }
   0xa   :  { %30 = vsyncpa [#allocation3], 0 }
   0xb   :  { %31 = vsyncpa [#allocation6], 0 }
   0xc   :  { %32 = vsyncpa [#allocation9], 0 }
   0xd   :  { %33 = vsyncpa [#allocation12], 0 }
   0xe   :  { %34 = vsyncpa [#allocation15], 0 }
   0xf   :  { %35 = vsyncpa [#allocation18], 0 }
  0x10   :  { %36 = vsyncpa [#allocation4], 0 }
  0x11   :  { %37 = vsyncpa [#allocation21], 0 }
  0x12   :  { %38 = vsyncpa [#allocation24], 0 }
  0x13   :  { %39 = vsyncpa [#allocation27], 0 }
  0x14   :  { %40 = vsyncpa [#allocation30], 0  ;;  %s5475_s4 = smov [#allocation5]   ;;  %s5476_s5 = smov [#allocation8]  }
  0x15   :  { %s59_s1 = sshll.u32 %s5475_s4, 4  ;;  %s81_s26 = sshll.u32 %s5476_s5, 4  ;;  %s60_s1 = int_to_ptr.vmem [resolvable:$true] %s59_s1  ;;  %s82_s26 = int_to_ptr.vmem [resolvable:$true] %s81_s26 }
  0x16   :  { %s6270_s6 = sld [smem:[#allocation43_spill]] }
  0x1c   :  { %s5057_s12 = scalar_lea.hbm %s6270_s6, 1024 }
  0x1d   :  { %p5058_p0 = scmp.ne.s32.totalorder %s6270_s6, %s5057_s12  ;;  %p5061_p1 = scmp.lt.u32.totalorder %s5057_s12, %s6270_s6 }
  0x1f   :  { %p5063_p2 = pnand %p5061_p1, %p5058_p0 }
  0x21   :  { %5066 = shalt.err (!%p5063_p2)
}
  0x22   :  { %s5067_s30 = scalar_lea.vmem %s60_s1, 1024  ;;  %p5072_p4 = scmp.lt.s32.totalorder %s60_s1, %s60_s1 }
  0x23   :  { %p5068_p3 = scmp.ne.s32.totalorder %s60_s1, %s5067_s30  ;;  %p5073_p5 = scmp.lt.s32.totalorder %s5067_s30, %s5067_s30 }
  0x25   :  { %p5074_p6 = por %p5073_p5, %p5072_p4 }
  0x27   :  { %p5075_p7 = pnand %p5074_p6, %p5068_p3 }
  0x29   :  { %5078 = shalt.err (!%p5075_p7)
}
  0x2a   :  { %62 = dma.hbm_to_vmem [thread:$0]  %s6270_s6, 1024, %s60_s1, [#allocation6]  }
  0x2b   :  { %s6271_s4 = sld [smem:[#allocation46_spill]] }
  0x31   :  { %s5079_s5 = scalar_lea.hbm %s6271_s4, 128 }
  0x32   :  { %p5080_p8 = scmp.ne.s32.totalorder %s6271_s4, %s5079_s5  ;;  %p5083_p9 = scmp.lt.u32.totalorder %s5079_s5, %s6271_s4 }
  0x34   :  { %p5085_p10 = pnand %p5083_p9, %p5080_p8 }
  0x36   :  { %5088 = shalt.err (!%p5085_p10)
}
  0x37   :  { %s5089_s29 = scalar_lea.vmem %s82_s26, 128  ;;  %p5094_p12 = scmp.lt.s32.totalorder %s82_s26, %s82_s26 }
  0x38   :  { %p5090_p11 = scmp.ne.s32.totalorder %s82_s26, %s5089_s29  ;;  %p5095_p13 = scmp.lt.s32.totalorder %s5089_s29, %s5089_s29 }
  0x3a   :  { %p5096_p0 = por %p5095_p13, %p5094_p12 }
  0x3c   :  { %p5097_p1 = pnand %p5096_p0, %p5090_p11 }
  0x3e   :  { %5100 = shalt.err (!%p5097_p1)
}
  0x3f   :  { %84 = dma.hbm_to_vmem [thread:$0]  %s6271_s4, 128, %s82_s26, [#allocation9]  }
  0x40   :  { %s5477_s7 = smov [#allocation11]   ;;  %s6272_s8 = sld [smem:[#allocation50_spill]] }
  0x41   :  { %s105_s0 = sshll.u32 %s5477_s7, 4  ;;  %s106_s0 = int_to_ptr.vmem [resolvable:$true] %s105_s0 }
  0x46   :  { %s5101_s16 = scalar_lea.hbm %s6272_s8, 128 }
  0x47   :  { %p5102_p2 = scmp.ne.s32.totalorder %s6272_s8, %s5101_s16  ;;  %p5105_p3 = scmp.lt.u32.totalorder %s5101_s16, %s6272_s8 }
  0x49   :  { %p5107_p4 = pnand %p5105_p3, %p5102_p2 }
  0x4b   :  { %5110 = shalt.err (!%p5107_p4)
}
  0x4c   :  { %s5111_s12 = scalar_lea.vmem %s106_s0, 128  ;;  %p5116_p6 = scmp.lt.s32.totalorder %s106_s0, %s106_s0 }
  0x4d   :  { %p5112_p5 = scmp.ne.s32.totalorder %s106_s0, %s5111_s12  ;;  %p5117_p7 = scmp.lt.s32.totalorder %s5111_s12, %s5111_s12 }
  0x4f   :  { %p5118_p8 = por %p5117_p7, %p5116_p6 }
  0x51   :  { %p5119_p9 = pnand %p5118_p8, %p5112_p5 }
  0x53   :  { %5122 = shalt.err (!%p5119_p9)
}
  0x54   :  { %108 = dma.hbm_to_vmem [thread:$0]  %s6272_s8, 128, %s106_s0, [#allocation12]  }
  0x55   :  { %s5478_s2 = smov [#allocation14]   ;;  %s5479_s1 = smov [#allocation2]  }
  0x56   :  { %s128_s29 = sshll.u32 %s5478_s2, 4  ;;  %s46_s6 = sshll.u32 %s5479_s1, 4  ;;  %s129_s29 = int_to_ptr.vmem [resolvable:$true] %s128_s29  ;;  %s47_s6 = int_to_ptr.vmem [resolvable:$true] %s46_s6 }
  0x57   :  { %s5123_s3 = scalar_lea.hbm %s6239_s11, 1024 }
  0x58   :  { %p5124_p10 = scmp.ne.s32.totalorder %s6239_s11, %s5123_s3  ;;  %p5127_p11 = scmp.lt.u32.totalorder %s5123_s3, %s6239_s11 }
  0x5a   :  { %p5129_p12 = pnand %p5127_p11, %p5124_p10 }
  0x5c   :  { %5132 = shalt.err (!%p5129_p12)
}
  0x5d   :  { %s5133_s0 = scalar_lea.vmem %s129_s29, 1024  ;;  %p5138_p0 = scmp.lt.s32.totalorder %s129_s29, %s129_s29 }
  0x5e   :  { %p5134_p13 = scmp.ne.s32.totalorder %s129_s29, %s5133_s0  ;;  %p5139_p1 = scmp.lt.s32.totalorder %s5133_s0, %s5133_s0 }
  0x60   :  { %p5140_p2 = por %p5139_p1, %p5138_p0 }
  0x62   :  { %p5141_p3 = pnand %p5140_p2, %p5134_p13 }
  0x64   :  { %5144 = shalt.err (!%p5141_p3)
}
  0x65   :  { %s5480_s8 = smov 64   ;;  %s6259_s28 = smov 4  }
  0x66   :  { %134 = dma.hbm_to_vmem [thread:$0]  %s6239_s11, 1024, %s129_s29, [#allocation15], %s5480_s8, %s5480_s8, %s6259_s28  }
  0x67   :  { %s6273_s1 = sld [smem:[#allocation42_spill]] }
  0x6d   :  { %s5145_s7 = scalar_lea.hbm %s6273_s1, 4096 }
  0x6e   :  { %p5146_p4 = scmp.ne.s32.totalorder %s6273_s1, %s5145_s7  ;;  %p5149_p5 = scmp.lt.u32.totalorder %s5145_s7, %s6273_s1 }
  0x70   :  { %p5151_p6 = pnand %p5149_p5, %p5146_p4 }
  0x72   :  { %5154 = shalt.err (!%p5151_p6)
}
  0x73   :  { %s5155_s5 = scalar_lea.vmem %s47_s6, 4096  ;;  %p5160_p8 = scmp.lt.s32.totalorder %s47_s6, %s47_s6 }
  0x74   :  { %p5156_p7 = scmp.ne.s32.totalorder %s47_s6, %s5155_s5  ;;  %p5161_p9 = scmp.lt.s32.totalorder %s5155_s5, %s5155_s5 }
  0x76   :  { %p5162_p10 = por %p5161_p9, %p5160_p8 }
  0x78   :  { %p5163_p11 = pnand %p5162_p10, %p5156_p7 }
  0x7a   :  { %5166 = shalt.err (!%p5163_p11)
}
  0x7b   :  { %s5482_s11 = smov 1024   ;;  %s5483_s0 = smov [#allocation7]  }
  0x7c   :  { %52 = dma.hbm_to_vmem [thread:$0]  %s6273_s1, 4096, %s47_s6, [#allocation3], %s5482_s11, %s5482_s11, %s5480_s8  }
  0x7d   :  { %s69_s12 = sshll.u32 %s5483_s0, 4  ;;  %s5484_s26 = smov [#allocation10]   ;;  %s70_s12 = int_to_ptr.vmem [resolvable:$true] %s69_s12 }
  0x7e   :  { %s93_s4 = sshll.u32 %s5484_s26, 4  ;;  %s6274_s30 = sld [smem:[#allocation44_spill]]  ;;  %s94_s4 = int_to_ptr.vmem [resolvable:$true] %s93_s4 }
  0x84   :  { %s5167_s3 = scalar_lea.hbm %s6274_s30, 1024 }
  0x85   :  { %p5168_p12 = scmp.ne.s32.totalorder %s6274_s30, %s5167_s3  ;;  %p5171_p13 = scmp.lt.u32.totalorder %s5167_s3, %s6274_s30 }
  0x87   :  { %p5173_p0 = pnand %p5171_p13, %p5168_p12 }
  0x89   :  { %5176 = shalt.err (!%p5173_p0)
}
  0x8a   :  { %s5177_s6 = scalar_lea.vmem %s70_s12, 1024  ;;  %p5182_p2 = scmp.lt.s32.totalorder %s70_s12, %s70_s12 }
  0x8b   :  { %p5178_p1 = scmp.ne.s32.totalorder %s70_s12, %s5177_s6  ;;  %p5183_p3 = scmp.lt.s32.totalorder %s5177_s6, %s5177_s6 }
  0x8d   :  { %p5184_p4 = por %p5183_p3, %p5182_p2 }
  0x8f   :  { %p5185_p5 = pnand %p5184_p4, %p5178_p1 }
  0x91   :  { %5188 = shalt.err (!%p5185_p5)
}
  0x92   :  { %72 = dma.hbm_to_vmem [thread:$0]  %s6274_s30, 1024, %s70_s12, [#allocation6]  }
  0x93   :  { %s6275_s0 = sld [smem:[#allocation48_spill]] }
  0x99   :  { %s5189_s26 = scalar_lea.hbm %s6275_s0, 128 }
  0x9a   :  { %p5190_p6 = scmp.ne.s32.totalorder %s6275_s0, %s5189_s26  ;;  %p5193_p7 = scmp.lt.u32.totalorder %s5189_s26, %s6275_s0 }
  0x9c   :  { %p5195_p8 = pnand %p5193_p7, %p5190_p6 }
  0x9e   :  { %5198 = shalt.err (!%p5195_p8)
}
  0x9f   :  { %s5199_s16 = scalar_lea.vmem %s94_s4, 128  ;;  %p5204_p10 = scmp.lt.s32.totalorder %s94_s4, %s94_s4 }
  0xa0   :  { %p5200_p9 = scmp.ne.s32.totalorder %s94_s4, %s5199_s16  ;;  %p5205_p11 = scmp.lt.s32.totalorder %s5199_s16, %s5199_s16 }
  0xa2   :  { %p5206_p12 = por %p5205_p11, %p5204_p10 }
  0xa4   :  { %p5207_p13 = pnand %p5206_p12, %p5200_p9 }
  0xa6   :  { %5210 = shalt.err (!%p5207_p13)
}
  0xa7   :  { %96 = dma.hbm_to_vmem [thread:$0]  %s6275_s0, 128, %s94_s4, [#allocation9]  }
  0xa8   :  { %s5485_s25 = smov [#allocation13]   ;;  %s5486_s6 = smov [#allocation16]  }
  0xa9   :  { %s114_s5 = sshll.u32 %s5485_s25, 4  ;;  %s142_s1 = sshll.u32 %s5486_s6, 4  ;;  %s115_s5 = int_to_ptr.vmem [resolvable:$true] %s114_s5  ;;  %s5711_s1 = int_to_ptr.vmem [resolvable:$true] %s142_s1 }
  0xaa   :  { %s5211_s27 = scalar_lea.hbm %s6237_s9, 8192 }
  0xab   :  { %p5212_p0 = scmp.ne.s32.totalorder %s6237_s9, %s5211_s27  ;;  %p5215_p1 = scmp.lt.u32.totalorder %s5211_s27, %s6237_s9 }
  0xad   :  { %p5217_p2 = pnand %p5215_p1, %p5212_p0 }
  0xaf   :  { %5220 = shalt.err (!%p5217_p2)
}
  0xb0   :  { %s5221_s4 = scalar_lea.vmem %s115_s5, 8192  ;;  %p5226_p4 = scmp.lt.s32.totalorder %s115_s5, %s115_s5 }
  0xb1   :  { %p5222_p3 = scmp.ne.s32.totalorder %s115_s5, %s5221_s4  ;;  %p5227_p5 = scmp.lt.s32.totalorder %s5221_s4, %s5221_s4 }
  0xb3   :  { %p5228_p6 = por %p5227_p5, %p5226_p4 }
  0xb5   :  { %p5229_p7 = pnand %p5228_p6, %p5222_p3 }
  0xb7   :  { %5232 = shalt.err (!%p5229_p7)
}
  0xb8   :  { %s6276_s0 = smov 4   ;;  %s5233_s25 = scalar_lea.hbm %s6241_s13, 1024 }
  0xb9   :  { %120 = dma.hbm_to_vmem [thread:$0]  %s6237_s9, 8192, %s115_s5, [#allocation12], %s5480_s8, %s5480_s8, %s6276_s0  }
  0xba   :  { %p5234_p8 = scmp.ne.s32.totalorder %s6241_s13, %s5233_s25  ;;  %p5237_p9 = scmp.lt.u32.totalorder %s5233_s25, %s6241_s13 }
  0xbc   :  { %p5239_p10 = pnand %p5237_p9, %p5234_p8 }
  0xbe   :  { %5242 = shalt.err (!%p5239_p10)
}
  0xbf   :  { %s5243_s26 = scalar_lea.vmem %s5711_s1, 1024  ;;  %p5248_p12 = scmp.lt.s32.totalorder %s5711_s1, %s5711_s1 }
  0xc0   :  { %p5244_p11 = scmp.ne.s32.totalorder %s5711_s1, %s5243_s26  ;;  %p5249_p13 = scmp.lt.s32.totalorder %s5243_s26, %s5243_s26 }
  0xc2   :  { %p5250_p0 = por %p5249_p13, %p5248_p12 }
  0xc4   :  { %p5251_p1 = pnand %p5250_p0, %p5244_p11 }
  0xc6   :  { %5254 = shalt.err (!%p5251_p1)
}
  0xc7   :  { %148 = dma.hbm_to_vmem [thread:$0]  %s6241_s13, 1024, %s5711_s1, [#allocation15], %s5480_s8, %s5480_s8, %s6276_s0  }
  0xc8   :  { %s5487_s2 = smov [#allocation17]   ;;  %s5255_s3 = scalar_lea.hbm %s6243_s15, 1024 }
  0xc9   :  { %s156_s28 = sshll.u32 %s5487_s2, 4  ;;  %p5256_p2 = scmp.ne.s32.totalorder %s6243_s15, %s5255_s3  ;;  %s157_s28 = int_to_ptr.vmem [resolvable:$true] %s156_s28 }
  0xca   :  { %p5259_p3 = scmp.lt.u32.totalorder %s5255_s3, %s6243_s15 }
  0xcc   :  { %p5261_p4 = pnand %p5259_p3, %p5256_p2 }
  0xce   :  { %5264 = shalt.err (!%p5261_p4)
}
  0xcf   :  { %s5265_s6 = scalar_lea.vmem %s157_s28, 1024  ;;  %p5270_p6 = scmp.lt.s32.totalorder %s157_s28, %s157_s28 }
  0xd0   :  { %p5266_p5 = scmp.ne.s32.totalorder %s157_s28, %s5265_s6  ;;  %p5271_p7 = scmp.lt.s32.totalorder %s5265_s6, %s5265_s6 }
  0xd2   :  { %p5272_p8 = por %p5271_p7, %p5270_p6 }
  0xd4   :  { %p5273_p9 = pnand %p5272_p8, %p5266_p5 }
  0xd6   :  { %5276 = shalt.err (!%p5273_p9)
}
  0xd7   :  { %162 = dma.hbm_to_vmem [thread:$0]  %s6243_s15, 1024, %s157_s28, [#allocation18], %s5480_s8, %s5480_s8, %s6276_s0  }
  0xd8   :  { %5453 = dma.done.wait [#allocation3], 4096  }
  0xd9   :  { %5454 = vsyncadd [#allocation3], 4294963200 }
  0xda   :  { %5455 = dma.done.wait [#allocation6], 2048  }
  0xdb   :  { %5456 = vsyncadd [#allocation6], 4294965248 }
  0xdc   :  { %5457 = dma.done.wait [#allocation9], 256  }
  0xdd   :  { %5458 = vsyncadd [#allocation9], 4294967040 }
  0xde   :  { %5459 = dma.done.wait [#allocation12], 8320  }
  0xdf   :  { %5460 = vsyncadd [#allocation12], 4294958976 }
  0xe0   :  { %5461 = dma.done.wait [#allocation15], 2048  }
  0xe1   :  { %5462 = vsyncadd [#allocation15], 4294965248 }
  0xe2   :  { %5463 = dma.done.wait [#allocation18], 1024  }
  0xe3   :  { %5464 = vsyncadd [#allocation18], 4294966272  ;;  %v4769_v0 = vld [vmem:[#allocation13 + $0x40] sm:$0xff]   ;;  %v4773_v4 = vld [vmem:[#allocation13 + $0x48] sm:$0xff]   ;;  %vm5489_vm0 = vmmov 0   ;;  %s6277_s29 = sld [smem:[#allocation45_spill]] }
  0xe4   :  { %v4770_v1 = vld [vmem:[#allocation13 + $0xc0] sm:$0xff]   ;;  %4278 = vmatprep.subr.bf16.mxu0 %v4769_v0  ;;  %v4774_v5 = vld [vmem:[#allocation13 + $0xc8] sm:$0xff]   ;;  %v4777_v8 = vld [vmem:[#allocation13 + $0x50] sm:$0xff]   ;;  %s6278_s9 = sld [smem:[#allocation47_spill]]  ;;  %s6279_s28 = sld [smem:[#allocation49_spill]] }
  0xe5   :  { %v4771_v2 = vld [vmem:[#allocation13] sm:$0xff]   ;;  %4300 = vmatprep.subr.bf16.mxu1 %v4770_v1  ;;  %v4775_v6 = vld [vmem:[#allocation13 + $0x8] sm:$0xff]   ;;  %v4778_v9 = vld [vmem:[#allocation13 + $0xd0] sm:$0xff]   ;;  %s5491_s25 = smov [#allocation23]  }
  0xe6   :  { %v4772_v3 = vld [vmem:[#allocation13 + $0x80] sm:$0xff]   ;;  %4279 = vmatpush3.bf16.msra.mxu0 %v4771_v2  ;;  %v4776_v7 = vld [vmem:[#allocation13 + $0x88] sm:$0xff]   ;;  %v4779_v10 = vld [vmem:[#allocation13 + $0x10] sm:$0xff]   ;;  %s3903_s6 = sshll.u32 %s5491_s25, 4  ;;  %s3904_s6 = int_to_ptr.vmem [resolvable:$true] %s3903_s6 }
  0xe7   :  { %4301 = vmatpush3.bf16.msra.mxu1 %v4772_v3  ;;  %4280 = vmatprep.subr.bf16.mxu0 %v4773_v4  ;;  %v4780_v11 = vld [vmem:[#allocation13 + $0x90] sm:$0xff]   ;;  %v4781_v12 = vld [vmem:[#allocation13 + $0x58] sm:$0xff]   ;;  %v4785_v16 = vld [vmem:[#allocation13 + $0x60] sm:$0xff]  }
  0xe8   :  { %4302 = vmatprep.subr.bf16.mxu1 %v4774_v5  ;;  %v4782_v13 = vld [vmem:[#allocation13 + $0xd8] sm:$0xff]   ;;  %v4786_v17 = vld [vmem:[#allocation13 + $0xe0] sm:$0xff]   ;;  %v4789_v20 = vld [vmem:[#allocation13 + $0x68] sm:$0xff]  }
  0xe9   :  { %v4783_v14 = vld [vmem:[#allocation13 + $0x18] sm:$0xff]   ;;  %v4787_v18 = vld [vmem:[#allocation13 + $0x20] sm:$0xff]   ;;  %v4790_v21 = vld [vmem:[#allocation13 + $0xe8] sm:$0xff]  }
  0xea   :  { %4281 = vmatpush3.bf16.msra.mxu0 %v4775_v6  ;;  %v4784_v15 = vld [vmem:[#allocation13 + $0x98] sm:$0xff]   ;;  %v4788_v19 = vld [vmem:[#allocation13 + $0xa0] sm:$0xff]   ;;  %v4791_v22 = vld [vmem:[#allocation13 + $0x28] sm:$0xff]  }
  0xeb   :  { %4303 = vmatpush3.bf16.msra.mxu1 %v4776_v7  ;;  %4282 = vmatprep.subr.bf16.mxu0 %v4777_v8  ;;  %v4792_v23 = vld [vmem:[#allocation13 + $0xa8] sm:$0xff]   ;;  %v4793_v24 = vld [vmem:[#allocation13 + $0x70] sm:$0xff]   ;;  %v4797_v28 = vld [vmem:[#allocation13 + $0x78] sm:$0xff]  }
  0xec   :  { %4304 = vmatprep.subr.bf16.mxu1 %v4778_v9  ;;  %v4794_v25 = vld [vmem:[#allocation13 + $0xf0] sm:$0xff]   ;;  %v4798_v29 = vld [vmem:[#allocation13 + $0xf8] sm:$0xff]   ;;  %v203_v37 = vld [vmem:[#allocation5 + $0x18] sm:$0xff] }
  0xed   :  { %v4795_v26 = vld [vmem:[#allocation13 + $0x30] sm:$0xff]   ;;  %v4799_v30 = vld [vmem:[#allocation13 + $0x38] sm:$0xff]   ;;  %v219_v38 = vld [vmem:[#allocation7 + $0x18] sm:$0xff]  ;;  %v295_v44 = vmul.f32 0.9, %v203_v37 }
  0xee   :  { %4283 = vmatpush3.bf16.msra.mxu0 %v4779_v10  ;;  %v4796_v27 = vld [vmem:[#allocation13 + $0xb0] sm:$0xff]   ;;  %v4800_v31 = vld [vmem:[#allocation13 + $0xb8] sm:$0xff]   ;;  %v247_v39 = vld [vmem:[#allocation2 + $0x18] sm:$0xff]  ;;  %v263_v42 = vmul.f32 0.85, %v219_v38 }
  0xef   :  { %4305 = vmatpush3.bf16.msra.mxu1 %v4780_v11  ;;  %4284 = vmatprep.subr.bf16.mxu0 %v4781_v12  ;;  %v201_v32 = vld [vmem:[#allocation5 + $0x8] sm:$0xff]  ;;  %v271_v43 = vmul.f32 6.6666665, %v247_v39  ;;  %v200_v45 = vld [vmem:[#allocation5] sm:$0xff]  ;;  %v202_v53 = vld [vmem:[#allocation5 + $0x10] sm:$0xff] }
  0xf0   :  { %4306 = vmatprep.subr.bf16.mxu1 %v4782_v13  ;;  %v217_v33 = vld [vmem:[#allocation7 + $0x8] sm:$0xff]  ;;  %v293_v41 = vmul.f32 0.9, %v201_v32  ;;  %v216_v46 = vld [vmem:[#allocation7] sm:$0xff]  ;;  %v292_v52 = vmul.f32 0.9, %v200_v45 }
  0xf1   :  { %v245_v34 = vld [vmem:[#allocation2 + $0x8] sm:$0xff]  ;;  %v261_v35 = vmul.f32 0.85, %v217_v33  ;;  %v244_v47 = vld [vmem:[#allocation2] sm:$0xff]  ;;  %v279_v49 = vadd.f32 %v271_v43, %v263_v42  ;;  %v260_v50 = vmul.f32 0.85, %v216_v46 }
  0xf2   :  { %4285 = vmatpush3.bf16.msra.mxu0 %v4783_v14  ;;  %v269_v36 = vmul.f32 6.6666665, %v245_v34  ;;  %v268_v51 = vmul.f32 6.6666665, %v244_v47  ;;  %v218_v54 = vld [vmem:[#allocation7 + $0x10] sm:$0xff]  ;;  %v4801_v60 = vld [vmem:[#allocation13 + $0x140] sm:$0xff]  }
  0xf3   :  { %4307 = vmatpush3.bf16.msra.mxu1 %v4784_v15  ;;  %4286 = vmatprep.subr.bf16.mxu0 %v4785_v16  ;;  %v246_v55 = vld [vmem:[#allocation2 + $0x10] sm:$0xff]  ;;  %v303_v57 = vmul.f32 10.0, %v279_v49  ;;  %1008 = vst [vmem:[#allocation20 + $0x18] sm:$0xff] %v279_v49  ;;  %v262_v59 = vmul.f32 0.85, %v218_v54  ;;  %v4802_v1 = vld [vmem:[#allocation13 + $0x1c0] sm:$0xff]  }
  0xf4   :  { %4308 = vmatprep.subr.bf16.mxu1 %v4786_v17  ;;  %v5763_v40 = vadd.f32 %v269_v36, %v261_v35  ;;  %v5768_v58 = vadd.f32 %v268_v51, %v260_v50  ;;  %v270_v61 = vmul.f32 6.6666665, %v246_v55  ;;  %v294_v3 = vmul.f32 0.9, %v202_v53  ;;  %v4803_v7 = vld [vmem:[#allocation13 + $0x100] sm:$0xff]   ;;  %v4805_v9 = vld [vmem:[#allocation13 + $0x148] sm:$0xff]  }
  0xf5   :  { %v311_v63 = vadd.f32 %v303_v57, %v295_v44  ;;  %v4804_v11 = vld [vmem:[#allocation13 + $0x180] sm:$0xff]   ;;  %v4806_v12 = vld [vmem:[#allocation13 + $0x1c8] sm:$0xff]   ;;  %v4809_v15 = vld [vmem:[#allocation13 + $0x150] sm:$0xff]  }
  0xf6   :  { %4287 = vmatpush3.bf16.msra.mxu0 %v4787_v18  ;;  %v301_v48 = vmul.f32 10.0, %v5763_v40  ;;  %v300_v0 = vmul.f32 10.0, %v5768_v58  ;;  %v278_v2 = vadd.f32 %v270_v61, %v262_v59  ;;  %v4807_v14 = vld [vmem:[#allocation13 + $0x108] sm:$0xff]   ;;  %v4810_v17 = vld [vmem:[#allocation13 + $0x1d0] sm:$0xff]   ;;  %v4829_v36 = vld [vmem:[#allocation13 + $0x178] sm:$0xff]  }
  0xf7   :  { %4309 = vmatpush3.bf16.msra.mxu1 %v4788_v19  ;;  %4288 = vmatprep.subr.bf16.mxu0 %v4789_v20  ;;  %v323_v4 = vpack.c.bf16 %v311_v63, %v311_v63  ;;  %1016 = vst [vmem:[#allocation19 + $0x18] sm:$0xff] %v311_v63  ;;  %v4808_v16 = vld [vmem:[#allocation13 + $0x188] sm:$0xff]   ;;  %v4811_v18 = vld [vmem:[#allocation13 + $0x110] sm:$0xff]   ;;  %v4813_v19 = vld [vmem:[#allocation13 + $0x158] sm:$0xff]  }
  0xf8   :  { %4310 = vmatprep.subr.bf16.mxu1 %v4790_v21  ;;  %v5766_v56 = vadd.f32 %v301_v48, %v293_v41  ;;  %v5773_v5 = vadd.f32 %v300_v0, %v292_v52  ;;  %v302_v6 = vmul.f32 10.0, %v278_v2  ;;  %1007 = vst [vmem:[#allocation20 + $0x10] sm:$0xff] %v278_v2  ;;  %v4812_v20 = vld [vmem:[#allocation13 + $0x190] sm:$0xff]   ;;  %v4814_v21 = vld [vmem:[#allocation13 + $0x1d8] sm:$0xff]   ;;  %v4824_v32 = vld [vmem:[#allocation13 + $0x1a8] sm:$0xff]  }
  0xf9   :  { %913 = vmatprep.mubr.bf16.mxu1 %v323_v4  ;;  %v4826_v33 = vld [vmem:[#allocation13 + $0x1f0] sm:$0xff]   ;;  %v4830_v37 = vld [vmem:[#allocation13 + $0x1f8] sm:$0xff]   ;;  %v207_v43 = vld [vmem:[#allocation5 + $0x38] sm:$0xff] }
  0xfa   :  { %4289 = vmatpush3.bf16.msra.mxu0 %v4791_v22  ;;  %v321_v62 = vpack.c.bf16 %v5766_v56, %v5766_v56  ;;  %v320_v8 = vpack.c.bf16 %v5773_v5, %v5773_v5  ;;  %v310_v10 = vadd.f32 %v302_v6, %v294_v3  ;;  %v4815_v22 = vld [vmem:[#allocation13 + $0x118] sm:$0xff]   ;;  %v4827_v34 = vld [vmem:[#allocation13 + $0x130] sm:$0xff]   ;;  %v223_v46 = vld [vmem:[#allocation7 + $0x38] sm:$0xff]  ;;  %v299_v59 = vmul.f32 0.9, %v207_v43 }
  0xfb   :  { %4311 = vmatpush3.bf16.msra.mxu1 %v4792_v23  ;;  %4290 = vmatprep.subr.bf16.mxu0 %v4793_v24  ;;  %v4817_v23 = vld [vmem:[#allocation13 + $0x160] sm:$0xff]   ;;  %v4816_v24 = vld [vmem:[#allocation13 + $0x198] sm:$0xff]   ;;  %v4828_v35 = vld [vmem:[#allocation13 + $0x1b0] sm:$0xff]   ;;  %v267_v49 = vmul.f32 0.85, %v223_v46 }
  0xfc   :  { %4312 = vmatprep.subr.bf16.mxu1 %v4794_v25  ;;  %873 = vmatprep.mubr.bf16.mxu0 %v321_v62  ;;  %v322_v13 = vpack.c.bf16 %v310_v10, %v310_v10  ;;  %1015 = vst [vmem:[#allocation19 + $0x10] sm:$0xff] %v310_v10  ;;  %v4818_v25 = vld [vmem:[#allocation13 + $0x1e0] sm:$0xff]   ;;  %v4831_v38 = vld [vmem:[#allocation13 + $0x138] sm:$0xff]   ;;  %v205_v39 = vld [vmem:[#allocation5 + $0x28] sm:$0xff]  ;;  %v1167_v43 = vmul.f32 0.85, %v5763_v40 }
  0xfd   :  { %v221_v41 = vld [vmem:[#allocation7 + $0x28] sm:$0xff]  ;;  %v251_v47 = vld [vmem:[#allocation2 + $0x38] sm:$0xff]  ;;  %v4832_v48 = vld [vmem:[#allocation13 + $0x1b8] sm:$0xff]   ;;  %v297_v52 = vmul.f32 0.9, %v205_v39 }
  0xfe   :  { %4291 = vmatpush3.bf16.msra.mxu0 %v4795_v26  ;;  %v4819_v26 = vld [vmem:[#allocation13 + $0x120] sm:$0xff]   ;;  %v249_v42 = vld [vmem:[#allocation2 + $0x28] sm:$0xff]  ;;  %v265_v44 = vmul.f32 0.85, %v221_v41  ;;  %v275_v50 = vmul.f32 6.6666665, %v251_v47 }
  0xff   :  { %4313 = vmatpush3.bf16.msra.mxu1 %v4796_v27  ;;  %4292 = vmatprep.subr.bf16.mxu0 %v4797_v28  ;;  %v4821_v27 = vld [vmem:[#allocation13 + $0x168] sm:$0xff]   ;;  %v4820_v28 = vld [vmem:[#allocation13 + $0x1a0] sm:$0xff]   ;;  %v273_v45 = vmul.f32 6.6666665, %v249_v42  ;;  %v206_v0 = vld [vmem:[#allocation5 + $0x30] sm:$0xff] }
 0x100   :  { %4314 = vmatprep.subr.bf16.mxu1 %v4798_v29  ;;  %v4822_v29 = vld [vmem:[#allocation13 + $0x1e8] sm:$0xff]   ;;  %v5779_v57 = vadd.f32 %v275_v50, %v267_v49  ;;  %v250_v2 = vld [vmem:[#allocation2 + $0x30] sm:$0xff]  ;;  %v4851_v39 = vld [vmem:[#allocation16 + $0x30] sm:$0xff]   ;;  %v1166_v49 = vmul.f32 0.85, %v5768_v58 }
 0x101   :  { %v5777_v51 = vadd.f32 %v273_v45, %v265_v44  ;;  %v204_v53 = vld [vmem:[#allocation5 + $0x20] sm:$0xff]  ;;  %v1151_v41 = vld [vmem:[#allocation2 + $0x48] sm:$0xff]  ;;  %v4854_v47 = vld [vmem:[#allocation16 + $0x38] sm:$0xff]   ;;  %v1198_v58 = vmul.f32 0.9, %v5773_v5 }
 0x102   :  { %4293 = vmatpush3.bf16.msra.mxu0 %v4799_v30  ;;  %v4823_v30 = vld [vmem:[#allocation13 + $0x128] sm:$0xff]   ;;  %v296_v63 = vmul.f32 0.9, %v204_v53  ;;  %v307_v3 = vmul.f32 10.0, %v5779_v57  ;;  %v4852_v42 = vld [vmem:[#allocation13 + $0x70] sm:$0xff]   ;;  %v4857_v50 = vld [vmem:[#allocation13 + $0xc0] sm:$0xff]  }
 0x103   :  { %4315 = vmatpush3.bf16.msra.mxu1 %v4800_v31  ;;  %4322 = vmatprep.subr.bf16.mxu0 %v4801_v60  ;;  %v4825_v31 = vld [vmem:[#allocation13 + $0x170] sm:$0xff]   ;;  %v220_v54 = vld [vmem:[#allocation7 + $0x20] sm:$0xff]  ;;  %v305_v62 = vmul.f32 10.0, %v5777_v51  ;;  %v1175_v44 = vmul.f32 6.6666665, %v1151_v41  ;;  %v4856_v40 = vld [vmem:[#allocation13 + $0x38] sm:$0xff]  }
 0x104   :  { %4344 = vmatprep.subr.bf16.mxu1 %v4802_v1  ;;  %v248_v55 = vld [vmem:[#allocation2 + $0x20] sm:$0xff]  ;;  %v264_v60 = vmul.f32 0.85, %v220_v54  ;;  %v222_v1 = vld [vmem:[#allocation7 + $0x30] sm:$0xff]  ;;  %v5787_v10 = vadd.f32 %v307_v3, %v299_v59  ;;  %v4853_v46 = vld [vmem:[#allocation13 + $0x30] sm:$0xff]  }
 0x105   :  { %874 = vmatmul.mubr.bf16.vlgmr.msra.gmra.mrb[0].mxu0 %v320_v8  ;;  %v272_v61 = vmul.f32 6.6666665, %v248_v55  ;;  %v266_v6 = vmul.f32 0.85, %v222_v1  ;;  %v5785_v8 = vadd.f32 %v305_v62, %v297_v52  ;;  %v1150_v45 = vld [vmem:[#allocation2 + $0x40] sm:$0xff]  ;;  %v5815_v52 = vadd.f32 %v1175_v44, %v1167_v43  ;;  %v4867_v3 = vld [vmem:[#allocation13 + $0x150] sm:$0xff]  }
 0x106   :  { %4323 = vmatpush3.bf16.msra.mxu0 %v4803_v7  ;;  %914 = vmatmul.mubr.bf16.vlgmr.msra.gmra.mrb[0].mxu1 %v322_v13  ;;  %v274_v7 = vmul.f32 6.6666665, %v250_v2  ;;  %v1174_v53 = vmul.f32 6.6666665, %v1150_v45  ;;  %v1199_v54 = vmul.f32 0.9, %v5766_v56 }
 0x107   :  { %4324 = vmatprep.subr.bf16.mxu0 %v4805_v9  ;;  %4345 = vmatpush3.bf16.msra.mxu1 %v4804_v11  ;;  %v5783_v4 = vadd.f32 %v272_v61, %v264_v60  ;;  %v298_v9 = vmul.f32 0.9, %v206_v0  ;;  %v325_v13 = vpack.c.bf16 %v5785_v8, %v5785_v8  ;;  %v1207_v55 = vmul.f32 10.0, %v5815_v52  ;;  %v4860_v56 = vld [vmem:[#allocation13 + $0x100] sm:$0xff]   ;;  %v4863_v5 = vld [vmem:[#allocation13 + $0x148] sm:$0xff]  }
 0x108   :  { %4346 = vmatprep.subr.bf16.mxu1 %v4806_v12  ;;  %v5790_v12 = vadd.f32 %v274_v7, %v266_v6  ;;  %v5821_v59 = vadd.f32 %v1174_v53, %v1166_v49  ;;  %v4864_v2 = vld [vmem:[#allocation13 + $0x108] sm:$0xff]   ;;  %v4868_v6 = vld [vmem:[#allocation13 + $0x110] sm:$0xff]   ;;  %v4871_v7 = vld [vmem:[#allocation13 + $0x158] sm:$0xff]  }
 0x109   :  { %v304_v11 = vmul.f32 10.0, %v5783_v4  ;;  %953 = vmatprep.mubr.bf16.mxu0 %v325_v13  ;;  %v5824_v60 = vadd.f32 %v1207_v55, %v1199_v54  ;;  %v4876_v13 = vld [vmem:[#allocation13 + $0x120] sm:$0xff]   ;;  %v232_v49 = vld [vmem:[%s6277_s29] sm:$0xff]  ;;  %v1161_v54 = vld [vmem:[#allocation20 + $0x18] sm:$0xff] }
 0x10a   :  { %4325 = vmatpush3.bf16.msra.mxu0 %v4807_v14  ;;  %v327_v14 = vpack.c.bf16 %v5787_v10, %v5787_v10  ;;  %v1206_v61 = vmul.f32 10.0, %v5821_v59  ;;  %v317_v53 = vmul.f32 0.65, %v232_v49  ;;  %v4874_v49 = vld [vmem:[#allocation13 + $0xa0] sm:$0xff]  }
 0x10b   :  { %4326 = vmatprep.subr.bf16.mxu0 %v4809_v15  ;;  %4347 = vmatpush3.bf16.msra.mxu1 %v4808_v16  ;;  %v5796_v15 = vadd.f32 %v304_v11, %v296_v63  ;;  %v306_v16 = vmul.f32 10.0, %v5790_v12  ;;  %v1227_v62 = vpack.c.bf16 %v5824_v60, %v5824_v60  ;;  %v4859_v63 = vld [vmem:[#allocation13 + $0x140] sm:$0xff]  }
 0x10c   :  { %4348 = vmatprep.subr.bf16.mxu1 %v4810_v17  ;;  %993 = vmatprep.mubr.bf16.mxu1 %v327_v14  ;;  %v5829_v0 = vadd.f32 %v1206_v61, %v1198_v58  ;;  %v4875_v11 = vld [vmem:[#allocation13 + $0x160] sm:$0xff]   ;;  %v4879_v14 = vld [vmem:[#allocation13 + $0x168] sm:$0xff]  }
 0x10d   :  { %v324_v17 = vpack.c.bf16 %v5796_v15, %v5796_v15  ;;  %v234_v58 = vld [vmem:[#allocation8] sm:$0xff] }
 0x10e   :  { %4327 = vmatpush3.bf16.msra.mxu0 %v4811_v18  ;;  %v5801_v18 = vadd.f32 %v306_v16, %v298_v9  ;;  %v1226_v1 = vpack.c.bf16 %v5829_v0, %v5829_v0  ;;  %v4872_v9 = vld [vmem:[#allocation13 + $0x118] sm:$0xff]   ;;  %v4880_v16 = vld [vmem:[#allocation13 + $0x128] sm:$0xff]  }
 0x10f   :  { %4328 = vmatprep.subr.bf16.mxu0 %v4813_v19  ;;  %4349 = vmatpush3.bf16.msra.mxu1 %v4812_v20  ;;  %v4833_v20 = vld [vmem:[#allocation16] sm:$0xff]  }
 0x110   :  { %4350 = vmatprep.subr.bf16.mxu1 %v4814_v21  ;;  %v326_v19 = vpack.c.bf16 %v5801_v18, %v5801_v18  ;;  %v4834_v21 = vld [vmem:[#allocation13 + $0x40] sm:$0xff]  }
 0x112   :  { %4329 = vmatpush3.bf16.msra.mxu0 %v4815_v22  ;;  %v4835_v22 = vld [vmem:[#allocation13] sm:$0xff]  }
 0x113   :  { %4330 = vmatprep.subr.bf16.mxu0 %v4817_v23  ;;  %4351 = vmatpush3.bf16.msra.mxu1 %v4816_v24  ;;  %v5488_v23 = vmov 0.0   ;;  %v4836_v24 = vld [vmem:[#allocation16 + $0x8] sm:$0xff]  }
 0x114   :  { %4352 = vmatprep.subr.bf16.mxu1 %v4818_v25  ;;  %v4837_v25 = vld [vmem:[#allocation13 + $0x48] sm:$0xff]  }
 0x116   :  { %4331 = vmatpush3.bf16.msra.mxu0 %v4819_v26  ;;  %v4838_v26 = vld [vmem:[#allocation13 + $0x8] sm:$0xff]  }
 0x117   :  { %4332 = vmatprep.subr.bf16.mxu0 %v4821_v27  ;;  %4353 = vmatpush3.bf16.msra.mxu1 %v4820_v28  ;;  %v4840_v27 = vld [vmem:[#allocation13 + $0x50] sm:$0xff]  }
 0x118   :  { %4354 = vmatprep.subr.bf16.mxu1 %v4822_v29  ;;  %v4839_v28 = vld [vmem:[#allocation16 + $0x10] sm:$0xff]  }
 0x119   :  { %v4841_v29 = vld [vmem:[#allocation13 + $0x10] sm:$0xff]  }
 0x11a   :  { %4333 = vmatpush3.bf16.msra.mxu0 %v4823_v30  ;;  %v4842_v30 = vld [vmem:[#allocation16 + $0x18] sm:$0xff]  }
 0x11b   :  { %4334 = vmatprep.subr.bf16.mxu0 %v4825_v31  ;;  %4355 = vmatpush3.bf16.msra.mxu1 %v4824_v32  ;;  %v4843_v31 = vld [vmem:[#allocation13 + $0x58] sm:$0xff]  }
 0x11c   :  { %4356 = vmatprep.subr.bf16.mxu1 %v4826_v33  ;;  %v4844_v32 = vld [vmem:[#allocation13 + $0x18] sm:$0xff]   ;;  %v4845_v33 = vld [vmem:[#allocation16 + $0x20] sm:$0xff]  }
 0x11e   :  { %4335 = vmatpush3.bf16.msra.mxu0 %v4827_v34  ;;  %v4846_v34 = vld [vmem:[#allocation13 + $0x60] sm:$0xff]  }
 0x11f   :  { %4336 = vmatprep.subr.bf16.mxu0 %v4829_v36  ;;  %4357 = vmatpush3.bf16.msra.mxu1 %v4828_v35  ;;  %v4847_v35 = vld [vmem:[#allocation13 + $0x20] sm:$0xff]   ;;  %v4848_v36 = vld [vmem:[#allocation16 + $0x28] sm:$0xff]  }
 0x120   :  { %4358 = vmatprep.subr.bf16.mxu1 %v4830_v37  ;;  %v4849_v37 = vld [vmem:[#allocation13 + $0x68] sm:$0xff]  }
 0x122   :  { %4337 = vmatpush3.bf16.msra.mxu0 %v4831_v38  ;;  %v4850_v38 = vld [vmem:[#allocation13 + $0x28] sm:$0xff]  }
 0x123   :  { %4359 = vmatpush3.bf16.msra.mxu1 %v4832_v48  ;;  %4666 = vmatprep.subr.bf16.mxu0 %v5488_v23  ;;  %v4855_v48 = vld [vmem:[#allocation13 + $0x78] sm:$0xff]  }
 0x124   :  { %4375 = vmatprep.subr.bf16.mxu1 %v4834_v21  ;;  %v4884_v21 = vld [vmem:[#allocation13 + $0x130] sm:$0xff]  }
 0x125   :  { %954 = vmatmul.mubr.bf16.vlgmr.msra.gmra.mrb[4].mxu0 %v324_v17  ;;  %v1155_v17 = vld [vmem:[#allocation2 + $0x68] sm:$0xff] }
 0x126   :  { %994 = vmatmul.mubr.bf16.vlgmr.msra.gmra.mrb[4].mxu1 %v326_v19  ;;  %4667 = vmatpush3.bf16.msra.mxu0 %v4833_v20  ;;  %v4883_v19 = vld [vmem:[#allocation13 + $0x170] sm:$0xff]   ;;  %v1171_v20 = vmul.f32 0.85, %v5777_v51  ;;  %v1202_v51 = vmul.f32 0.9, %v5796_v15 }
 0x127   :  { %4376 = vmatpush3.bf16.msra.mxu1 %v4835_v22  ;;  %4668 = vmatprep.subr.bf16.mxu0 %v5488_v23  ;;  %v1179_v22 = vmul.f32 6.6666665, %v1155_v17 }
 0x128   :  { %4377 = vmatprep.subr.bf16.mxu1 %v4837_v25  ;;  %4682 = vmatprep.mubr.msk.bf16.mxu0 %vm5489_vm0, %v5488_v23 }
 0x129   :  { %1779 = vmatprep.mubr.bf16.mxu1 %v1227_v62  ;;  %v5834_v25 = vadd.f32 %v1179_v22, %v1171_v20  ;;  %v236_v22 = vld [vmem:[%s6278_s9] sm:$0xff] }
 0x12a   :  { %4669 = vmatpush3.bf16.msra.mxu0 %v4836_v24  ;;  %v1154_v24 = vld [vmem:[#allocation2 + $0x60] sm:$0xff] }
 0x12b   :  { %4378 = vmatpush3.bf16.msra.mxu1 %v4838_v26  ;;  %4670 = vmatprep.subr.bf16.mxu0 %v5488_v23  ;;  %v1203_v26 = vmul.f32 0.9, %v5785_v8 }
 0x12c   :  { %4379 = vmatprep.subr.bf16.mxu1 %v4840_v27  ;;  %v1170_v27 = vmul.f32 0.85, %v5783_v4 }
 0x12e   :  { %4671 = vmatpush3.bf16.msra.mxu0 %v4839_v28  ;;  %v4887_v28 = vld [vmem:[#allocation13 + $0x178] sm:$0xff]  }
 0x12f   :  { %4672 = vmatprep.subr.bf16.mxu0 %v5488_v23  ;;  %4380 = vmatpush3.bf16.msra.mxu1 %v4841_v29  ;;  %v1178_v29 = vmul.f32 6.6666665, %v1154_v24 }
 0x130   :  { %4381 = vmatprep.subr.bf16.mxu1 %v4843_v31  ;;  %v1211_v31 = vmul.f32 10.0, %v5834_v25 }
 0x132   :  { %4673 = vmatpush3.bf16.msra.mxu0 %v4842_v30  ;;  %v4888_v30 = vld [vmem:[#allocation13 + $0x138] sm:$0xff]  }
 0x133   :  { %4674 = vmatprep.subr.bf16.mxu0 %v5488_v23  ;;  %4382 = vmatpush3.bf16.msra.mxu1 %v4844_v32  ;;  %v5839_v32 = vadd.f32 %v1178_v29, %v1170_v27  ;;  %v1028_v29 = vmul.f32 0.9, %v236_v22  ;;  %v4894_v22 = vld [vmem:[#allocation13 + $0x190] sm:$0xff]  }
 0x134   :  { %4383 = vmatprep.subr.bf16.mxu1 %v4846_v34 }
 0x135   :  { %v1210_v34 = vmul.f32 10.0, %v5839_v32 }
 0x136   :  { %4675 = vmatpush3.bf16.msra.mxu0 %v4845_v33  ;;  %v5842_v33 = vadd.f32 %v1211_v31, %v1203_v26 }
 0x137   :  { %4676 = vmatprep.subr.bf16.mxu0 %v5488_v23  ;;  %4384 = vmatpush3.bf16.msra.mxu1 %v4847_v35  ;;  %v5847_v4 = vadd.f32 %v1210_v34, %v1202_v51  ;;  %v4858_v34 = vld [vmem:[#allocation13 + $0x80] sm:$0xff]  }
 0x138   :  { %4385 = vmatprep.subr.bf16.mxu1 %v4849_v37  ;;  %v1231_v8 = vpack.c.bf16 %v5842_v33, %v5842_v33 }
 0x139   :  { %v1230_v35 = vpack.c.bf16 %v5847_v4, %v5847_v4 }
 0x13a   :  { %4677 = vmatpush3.bf16.msra.mxu0 %v4848_v36  ;;  %v5857_v36 = vld [vmem:[%s6238_s10] sm:$0xff] }
 0x13b   :  { %4678 = vmatprep.subr.bf16.mxu0 %v5488_v23  ;;  %4386 = vmatpush3.bf16.msra.mxu1 %v4850_v38 }
 0x13c   :  { %4387 = vmatprep.subr.bf16.mxu1 %v4852_v42 }
 0x13e   :  { %4679 = vmatpush3.bf16.msra.mxu0 %v4851_v39 }
 0x13f   :  { %4680 = vmatprep.subr.bf16.mxu0 %v5488_v23  ;;  %4388 = vmatpush3.bf16.msra.mxu1 %v4853_v46 }
 0x140   :  { %4389 = vmatprep.subr.bf16.mxu1 %v4855_v48 }
 0x142   :  { %4681 = vmatpush3.bf16.msra.mxu0 %v4854_v47 }
 0x143   :  { %4397 = vmatprep.subr.bf16.mxu0 %v4857_v50  ;;  %4390 = vmatpush3.bf16.msra.mxu1 %v4856_v40  ;;  %v1153_v40 = vld [vmem:[#allocation2 + $0x58] sm:$0xff] }
 0x144   :  { %4419 = vmatprep.subr.bf16.mxu1 %v4859_v63 }
 0x146   :  { %1780 = vmatmul.mubr.bf16.vlgmr.msra.gmra.mrb[8].mxu1 %v1226_v1 }
 0x147   :  { %4420 = vmatpush3.bf16.msra.mxu1 %v4860_v56  ;;  %1859 = vmatprep.mubr.bf16.mxu1 %v1231_v8 }
 0x148   :  { %4421 = vmatprep.subr.bf16.mxu1 %v4863_v5  ;;  %v1169_v5 = vmul.f32 0.85, %v1161_v54 }
 0x14b   :  { %4422 = vmatpush3.bf16.msra.mxu1 %v4864_v2  ;;  %v1177_v2 = vmul.f32 6.6666665, %v1153_v40  ;;  %v4877_v40 = vld [vmem:[#allocation13 + $0xe8] sm:$0xff]  }
 0x14c   :  { %4423 = vmatprep.subr.bf16.mxu1 %v4867_v3 }
 0x14f   :  { %4424 = vmatpush3.bf16.msra.mxu1 %v4868_v6  ;;  %v5863_v6 = vsub.f32 %v317_v53, %v234_v58  ;;  %v1192_v58 = vld [vmem:[#allocation19 + $0x10] sm:$0xff] }
 0x150   :  { %4425 = vmatprep.subr.bf16.mxu1 %v4871_v7 }
 0x153   :  { %4426 = vmatpush3.bf16.msra.mxu1 %v4872_v9 }
 0x154   :  { %4427 = vmatprep.subr.bf16.mxu1 %v4875_v11 }
 0x157   :  { %4428 = vmatpush3.bf16.msra.mxu1 %v4876_v13 }
 0x158   :  { %4429 = vmatprep.subr.bf16.mxu1 %v4879_v14  ;;  %v238_v14 = vld [vmem:[#allocation10] sm:$0xff] }
 0x159   :  { %v1024_v20 = vmul.f32 0.85, %v238_v14  ;;  %v4890_v14 = vld [vmem:[#allocation13 + $0x180] sm:$0xff]  }
 0x15b   :  { %4430 = vmatpush3.bf16.msra.mxu1 %v4880_v16  ;;  %v5865_v16 = vadd.f32 %v1177_v2, %v1169_v5  ;;  %v1205_v5 = vmul.f32 0.9, %v5787_v10  ;;  %v4885_v2 = vld [vmem:[#allocation13 + $0xf8] sm:$0xff]  }
 0x15c   :  { %4431 = vmatprep.subr.bf16.mxu1 %v4883_v19  ;;  %v1193_v19 = vld [vmem:[#allocation19 + $0x18] sm:$0xff] }
 0x15d   :  { %v1201_v24 = vmul.f32 0.9, %v1193_v19  ;;  %v1209_v26 = vmul.f32 10.0, %v5865_v16  ;;  %v4892_v19 = vld [vmem:[#allocation13 + $0x188] sm:$0xff]  }
 0x15f   :  { %4432 = vmatpush3.bf16.msra.mxu1 %v4884_v21 }
 0x160   :  { %4433 = vmatprep.subr.bf16.mxu1 %v4887_v28 }
 0x163   :  { %4434 = vmatpush3.bf16.msra.mxu1 %v4888_v30  ;;  %v5878_v30 = vadd.f32 %v1209_v26, %v1201_v24  ;;  %v4895_v24 = vld [vmem:[#allocation13 + $0x1d8] sm:$0xff]  }
 0x164   :  { %4686 = vmatprep.subr.bf16.mxu1 %v5488_v23  ;;  %v4896_v26 = vld [vmem:[#allocation13 + $0x198] sm:$0xff]  }
 0x165   :  { %v1229_v8 = vpack.c.bf16 %v5878_v30, %v5878_v30 }
 0x166   :  { %1860 = vmatmul.mubr.bf16.vlgmr.msra.gmra.mrb[12].mxu1 %v1230_v35 }
 0x167   :  { %4702 = vmatprep.mubr.msk.bf16.mxu1 %vm5489_vm0, %v5488_v23 }
 0x1d8   :  { %v4294_v15 = vpop.f32.mrb[0].mxu0 }
 0x1d9   :  { %v4295_v37 = vpop.f32.mrb[1].mxu0  ;;  %v4316_v41 = vpop.f32.mrb[0].mxu1 }
 0x1da   :  { %v4296_v38 = vadd.f32 %v4295_v37, %v4294_v15  ;;  %v4297_v39 = vpop.f32.mrb[2].mxu0  ;;  %v4317_v44 = vpop.f32.mrb[1].mxu1  ;;  %v4861_v15 = vld [vmem:[#allocation13 + $0xc8] sm:$0xff]  }
 0x1db   :  { %v4298_v42 = vpop.f32.mrb[3].mxu0  ;;  %v4318_v45 = vadd.f32 %v4317_v44, %v4316_v41  ;;  %v4319_v46 = vpop.f32.mrb[2].mxu1  ;;  %v4862_v37 = vld [vmem:[#allocation13 + $0x88] sm:$0xff]   ;;  %v4866_v39 = vld [vmem:[#allocation13 + $0x90] sm:$0xff]   ;;  %v4869_v41 = vld [vmem:[#allocation13 + $0xd8] sm:$0xff]  }
 0x1dc   :  { %v876_v43 = vadd.f32 %v4296_v38, %v5857_v36  ;;  %v4320_v47 = vpop.f32.mrb[3].mxu1  ;;  %v4865_v38 = vld [vmem:[#allocation13 + $0xd0] sm:$0xff]   ;;  %v4870_v42 = vld [vmem:[#allocation13 + $0x98] sm:$0xff]   ;;  %v1157_v46 = vld [vmem:[#allocation2 + $0x78] sm:$0xff] }
 0x1dd   :  { %v1160_v44 = vld [vmem:[#allocation20 + $0x10] sm:$0xff]  ;;  %v1181_v53 = vmul.f32 6.6666665, %v1157_v46 }
 0x1de   :  { %v916_v48 = vadd.f32 %v4318_v45, %v876_v43  ;;  %v1152_v43 = vld [vmem:[#allocation2 + $0x50] sm:$0xff]  ;;  %v4873_v45 = vld [vmem:[#allocation13 + $0xe0] sm:$0xff]   ;;  %v1168_v47 = vmul.f32 0.85, %v1160_v44 }
 0x1df   :  { %v4904_v44 = vld [vmem:[#allocation13 + $0x1b8] sm:$0xff]  }
 0x1f8   :  { %v4338_v50 = vpop.f32.mrb[4].mxu0 }
 0x1f9   :  { %v4339_v55 = vpop.f32.mrb[5].mxu0  ;;  %v4360_v61 = vpop.f32.mrb[4].mxu1 }
 0x1fa   :  { %v4340_v62 = vadd.f32 %v4339_v55, %v4338_v50  ;;  %v4341_v63 = vpop.f32.mrb[6].mxu0  ;;  %v4361_v56 = vpop.f32.mrb[5].mxu1  ;;  %v1173_v50 = vmul.f32 0.85, %v5779_v57  ;;  %v4878_v55 = vld [vmem:[#allocation13 + $0xa8] sm:$0xff]  }
 0x1fb   :  { %v4342_v1 = vpop.f32.mrb[7].mxu0  ;;  %v4362_v7 = vadd.f32 %v4361_v56, %v4360_v61  ;;  %v4363_v9 = vpop.f32.mrb[6].mxu1  ;;  %v1200_v63 = vmul.f32 0.9, %v1192_v58  ;;  %v4909_v58 = vld [vmem:[#allocation13 + $0x48] sm:$0xff]  }
 0x1fc   :  { %v956_v3 = vadd.f32 %v4340_v62, %v916_v48  ;;  %v4364_v11 = vpop.f32.mrb[7].mxu1  ;;  %v1176_v48 = vmul.f32 6.6666665, %v1152_v43  ;;  %v5890_v61 = vadd.f32 %v1181_v53, %v1173_v50  ;;  %v4881_v62 = vld [vmem:[#allocation13 + $0xf0] sm:$0xff]   ;;  %v4903_v43 = vld [vmem:[#allocation13 + $0x1f8] sm:$0xff]   ;;  %v4905_v50 = vld [vmem:[#allocation16] sm:$0xff]  }
 0x1fd   :  { %v4882_v1 = vld [vmem:[#allocation13 + $0xb0] sm:$0xff]   ;;  %v4889_v11 = vld [vmem:[#allocation13 + $0x1c0] sm:$0xff]   ;;  %4687 = vmatpush3.bf16.msra.mxu1 %v4905_v50 }
 0x1fe   :  { %v996_v13 = vadd.f32 %v4362_v7, %v956_v3  ;;  %v5888_v54 = vadd.f32 %v1176_v48, %v1168_v47  ;;  %v1213_v57 = vmul.f32 10.0, %v5890_v61  ;;  %v4886_v7 = vld [vmem:[#allocation13 + $0xb8] sm:$0xff]   ;;  %v4906_v53 = vld [vmem:[#allocation13 + $0x40] sm:$0xff]   ;;  %4688 = vmatprep.subr.bf16.mxu1 %v5488_v23 }
 0x200   :  { %v1001_v17 = vadd.f32 %v996_v13, %v5863_v6  ;;  %v1208_v56 = vmul.f32 10.0, %v5888_v54  ;;  %v5897_v9 = vadd.f32 %v1213_v57, %v1205_v5  ;;  %v4912_v57 = vld [vmem:[#allocation13 + $0x50] sm:$0xff]  }
 0x202   :  { %vm1002_vm1 = vcmp.gt.f32.partialorder %v1001_v17, 0.0  ;;  %v5895_v3 = vadd.f32 %v1208_v56, %v1200_v63  ;;  %v1233_v10 = vpack.c.bf16 %v5897_v9, %v5897_v9  ;;  %v4891_v17 = vld [vmem:[#allocation13 + $0x1c8] sm:$0xff]  }
 0x203   :  { %v5869_v21 = vsel %vm1002_vm1, 1.0, %v5488_v23  ;;  %v4908_v63 = vld [vmem:[#allocation16 + $0x8] sm:$0xff]  }
 0x204   :  { %v1025_v27 = vmul.f32 6.6666665, %v5869_v21  ;;  %v1228_v13 = vpack.c.bf16 %v5895_v3, %v5895_v3  ;;  %4689 = vmatpush3.bf16.msra.mxu1 %v4908_v63  ;;  %v4940_v63 = vld [vmem:[#allocation13 + $0x110] sm:$0xff]  }
 0x205   :  { %4690 = vmatprep.subr.bf16.mxu1 %v5488_v23 }
 0x206   :  { %v5876_v28 = vadd.f32 %v1025_v27, %v1024_v20  ;;  %v4893_v20 = vld [vmem:[#allocation13 + $0x1d0] sm:$0xff]   ;;  %v1156_v27 = vld [vmem:[#allocation2 + $0x70] sm:$0xff] }
 0x208   :  { %v1029_v31 = vmul.f32 10.0, %v5876_v28 }
 0x20a   :  { %v5881_v51 = vadd.f32 %v1029_v31, %v1028_v29  ;;  %v4897_v29 = vld [vmem:[#allocation13 + $0x1e0] sm:$0xff]   ;;  %v1172_v31 = vmul.f32 0.85, %v5790_v12 }
 0x20c   :  { %v1035_v35 = vpack.c.bf16 %v5881_v51, %v5881_v51 }
 0x20e   :  { %4683 = vmatmul.mubr.bf16.vlgmr.msra.gmra.mrb[8].mxu0 %v1035_v35  ;;  %v4899_v35 = vld [vmem:[#allocation13 + $0x1e8] sm:$0xff]  }
 0x20f   :  { %4398 = vmatpush3.bf16.msra.mxu0 %v4858_v34  ;;  %1819 = vmatprep.mubr.bf16.mxu0 %v1229_v8  ;;  %v1180_v34 = vmul.f32 6.6666665, %v1156_v27  ;;  %v4898_v8 = vld [vmem:[#allocation13 + $0x1a0] sm:$0xff]   ;;  %v4923_v27 = vld [vmem:[#allocation16 + $0x30] sm:$0xff]  }
 0x210   :  { %4399 = vmatprep.subr.bf16.mxu0 %v4861_v15 }
 0x211   :  { %v5904_v15 = vadd.f32 %v1180_v34, %v1172_v31  ;;  %v4924_v31 = vld [vmem:[#allocation13 + $0x70] sm:$0xff]   ;;  %v2073_v34 = vmul.f32 0.85, %v5815_v52  ;;  %v2105_v52 = vmul.f32 0.9, %v5824_v60 }
 0x213   :  { %4400 = vmatpush3.bf16.msra.mxu0 %v4862_v37  ;;  %v4900_v37 = vld [vmem:[#allocation13 + $0x1a8] sm:$0xff]  }
 0x214   :  { %4401 = vmatprep.subr.bf16.mxu0 %v4865_v38  ;;  %v4901_v38 = vld [vmem:[#allocation13 + $0x1f0] sm:$0xff]  }
 0x217   :  { %4402 = vmatpush3.bf16.msra.mxu0 %v4866_v39  ;;  %v1204_v39 = vmul.f32 0.9, %v5801_v18 }
 0x218   :  { %4403 = vmatprep.subr.bf16.mxu0 %v4869_v41  ;;  %v1212_v41 = vmul.f32 10.0, %v5904_v15 }
 0x219   :  { %v4391_v46 = vpop.f32.mrb[8].mxu1 }
 0x21a   :  { %v5908_v12 = vadd.f32 %v1212_v41, %v1204_v39  ;;  %v4392_v47 = vpop.f32.mrb[9].mxu1  ;;  %v4926_v41 = vld [vmem:[#allocation16 + $0x38] sm:$0xff]  }
 0x21b   :  { %4404 = vmatpush3.bf16.msra.mxu0 %v4870_v42  ;;  %v4902_v42 = vld [vmem:[#allocation13 + $0x1b0] sm:$0xff]   ;;  %v5912_v48 = vadd.f32 %v4392_v47, %v4391_v46  ;;  %v4394_v18 = vpop.f32.mrb[10].mxu1 }
 0x21c   :  { %4405 = vmatprep.subr.bf16.mxu0 %v4873_v45  ;;  %v1232_v45 = vpack.c.bf16 %v5908_v12, %v5908_v12 }
 0x21f   :  { %4406 = vmatpush3.bf16.msra.mxu0 %v4874_v49  ;;  %v4395_v49 = vpop.f32.mrb[11].mxu1 }
 0x220   :  { %4407 = vmatprep.subr.bf16.mxu0 %v4877_v40  ;;  %v4907_v40 = vld [vmem:[#allocation13] sm:$0xff]  }
 0x223   :  { %4408 = vmatpush3.bf16.msra.mxu0 %v4878_v55 }
 0x224   :  { %4409 = vmatprep.subr.bf16.mxu0 %v4881_v62 }
 0x227   :  { %4410 = vmatpush3.bf16.msra.mxu0 %v4882_v1  ;;  %v4910_v1 = vld [vmem:[#allocation13 + $0x8] sm:$0xff]  }
 0x228   :  { %4411 = vmatprep.subr.bf16.mxu0 %v4885_v2 }
 0x22b   :  { %4412 = vmatpush3.bf16.msra.mxu0 %v4886_v7  ;;  %v4911_v7 = vld [vmem:[#allocation16 + $0x10] sm:$0xff]  }
 0x22c   :  { %4441 = vmatprep.subr.bf16.mxu0 %v4889_v11  ;;  %v4913_v11 = vld [vmem:[#allocation13 + $0x10] sm:$0xff]   ;;  %4691 = vmatpush3.bf16.msra.mxu1 %v4911_v7  ;;  %v4951_v7 = vld [vmem:[#allocation13 + $0x168] sm:$0xff]  }
 0x22d   :  { %4692 = vmatprep.subr.bf16.mxu1 %v5488_v23 }
 0x22e   :  { %1820 = vmatmul.mubr.bf16.vlgmr.msra.gmra.mrb[12].mxu0 %v1228_v13  ;;  %v4914_v13 = vld [vmem:[#allocation16 + $0x18] sm:$0xff]  }
 0x22f   :  { %4442 = vmatpush3.bf16.msra.mxu0 %v4890_v14  ;;  %1899 = vmatprep.mubr.bf16.mxu0 %v1233_v10  ;;  %v4915_v14 = vld [vmem:[#allocation13 + $0x58] sm:$0xff]  }
 0x230   :  { %4443 = vmatprep.subr.bf16.mxu0 %v4891_v17  ;;  %4693 = vmatpush3.bf16.msra.mxu1 %v4914_v13  ;;  %v4916_v10 = vld [vmem:[#allocation13 + $0x18] sm:$0xff]   ;;  %v4917_v17 = vld [vmem:[#allocation16 + $0x20] sm:$0xff]   ;;  %v2061_v13 = vld [vmem:[#allocation2 + $0xa8] sm:$0xff] }
 0x231   :  { %4694 = vmatprep.subr.bf16.mxu1 %v5488_v23 }
 0x233   :  { %4444 = vmatpush3.bf16.msra.mxu0 %v4892_v19  ;;  %v4918_v19 = vld [vmem:[#allocation13 + $0x60] sm:$0xff]  }
 0x234   :  { %4445 = vmatprep.subr.bf16.mxu0 %v4893_v20  ;;  %4695 = vmatpush3.bf16.msra.mxu1 %v4917_v17  ;;  %v4919_v20 = vld [vmem:[#allocation13 + $0x20] sm:$0xff]   ;;  %v4955_v17 = vld [vmem:[#allocation13 + $0x170] sm:$0xff]  }
 0x235   :  { %4696 = vmatprep.subr.bf16.mxu1 %v5488_v23 }
 0x237   :  { %4446 = vmatpush3.bf16.msra.mxu0 %v4894_v22  ;;  %v4920_v22 = vld [vmem:[#allocation16 + $0x28] sm:$0xff]  }
 0x238   :  { %4447 = vmatprep.subr.bf16.mxu0 %v4895_v24  ;;  %v4921_v24 = vld [vmem:[#allocation13 + $0x68] sm:$0xff]   ;;  %4697 = vmatpush3.bf16.msra.mxu1 %v4920_v22  ;;  %v4956_v22 = vld [vmem:[#allocation13 + $0x130] sm:$0xff]  }
 0x239   :  { %v4435_v55 = vpop.f32.mrb[12].mxu1  ;;  %4698 = vmatprep.subr.bf16.mxu1 %v5488_v23 }
 0x23a   :  { %v4436_v62 = vpop.f32.mrb[13].mxu1 }
 0x23b   :  { %4448 = vmatpush3.bf16.msra.mxu0 %v4896_v26  ;;  %v5914_v56 = vadd.f32 %v4436_v62, %v4435_v55  ;;  %v4438_v5 = vpop.f32.mrb[14].mxu1  ;;  %v4922_v26 = vld [vmem:[#allocation13 + $0x28] sm:$0xff]   ;;  %v4932_v55 = vld [vmem:[#allocation13 + $0x100] sm:$0xff]   ;;  %v4939_v62 = vld [vmem:[#allocation13 + $0x150] sm:$0xff]  }
 0x23c   :  { %4449 = vmatprep.subr.bf16.mxu0 %v4897_v29  ;;  %v4439_v2 = vpop.f32.mrb[15].mxu1  ;;  %v2057_v29 = vld [vmem:[#allocation2 + $0x88] sm:$0xff]  ;;  %4699 = vmatpush3.bf16.msra.mxu1 %v4923_v27  ;;  %v4944_v5 = vld [vmem:[#allocation13 + $0x118] sm:$0xff]   ;;  %v2109_v27 = vmul.f32 0.9, %v5842_v33 }
 0x23d   :  { %4700 = vmatprep.subr.bf16.mxu1 %v5488_v23  ;;  %v4948_v2 = vld [vmem:[#allocation13 + $0x120] sm:$0xff]  }
 0x23f   :  { %4450 = vmatpush3.bf16.msra.mxu0 %v4898_v8  ;;  %v2081_v8 = vmul.f32 6.6666665, %v2057_v29 }
 0x240   :  { %4451 = vmatprep.subr.bf16.mxu0 %v4899_v35  ;;  %v2056_v35 = vld [vmem:[#allocation2 + $0x80] sm:$0xff]  ;;  %4701 = vmatpush3.bf16.msra.mxu1 %v4926_v41 }
 0x241   :  { %v2080_v39 = vmul.f32 6.6666665, %v2056_v35 }
 0x243   :  { %4452 = vmatpush3.bf16.msra.mxu0 %v4900_v37  ;;  %v4925_v37 = vld [vmem:[#allocation13 + $0x30] sm:$0xff]  }
 0x244   :  { %4453 = vmatprep.subr.bf16.mxu0 %v4901_v38  ;;  %v2072_v38 = vmul.f32 0.85, %v5821_v59  ;;  %v2104_v59 = vmul.f32 0.9, %v5829_v0  ;;  %v4935_v0 = vld [vmem:[#allocation13 + $0x148] sm:$0xff]  }
 0x246   :  { %v5927_v46 = vadd.f32 %v2080_v39, %v2072_v38 }
 0x247   :  { %4454 = vmatpush3.bf16.msra.mxu0 %v4902_v42  ;;  %v4927_v42 = vld [vmem:[#allocation13 + $0x78] sm:$0xff]  }
 0x248   :  { %4455 = vmatprep.subr.bf16.mxu0 %v4903_v43  ;;  %v5925_v43 = vadd.f32 %v2081_v8, %v2073_v34  ;;  %v2112_v18 = vmul.f32 10.0, %v5927_v46  ;;  %v4960_v8 = vld [vmem:[#allocation13 + $0x138] sm:$0xff]  }
 0x24a   :  { %v2113_v47 = vmul.f32 10.0, %v5925_v43  ;;  %v5935_v50 = vadd.f32 %v2112_v18, %v2104_v59 }
 0x24b   :  { %4456 = vmatpush3.bf16.msra.mxu0 %v4904_v44  ;;  %v4928_v44 = vld [vmem:[#allocation13 + $0x38] sm:$0xff]  }
 0x24c   :  { %4472 = vmatprep.subr.bf16.mxu0 %v4906_v53  ;;  %v5933_v49 = vadd.f32 %v2113_v47, %v2105_v52  ;;  %v2132_v60 = vpack.c.bf16 %v5935_v50, %v5935_v50 }
 0x24e   :  { %1900 = vmatmul.mubr.bf16.vlgmr.msra.gmra.mrb[16].mxu0 %v1232_v45  ;;  %v4929_v45 = vld [vmem:[#allocation13 + $0xc0] sm:$0xff]   ;;  %v2133_v53 = vpack.c.bf16 %v5933_v49, %v5933_v49 }
 0x24f   :  { %4473 = vmatpush3.bf16.msra.mxu0 %v4907_v40  ;;  %4494 = vmatprep.subr.bf16.mxu1 %v4929_v45  ;;  %v4931_v40 = vld [vmem:[#allocation13 + $0x140] sm:$0xff]  }
 0x250   :  { %4474 = vmatprep.subr.bf16.mxu0 %v4909_v58  ;;  %2685 = vmatprep.mubr.bf16.mxu0 %v2133_v53  ;;  %v4936_v58 = vld [vmem:[#allocation13 + $0x108] sm:$0xff]  }
 0x253   :  { %4475 = vmatpush3.bf16.msra.mxu0 %v4910_v1  ;;  %v4943_v1 = vld [vmem:[#allocation13 + $0x158] sm:$0xff]  }
 0x254   :  { %4476 = vmatprep.subr.bf16.mxu0 %v4912_v57  ;;  %v4947_v57 = vld [vmem:[#allocation13 + $0x160] sm:$0xff]  }
 0x257   :  { %4477 = vmatpush3.bf16.msra.mxu0 %v4913_v11  ;;  %v4952_v11 = vld [vmem:[#allocation13 + $0x128] sm:$0xff]  }
 0x258   :  { %4478 = vmatprep.subr.bf16.mxu0 %v4915_v14  ;;  %v2077_v14 = vmul.f32 0.85, %v5834_v25  ;;  %v2108_v25 = vmul.f32 0.9, %v5847_v4 }
 0x25b   :  { %4479 = vmatpush3.bf16.msra.mxu0 %v4916_v10  ;;  %v2085_v10 = vmul.f32 6.6666665, %v2061_v13 }
 0x25c   :  { %4480 = vmatprep.subr.bf16.mxu0 %v4918_v19  ;;  %v2060_v19 = vld [vmem:[#allocation2 + $0xa0] sm:$0xff] }
 0x25f   :  { %4481 = vmatpush3.bf16.msra.mxu0 %v4919_v20  ;;  %v2076_v20 = vmul.f32 0.85, %v5839_v32 }
 0x260   :  { %4482 = vmatprep.subr.bf16.mxu0 %v4921_v24  ;;  %v5943_v24 = vadd.f32 %v2085_v10, %v2077_v14 }
 0x262   :  { %v2117_v29 = vmul.f32 10.0, %v5943_v24 }
 0x263   :  { %4483 = vmatpush3.bf16.msra.mxu0 %v4922_v26  ;;  %v2084_v26 = vmul.f32 6.6666665, %v2060_v19 }
 0x264   :  { %4484 = vmatprep.subr.bf16.mxu0 %v4924_v31  ;;  %v4959_v31 = vld [vmem:[#allocation13 + $0x178] sm:$0xff]   ;;  %v5950_v35 = vadd.f32 %v2117_v29, %v2109_v27  ;;  %v4937_v27 = vld [vmem:[#allocation13 + $0xd0] sm:$0xff]  }
 0x265   :  { %v5947_v34 = vadd.f32 %v2084_v26, %v2076_v20  ;;  %v4930_v20 = vld [vmem:[#allocation13 + $0x80] sm:$0xff]   ;;  %v4934_v26 = vld [vmem:[#allocation13 + $0x88] sm:$0xff]   ;;  %v4938_v29 = vld [vmem:[#allocation13 + $0x90] sm:$0xff]  }
 0x267   :  { %4485 = vmatpush3.bf16.msra.mxu0 %v4925_v37  ;;  %v2116_v32 = vmul.f32 10.0, %v5947_v34  ;;  %v2137_v37 = vpack.c.bf16 %v5950_v35, %v5950_v35 }
 0x268   :  { %4486 = vmatprep.subr.bf16.mxu0 %v4927_v42 }
 0x269   :  { %v5955_v38 = vadd.f32 %v2116_v32, %v2108_v25  ;;  %v2058_v25 = vld [vmem:[#allocation2 + $0x90] sm:$0xff]  ;;  %v2063_v32 = vld [vmem:[#allocation2 + $0xb8] sm:$0xff] }
 0x26b   :  { %4487 = vmatpush3.bf16.msra.mxu0 %v4928_v44  ;;  %v2136_v33 = vpack.c.bf16 %v5955_v38, %v5955_v38  ;;  %v1782_v44 = vadd.f32 %v5912_v48, %v5857_v36 }
 0x26c   :  { %4516 = vmatprep.subr.bf16.mxu0 %v4931_v40 }
 0x26e   :  { %2686 = vmatmul.mubr.bf16.vlgmr.msra.gmra.mrb[20].mxu0 %v2132_v60  ;;  %v2059_v60 = vld [vmem:[#allocation2 + $0x98] sm:$0xff] }
 0x26f   :  { %4517 = vmatpush3.bf16.msra.mxu0 %v4932_v55  ;;  %2765 = vmatprep.mubr.bf16.mxu0 %v2137_v37  ;;  %v2074_v37 = vmul.f32 0.85, %v5888_v54 }
 0x270   :  { %4518 = vmatprep.subr.bf16.mxu0 %v4935_v0  ;;  %v1223_v0 = vmul.f32 0.65, %v5863_v6  ;;  %v2107_v6 = vmul.f32 0.9, %v5878_v30 }
 0x272   :  { %v5970_v36 = vsub.f32 %v1223_v0, %v5869_v21  ;;  %v4958_v0 = vld [vmem:[#allocation13 + $0xb8] sm:$0xff]  }
 0x273   :  { %4519 = vmatpush3.bf16.msra.mxu0 %v4936_v58 }
 0x274   :  { %4520 = vmatprep.subr.bf16.mxu0 %v4939_v62  ;;  %v2075_v62 = vmul.f32 0.85, %v5865_v16 }
 0x277   :  { %4521 = vmatpush3.bf16.msra.mxu0 %v4940_v63  ;;  %v2083_v63 = vmul.f32 6.6666665, %v2059_v60  ;;  %v4957_v60 = vld [vmem:[#allocation13 + $0xf8] sm:$0xff]  }
 0x278   :  { %4522 = vmatprep.subr.bf16.mxu0 %v4943_v1 }
 0x27b   :  { %4523 = vmatpush3.bf16.msra.mxu0 %v4944_v5 }
 0x27c   :  { %4524 = vmatprep.subr.bf16.mxu0 %v4947_v57 }
 0x27f   :  { %4525 = vmatpush3.bf16.msra.mxu0 %v4948_v2  ;;  %v5972_v2 = vadd.f32 %v2083_v63, %v2075_v62  ;;  %v4961_v62 = vld [vmem:[#allocation13 + $0x1c0] sm:$0xff]  }
 0x280   :  { %4526 = vmatprep.subr.bf16.mxu0 %v4951_v7  ;;  %v4962_v63 = vld [vmem:[#allocation13 + $0x180] sm:$0xff]  }
 0x281   :  { %v2115_v16 = vmul.f32 10.0, %v5972_v2 }
 0x283   :  { %4527 = vmatpush3.bf16.msra.mxu0 %v4952_v11  ;;  %v1930_v11 = vmul.f32 0.85, %v5876_v28  ;;  %v5984_v21 = vadd.f32 %v2115_v16, %v2107_v6  ;;  %v4933_v28 = vld [vmem:[#allocation13 + $0xc8] sm:$0xff]   ;;  %v4968_v6 = vld [vmem:[#allocation13 + $0x198] sm:$0xff]  }
 0x284   :  { %4528 = vmatprep.subr.bf16.mxu0 %v4955_v17  ;;  %v1934_v17 = vmul.f32 0.9, %v5881_v51  ;;  %v4941_v51 = vld [vmem:[#allocation13 + $0xd8] sm:$0xff]  }
 0x285   :  { %v2135_v30 = vpack.c.bf16 %v5984_v21, %v5984_v21  ;;  %v2062_v16 = vld [vmem:[#allocation2 + $0xb0] sm:$0xff] }
 0x287   :  { %4529 = vmatpush3.bf16.msra.mxu0 %v4956_v22 }
 0x288   :  { %4530 = vmatprep.subr.bf16.mxu0 %v4959_v31  ;;  %v4942_v31 = vld [vmem:[#allocation13 + $0x98] sm:$0xff]  }
 0x28b   :  { %4531 = vmatpush3.bf16.msra.mxu0 %v4960_v8  ;;  %v4945_v8 = vld [vmem:[#allocation13 + $0xe0] sm:$0xff]  }
 0x28c   :  { %4706 = vmatprep.subr.bf16.mxu0 %v5488_v23 }
 0x28e   :  { %2766 = vmatmul.mubr.bf16.vlgmr.msra.gmra.mrb[24].mxu0 %v2136_v33  ;;  %v2082_v33 = vmul.f32 6.6666665, %v2058_v25 }
 0x28f   :  { %4722 = vmatprep.mubr.msk.bf16.mxu0 %vm5489_vm0, %v5488_v23 }
 0x2e1   :  { %v5962_v4 = vpop.f32.mrb[8].mxu0 }
 0x2e2   :  { %v4684_v39 = vpop.f32.mrb[9].mxu0 }
 0x2e3   :  { %v1138_v41 = vpop.f32.mrb[10].mxu0  ;;  %v4946_v39 = vld [vmem:[#allocation13 + $0xa0] sm:$0xff]  }
 0x2e4   :  { %v4685_v42 = vpop.f32.mrb[11].mxu0  ;;  %v2079_v41 = vmul.f32 0.85, %v5890_v61 }
 0x2e5   :  { %v2087_v42 = vmul.f32 6.6666665, %v2063_v32 }
 0x301   :  { %v4413_v45 = vpop.f32.mrb[12].mxu0 }
 0x302   :  { %v4414_v52 = vpop.f32.mrb[13].mxu0 }
 0x303   :  { %v4415_v47 = vadd.f32 %v4414_v52, %v4413_v45  ;;  %v4416_v59 = vpop.f32.mrb[14].mxu0  ;;  %v5996_v45 = vadd.f32 %v2082_v33, %v2074_v37  ;;  %v4950_v52 = vld [vmem:[#allocation13 + $0xa8] sm:$0xff]  }
 0x304   :  { %v4417_v18 = vpop.f32.mrb[15].mxu0  ;;  %v4953_v59 = vld [vmem:[#allocation13 + $0xf0] sm:$0xff]  }
 0x305   :  { %v1822_v53 = vadd.f32 %v4415_v47, %v1782_v44  ;;  %v4949_v44 = vld [vmem:[#allocation13 + $0xe8] sm:$0xff]   ;;  %v5998_v47 = vadd.f32 %v2087_v42, %v2079_v41  ;;  %v2106_v18 = vmul.f32 0.9, %v5895_v3  ;;  %v2114_v54 = vmul.f32 10.0, %v5996_v45 }
 0x307   :  { %v1862_v40 = vadd.f32 %v5914_v56, %v1822_v53  ;;  %v4954_v53 = vld [vmem:[#allocation13 + $0xb0] sm:$0xff]   ;;  %v2119_v61 = vmul.f32 10.0, %v5998_v47 }
 0x321   :  { %v4457_v55 = vpop.f32.mrb[16].mxu0 }
 0x322   :  { %v4458_v58 = vpop.f32.mrb[17].mxu0 }
 0x323   :  { %v4459_v1 = vadd.f32 %v4458_v58, %v4457_v55  ;;  %v4460_v5 = vpop.f32.mrb[18].mxu0  ;;  %v6004_v55 = vadd.f32 %v2114_v54, %v2106_v18  ;;  %v4981_v54 = vld [vmem:[#allocation13 + $0x48] sm:$0xff]  }
 0x324   :  { %v4461_v57 = vpop.f32.mrb[19].mxu0  ;;  %v4964_v5 = vld [vmem:[#allocation13 + $0x188] sm:$0xff]  }
 0x325   :  { %v1902_v48 = vadd.f32 %v4459_v1, %v1862_v40  ;;  %v2111_v40 = vmul.f32 0.9, %v5897_v9  ;;  %v2134_v3 = vpack.c.bf16 %v6004_v55, %v6004_v55  ;;  %v4963_v1 = vld [vmem:[#allocation13 + $0x1c8] sm:$0xff]   ;;  %v4965_v57 = vld [vmem:[#allocation13 + $0x1d0] sm:$0xff]  }
 0x327   :  { %v1907_v7 = vadd.f32 %v1902_v48, %v5970_v36  ;;  %v6006_v58 = vadd.f32 %v2119_v61, %v2111_v40  ;;  %v4966_v48 = vld [vmem:[#allocation13 + $0x190] sm:$0xff]   ;;  %v4980_v40 = vld [vmem:[#allocation16 + $0x8] sm:$0xff]  }
 0x328   :  { %v4982_v61 = vld [vmem:[#allocation13 + $0x8] sm:$0xff]  }
 0x329   :  { %vm1908_vm2 = vcmp.gt.f32.partialorder %v1907_v7, 0.0  ;;  %v2139_v9 = vpack.c.bf16 %v6006_v58, %v6006_v58  ;;  %v4967_v7 = vld [vmem:[#allocation13 + $0x1d8] sm:$0xff]  }
 0x32a   :  { %v5976_v56 = vsel %vm1908_vm2, 1.0, %v5488_v23 }
 0x32b   :  { %v1931_v13 = vmul.f32 6.6666665, %v5976_v56 }
 0x32d   :  { %v5982_v14 = vadd.f32 %v1931_v13, %v1930_v11  ;;  %v4969_v11 = vld [vmem:[#allocation13 + $0x1e0] sm:$0xff]   ;;  %v2078_v13 = vmul.f32 0.85, %v5904_v15 }
 0x32f   :  { %v1935_v10 = vmul.f32 10.0, %v5982_v14 }
 0x331   :  { %v5988_v19 = vadd.f32 %v1935_v10, %v1934_v17  ;;  %v2086_v10 = vmul.f32 6.6666665, %v2062_v16  ;;  %v4970_v17 = vld [vmem:[#allocation13 + $0x1a0] sm:$0xff]   ;;  %v4995_v16 = vld [vmem:[#allocation16 + $0x30] sm:$0xff]  }
 0x333   :  { %v1941_v22 = vpack.c.bf16 %v5988_v19, %v5988_v19 }
 0x335   :  { %4703 = vmatmul.mubr.bf16.vlgmr.msra.gmra.mrb[16].mxu1 %v1941_v22  ;;  %v4972_v22 = vld [vmem:[#allocation13 + $0x1a8] sm:$0xff]  }
 0x336   :  { %4495 = vmatpush3.bf16.msra.mxu1 %v4930_v20  ;;  %2725 = vmatprep.mubr.bf16.mxu1 %v2135_v30  ;;  %v4971_v20 = vld [vmem:[#allocation13 + $0x1e8] sm:$0xff]   ;;  %v6013_v30 = vadd.f32 %v2086_v10, %v2078_v13  ;;  %v2963_v13 = vld [vmem:[#allocation2 + $0xc8] sm:$0xff] }
 0x337   :  { %4496 = vmatprep.subr.bf16.mxu1 %v4933_v28  ;;  %v4973_v28 = vld [vmem:[#allocation13 + $0x1f0] sm:$0xff]  }
 0x338   :  { %v4997_v10 = vld [vmem:[#allocation13 + $0x30] sm:$0xff]  }
 0x33a   :  { %4497 = vmatpush3.bf16.msra.mxu1 %v4934_v26  ;;  %v2110_v26 = vmul.f32 0.9, %v5908_v12 }
 0x33b   :  { %4498 = vmatprep.subr.bf16.mxu1 %v4937_v27  ;;  %v2118_v27 = vmul.f32 10.0, %v6013_v30 }
 0x33d   :  { %v6017_v15 = vadd.f32 %v2118_v27, %v2110_v26  ;;  %v4998_v27 = vld [vmem:[#allocation16 + $0x38] sm:$0xff]  }
 0x33e   :  { %4499 = vmatpush3.bf16.msra.mxu1 %v4938_v29  ;;  %v4974_v29 = vld [vmem:[#allocation13 + $0x1b0] sm:$0xff]  }
 0x33f   :  { %4500 = vmatprep.subr.bf16.mxu1 %v4941_v51  ;;  %v4975_v51 = vld [vmem:[#allocation13 + $0x1f8] sm:$0xff]   ;;  %v2138_v25 = vpack.c.bf16 %v6017_v15, %v6017_v15 }
 0x342   :  { %4501 = vmatpush3.bf16.msra.mxu1 %v4942_v31  ;;  %v4976_v31 = vld [vmem:[#allocation13 + $0x1b8] sm:$0xff]  }
 0x343   :  { %4502 = vmatprep.subr.bf16.mxu1 %v4945_v8  ;;  %v4488_v8 = vpop.f32.mrb[20].mxu0 }
 0x344   :  { %v4489_v32 = vpop.f32.mrb[21].mxu0 }
 0x345   :  { %v6021_v37 = vadd.f32 %v4489_v32, %v4488_v8  ;;  %v4491_v12 = vpop.f32.mrb[22].mxu0  ;;  %v3011_v32 = vmul.f32 0.9, %v5933_v49  ;;  %v5007_v49 = vld [vmem:[#allocation13 + $0x148] sm:$0xff]  }
 0x346   :  { %4503 = vmatpush3.bf16.msra.mxu1 %v4946_v39  ;;  %v4492_v33 = vpop.f32.mrb[23].mxu0  ;;  %v3010_v12 = vmul.f32 0.9, %v5935_v50  ;;  %v5011_v50 = vld [vmem:[#allocation13 + $0x150] sm:$0xff]  }
 0x347   :  { %4504 = vmatprep.subr.bf16.mxu1 %v4949_v44  ;;  %v4977_v44 = vld [vmem:[#allocation16] sm:$0xff]  }
 0x348   :  { %4707 = vmatpush3.bf16.msra.mxu0 %v4977_v44  ;;  %v5003_v44 = vld [vmem:[#allocation13 + $0x140] sm:$0xff]  }
 0x349   :  { %4708 = vmatprep.subr.bf16.mxu0 %v5488_v23 }
 0x34a   :  { %4505 = vmatpush3.bf16.msra.mxu1 %v4950_v52  ;;  %v4978_v52 = vld [vmem:[#allocation13 + $0x40] sm:$0xff]  }
 0x34b   :  { %4506 = vmatprep.subr.bf16.mxu1 %v4953_v59  ;;  %v4979_v59 = vld [vmem:[#allocation13] sm:$0xff]  }
 0x34c   :  { %4709 = vmatpush3.bf16.msra.mxu0 %v4980_v40  ;;  %v5016_v40 = vld [vmem:[#allocation13 + $0x118] sm:$0xff]  }
 0x34d   :  { %4710 = vmatprep.subr.bf16.mxu0 %v5488_v23 }
 0x34e   :  { %4507 = vmatpush3.bf16.msra.mxu1 %v4954_v53 }
 0x34f   :  { %4508 = vmatprep.subr.bf16.mxu1 %v4957_v60  ;;  %v4984_v60 = vld [vmem:[#allocation13 + $0x50] sm:$0xff]  }
 0x352   :  { %4509 = vmatpush3.bf16.msra.mxu1 %v4958_v0  ;;  %v4983_v0 = vld [vmem:[#allocation16 + $0x10] sm:$0xff]  }
 0x353   :  { %4538 = vmatprep.subr.bf16.mxu1 %v4961_v62  ;;  %v4985_v62 = vld [vmem:[#allocation13 + $0x10] sm:$0xff]   ;;  %4711 = vmatpush3.bf16.msra.mxu0 %v4983_v0  ;;  %v5023_v0 = vld [vmem:[#allocation13 + $0x168] sm:$0xff]  }
 0x354   :  { %4712 = vmatprep.subr.bf16.mxu0 %v5488_v23 }
 0x355   :  { %2726 = vmatmul.mubr.bf16.vlgmr.msra.gmra.mrb[20].mxu1 %v2134_v3  ;;  %v4986_v3 = vld [vmem:[#allocation16 + $0x18] sm:$0xff]  }
 0x356   :  { %4539 = vmatpush3.bf16.msra.mxu1 %v4962_v63  ;;  %2805 = vmatprep.mubr.bf16.mxu1 %v2139_v9  ;;  %v4987_v63 = vld [vmem:[#allocation13 + $0x58] sm:$0xff]  }
 0x357   :  { %4540 = vmatprep.subr.bf16.mxu1 %v4963_v1  ;;  %4713 = vmatpush3.bf16.msra.mxu0 %v4986_v3  ;;  %v4988_v9 = vld [vmem:[#allocation13 + $0x18] sm:$0xff]   ;;  %v4989_v1 = vld [vmem:[#allocation16 + $0x20] sm:$0xff]   ;;  %v5024_v3 = vld [vmem:[#allocation13 + $0x128] sm:$0xff]  }
 0x358   :  { %4714 = vmatprep.subr.bf16.mxu0 %v5488_v23 }
 0x35a   :  { %4541 = vmatpush3.bf16.msra.mxu1 %v4964_v5  ;;  %v4990_v5 = vld [vmem:[#allocation13 + $0x60] sm:$0xff]  }
 0x35b   :  { %4542 = vmatprep.subr.bf16.mxu1 %v4965_v57  ;;  %4715 = vmatpush3.bf16.msra.mxu0 %v4989_v1  ;;  %v4991_v57 = vld [vmem:[#allocation13 + $0x20] sm:$0xff]   ;;  %v240_v1 = vld [vmem:[%s6279_s28] sm:$0xff] }
 0x35c   :  { %4716 = vmatprep.subr.bf16.mxu0 %v5488_v23 }
 0x35e   :  { %4543 = vmatpush3.bf16.msra.mxu1 %v4966_v48  ;;  %v4992_v48 = vld [vmem:[#allocation16 + $0x28] sm:$0xff]  }
 0x35f   :  { %4544 = vmatprep.subr.bf16.mxu1 %v4967_v7  ;;  %v4993_v7 = vld [vmem:[#allocation13 + $0x68] sm:$0xff]   ;;  %4717 = vmatpush3.bf16.msra.mxu0 %v4992_v48  ;;  %v2967_v48 = vld [vmem:[#allocation2 + $0xe8] sm:$0xff] }
 0x360   :  { %4718 = vmatprep.subr.bf16.mxu0 %v5488_v23 }
 0x361   :  { %v4532_v39 = vpop.f32.mrb[24].mxu0 }
 0x362   :  { %4545 = vmatpush3.bf16.msra.mxu1 %v4968_v6  ;;  %v4533_v41 = vpop.f32.mrb[25].mxu0  ;;  %v4994_v6 = vld [vmem:[#allocation13 + $0x28] sm:$0xff]  }
 0x363   :  { %4546 = vmatprep.subr.bf16.mxu1 %v4969_v11  ;;  %v6023_v42 = vadd.f32 %v4533_v41, %v4532_v39  ;;  %v4535_v18 = vpop.f32.mrb[26].mxu0  ;;  %v4996_v11 = vld [vmem:[#allocation13 + $0x70] sm:$0xff]   ;;  %4719 = vmatpush3.bf16.msra.mxu0 %v4995_v16  ;;  %v2983_v16 = vmul.f32 0.85, %v5943_v24 }
 0x364   :  { %v4536_v53 = vpop.f32.mrb[27].mxu0  ;;  %4720 = vmatprep.subr.bf16.mxu0 %v5488_v23  ;;  %v5008_v18 = vld [vmem:[#allocation13 + $0x108] sm:$0xff]  }
 0x365   :  { %v5015_v53 = vld [vmem:[#allocation13 + $0x158] sm:$0xff]  }
 0x366   :  { %4547 = vmatpush3.bf16.msra.mxu1 %v4970_v17  ;;  %v2979_v17 = vmul.f32 0.85, %v5925_v43 }
 0x367   :  { %4548 = vmatprep.subr.bf16.mxu1 %v4971_v20  ;;  %v2987_v20 = vmul.f32 6.6666665, %v2963_v13  ;;  %4721 = vmatpush3.bf16.msra.mxu0 %v4998_v27  ;;  %v5027_v13 = vld [vmem:[#allocation13 + $0x170] sm:$0xff]   ;;  %v1032_v27 = vmul.f32 0.65, %v240_v1  ;;  %v2968_v1 = vld [vmem:[#allocation2 + $0xf0] sm:$0xff] }
 0x36a   :  { %4549 = vmatpush3.bf16.msra.mxu1 %v4972_v22  ;;  %v2962_v22 = vld [vmem:[#allocation2 + $0xc0] sm:$0xff] }
 0x36b   :  { %4550 = vmatprep.subr.bf16.mxu1 %v4973_v28  ;;  %v2978_v28 = vmul.f32 0.85, %v5927_v46  ;;  %v2986_v26 = vmul.f32 6.6666665, %v2962_v22 }
 0x36d   :  { %v2994_v8 = vadd.f32 %v2986_v26, %v2978_v28 }
 0x36e   :  { %4551 = vmatpush3.bf16.msra.mxu1 %v4974_v29  ;;  %v4999_v29 = vld [vmem:[#allocation13 + $0x78] sm:$0xff]  }
 0x36f   :  { %4552 = vmatprep.subr.bf16.mxu1 %v4975_v51  ;;  %v5000_v51 = vld [vmem:[#allocation13 + $0x38] sm:$0xff]   ;;  %v3018_v33 = vmul.f32 10.0, %v2994_v8  ;;  %3723 = vst [vmem:[#allocation20] sm:$0xff] %v2994_v8 }
 0x370   :  { %v5031_v8 = vld [vmem:[#allocation13 + $0x178] sm:$0xff]  }
 0x371   :  { %v3026_v39 = vadd.f32 %v3018_v33, %v3010_v12 }
 0x372   :  { %4553 = vmatpush3.bf16.msra.mxu1 %v4976_v31  ;;  %v2995_v31 = vadd.f32 %v2987_v20, %v2979_v17  ;;  %v5028_v17 = vld [vmem:[#allocation13 + $0x130] sm:$0xff]   ;;  %v3013_v20 = vmul.f32 0.9, %v5984_v21  ;;  %v1052_v21 = vld [vmem:[%s6242_s14] sm:$0xff] }
 0x373   :  { %4569 = vmatprep.subr.bf16.mxu1 %v4978_v52  ;;  %v3038_v52 = vpack.c.bf16 %v3026_v39, %v3026_v39  ;;  %3731 = vst [vmem:[#allocation19] sm:$0xff] %v3026_v39  ;;  %v1136_v39 = vadd.f32 %v5962_v4, %v1052_v21 }
 0x374   :  { %v3019_v43 = vmul.f32 10.0, %v2995_v31  ;;  %3724 = vst [vmem:[#allocation20 + $0x8] sm:$0xff] %v2995_v31  ;;  %v3015_v31 = vmul.f32 0.9, %v5950_v35 }
 0x375   :  { %2806 = vmatmul.mubr.bf16.vlgmr.msra.gmra.mrb[24].mxu1 %v2138_v25  ;;  %v5001_v25 = vld [vmem:[#allocation13 + $0xc0] sm:$0xff]  }
 0x376   :  { %4570 = vmatpush3.bf16.msra.mxu1 %v4979_v59  ;;  %4591 = vmatprep.subr.bf16.mxu0 %v5001_v25  ;;  %v3027_v46 = vadd.f32 %v3019_v43, %v3011_v32  ;;  %v5004_v59 = vld [vmem:[#allocation13 + $0x100] sm:$0xff]   ;;  %v3014_v43 = vmul.f32 0.9, %v5955_v38 }
 0x377   :  { %4571 = vmatprep.subr.bf16.mxu1 %v4981_v54  ;;  %v5012_v54 = vld [vmem:[#allocation13 + $0x110] sm:$0xff]  }
 0x378   :  { %v3039_v41 = vpack.c.bf16 %v3027_v46, %v3027_v46  ;;  %3732 = vst [vmem:[#allocation19 + $0x8] sm:$0xff] %v3027_v46 }
 0x37a   :  { %4572 = vmatpush3.bf16.msra.mxu1 %v4982_v61  ;;  %3591 = vmatprep.mubr.bf16.mxu1 %v3039_v41  ;;  %v5019_v61 = vld [vmem:[#allocation13 + $0x160] sm:$0xff]  }
 0x37b   :  { %4573 = vmatprep.subr.bf16.mxu1 %v4984_v60  ;;  %v5020_v60 = vld [vmem:[#allocation13 + $0x120] sm:$0xff]  }
 0x37e   :  { %4574 = vmatpush3.bf16.msra.mxu1 %v4985_v62  ;;  %v2965_v62 = vld [vmem:[#allocation2 + $0xd8] sm:$0xff] }
 0x37f   :  { %4575 = vmatprep.subr.bf16.mxu1 %v4987_v63  ;;  %v2981_v63 = vmul.f32 0.85, %v5972_v2  ;;  %v2982_v2 = vmul.f32 0.85, %v5947_v34  ;;  %v242_v34 = vld [vmem:[#allocation11] sm:$0xff] }
 0x380   :  { %v1034_v46 = vsub.f32 %v1032_v27, %v242_v34 }
 0x382   :  { %4576 = vmatpush3.bf16.msra.mxu1 %v4988_v9  ;;  %v2989_v9 = vmul.f32 6.6666665, %v2965_v62 }
 0x383   :  { %4577 = vmatprep.subr.bf16.mxu1 %v4990_v5  ;;  %v2964_v5 = vld [vmem:[#allocation2 + $0xd0] sm:$0xff] }
 0x386   :  { %4578 = vmatpush3.bf16.msra.mxu1 %v4991_v57  ;;  %v2980_v57 = vmul.f32 0.85, %v5996_v45  ;;  %v3012_v45 = vmul.f32 0.9, %v6004_v55  ;;  %v5032_v55 = vld [vmem:[#allocation13 + $0x138] sm:$0xff]  }
 0x387   :  { %4579 = vmatprep.subr.bf16.mxu1 %v4993_v7  ;;  %v2997_v7 = vadd.f32 %v2989_v9, %v2981_v63  ;;  %v2985_v63 = vmul.f32 0.85, %v5998_v47  ;;  %v6077_v47 = vld [vmem:[%s6238_s10] sm:$0xff] }
 0x389   :  { %v3021_v22 = vmul.f32 10.0, %v2997_v7  ;;  %3726 = vst [vmem:[#allocation20 + $0x18] sm:$0xff] %v2997_v7 }
 0x38a   :  { %4580 = vmatpush3.bf16.msra.mxu1 %v4994_v6  ;;  %v2988_v6 = vmul.f32 6.6666665, %v2964_v5  ;;  %v2984_v5 = vmul.f32 0.85, %v6013_v30 }
 0x38b   :  { %4581 = vmatprep.subr.bf16.mxu1 %v4996_v11  ;;  %v2991_v11 = vmul.f32 6.6666665, %v2967_v48 }
 0x38c   :  { %v2996_v28 = vadd.f32 %v2988_v6, %v2980_v57  ;;  %v2992_v57 = vmul.f32 6.6666665, %v2968_v1  ;;  %v3017_v6 = vmul.f32 0.9, %v6006_v58  ;;  %v2688_v58 = vadd.f32 %v6021_v37, %v6077_v47  ;;  %v5037_v1 = vld [vmem:[#allocation13 + $0x1d0] sm:$0xff]  }
 0x38d   :  { %v2999_v26 = vadd.f32 %v2991_v11, %v2983_v16  ;;  %v3016_v11 = vmul.f32 0.9, %v6017_v15 }
 0x38e   :  { %4582 = vmatpush3.bf16.msra.mxu1 %v4997_v10  ;;  %v2966_v10 = vld [vmem:[#allocation2 + $0xe0] sm:$0xff]  ;;  %v3020_v24 = vmul.f32 10.0, %v2996_v28  ;;  %3725 = vst [vmem:[#allocation20 + $0x10] sm:$0xff] %v2996_v28  ;;  %v3000_v7 = vadd.f32 %v2992_v57, %v2984_v5  ;;  %v5038_v5 = vld [vmem:[#allocation13 + $0x190] sm:$0xff]   ;;  %v5039_v57 = vld [vmem:[#allocation13 + $0x1d8] sm:$0xff]  }
 0x38f   :  { %4583 = vmatprep.subr.bf16.mxu1 %v4999_v29  ;;  %v2990_v29 = vmul.f32 6.6666665, %v2966_v10  ;;  %v3023_v25 = vmul.f32 10.0, %v2999_v26  ;;  %3728 = vst [vmem:[#allocation20 + $0x28] sm:$0xff] %v2999_v26 }
 0x390   :  { %v6053_v12 = vadd.f32 %v3020_v24, %v3012_v45  ;;  %3729 = vst [vmem:[#allocation20 + $0x30] sm:$0xff] %v3000_v7 }
 0x391   :  { %v2998_v32 = vadd.f32 %v2990_v29, %v2982_v2  ;;  %v3031_v33 = vadd.f32 %v3023_v25, %v3015_v31  ;;  %v2129_v29 = vmul.f32 0.65, %v5970_v36 }
 0x392   :  { %4584 = vmatpush3.bf16.msra.mxu1 %v5000_v51  ;;  %v6045_v51 = vadd.f32 %v3021_v22, %v3013_v20  ;;  %3733 = vst [vmem:[#allocation19 + $0x10] sm:$0xff] %v6053_v12 }
 0x393   :  { %4613 = vmatprep.subr.bf16.mxu1 %v5003_v44  ;;  %v3022_v35 = vmul.f32 10.0, %v2998_v32  ;;  %3727 = vst [vmem:[#allocation20 + $0x20] sm:$0xff] %v2998_v32  ;;  %v3043_v41 = vpack.c.bf16 %v3031_v33, %v3031_v33  ;;  %3736 = vst [vmem:[#allocation19 + $0x28] sm:$0xff] %v3031_v33  ;;  %v2131_v34 = vsub.f32 %v2129_v29, %v5976_v56  ;;  %v5049_v29 = vld [vmem:[#allocation16] sm:$0xff]  }
 0x394   :  { %3734 = vst [vmem:[#allocation19 + $0x18] sm:$0xff] %v6045_v51 }
 0x395   :  { %3592 = vmatmul.mubr.bf16.vlgmr.msra.gmra.mrb[28].mxu1 %v3038_v52  ;;  %v3030_v44 = vadd.f32 %v3022_v35, %v3014_v43  ;;  %v1141_v52 = vadd.f32 %v1136_v39, %v1034_v46  ;;  %v3035_v37 = vmul.f32 0.65, %v2131_v34  ;;  %v2836_v43 = vmul.f32 0.85, %v5982_v14 }
 0x396   :  { %4614 = vmatpush3.bf16.msra.mxu1 %v5004_v59  ;;  %3671 = vmatprep.mubr.bf16.mxu1 %v3043_v41  ;;  %v1938_v59 = vmul.f32 0.65, %v1034_v46  ;;  %v2840_v35 = vmul.f32 0.9, %v5988_v19  ;;  %v5002_v46 = vld [vmem:[#allocation13 + $0x80] sm:$0xff]   ;;  %v3041_v39 = vpack.c.bf16 %v6045_v51, %v6045_v51  ;;  %v5005_v41 = vld [vmem:[#allocation13 + $0xc8] sm:$0xff]  }
 0x397   :  { %4615 = vmatprep.subr.bf16.mxu1 %v5007_v49  ;;  %v3042_v38 = vpack.c.bf16 %v3030_v44, %v3030_v44  ;;  %3735 = vst [vmem:[#allocation19 + $0x20] sm:$0xff] %v3030_v44  ;;  %vm1142_vm3 = vcmp.gt.f32.partialorder %v1141_v52, 0.0  ;;  %v5006_v44 = vld [vmem:[#allocation13 + $0x88] sm:$0xff]   ;;  %v5010_v52 = vld [vmem:[#allocation13 + $0x90] sm:$0xff]   ;;  %v5013_v19 = vld [vmem:[#allocation13 + $0xd8] sm:$0xff]  }
 0x398   :  { %v4055_v4 = vsel %vm1142_vm3, 1.0, %v5488_v23  ;;  %v5018_v51 = vld [vmem:[#allocation13 + $0xa0] sm:$0xff]  }
 0x39a   :  { %4616 = vmatpush3.bf16.msra.mxu1 %v5008_v18  ;;  %v1940_v18 = vsub.f32 %v1938_v59, %v4055_v4  ;;  %v5014_v59 = vld [vmem:[#allocation13 + $0x98] sm:$0xff]   ;;  %v5017_v4 = vld [vmem:[#allocation13 + $0xe0] sm:$0xff]  }
 0x39b   :  { %4617 = vmatprep.subr.bf16.mxu1 %v5011_v50 }
 0x39e   :  { %4618 = vmatpush3.bf16.msra.mxu1 %v5012_v54 }
 0x39f   :  { %4619 = vmatprep.subr.bf16.mxu1 %v5015_v53 }
 0x3a2   :  { %4620 = vmatpush3.bf16.msra.mxu1 %v5016_v40 }
 0x3a3   :  { %4621 = vmatprep.subr.bf16.mxu1 %v5019_v61 }
 0x3a6   :  { %4622 = vmatpush3.bf16.msra.mxu1 %v5020_v60  ;;  %v2844_v60 = vmul.f32 0.65, %v1940_v18 }
 0x3a7   :  { %4623 = vmatprep.subr.bf16.mxu1 %v5023_v0 }
 0x3aa   :  { %4624 = vmatpush3.bf16.msra.mxu1 %v5024_v3  ;;  %v2969_v3 = vld [vmem:[#allocation2 + $0xf8] sm:$0xff] }
 0x3ab   :  { %4625 = vmatprep.subr.bf16.mxu1 %v5027_v13  ;;  %v2993_v9 = vmul.f32 6.6666665, %v2969_v3  ;;  %v3024_v13 = vmul.f32 10.0, %v3000_v7  ;;  %v5042_v7 = vld [vmem:[#allocation13 + $0x1a0] sm:$0xff]  }
 0x3ad   :  { %v3001_v48 = vadd.f32 %v2993_v9, %v2985_v63  ;;  %v6070_v2 = vadd.f32 %v3024_v13, %v3016_v11  ;;  %v5035_v63 = vld [vmem:[#allocation13 + $0x1c8] sm:$0xff]   ;;  %v5045_v11 = vld [vmem:[#allocation13 + $0x1f0] sm:$0xff]  }
 0x3ae   :  { %4626 = vmatpush3.bf16.msra.mxu1 %v5028_v17  ;;  %v5036_v9 = vld [vmem:[#allocation13 + $0x188] sm:$0xff]   ;;  %v5046_v13 = vld [vmem:[#allocation13 + $0x1b0] sm:$0xff]  }
 0x3af   :  { %4627 = vmatprep.subr.bf16.mxu1 %v5031_v8  ;;  %v3025_v16 = vmul.f32 10.0, %v3001_v48  ;;  %3730 = vst [vmem:[#allocation20 + $0x38] sm:$0xff] %v3001_v48  ;;  %3737 = vst [vmem:[#allocation19 + $0x30] sm:$0xff] %v6070_v2  ;;  %v5040_v48 = vld [vmem:[#allocation13 + $0x198] sm:$0xff]  }
 0x3b1   :  { %v6068_v10 = vadd.f32 %v3025_v16, %v3017_v6  ;;  %v5043_v6 = vld [vmem:[#allocation13 + $0x1e8] sm:$0xff]  }
 0x3b2   :  { %4628 = vmatpush3.bf16.msra.mxu1 %v5032_v55  ;;  %v5044_v16 = vld [vmem:[#allocation13 + $0x1a8] sm:$0xff]  }
 0x3b3   :  { %4726 = vmatprep.subr.bf16.mxu1 %v5488_v23  ;;  %3738 = vst [vmem:[#allocation19 + $0x38] sm:$0xff] %v6068_v10  ;;  %v3045_v3 = vpack.c.bf16 %v6068_v10, %v6068_v10  ;;  %v5047_v10 = vld [vmem:[#allocation13 + $0x1f8] sm:$0xff]  }
 0x3b5   :  { %3672 = vmatmul.mubr.bf16.vlgmr.msra.gmra.mrb[32].mxu1 %v3042_v38  ;;  %v5009_v38 = vld [vmem:[#allocation13 + $0xd0] sm:$0xff]  }
 0x3b6   :  { %4742 = vmatprep.mubr.msk.bf16.mxu1 %vm5489_vm0, %v5488_v23  ;;  %4727 = vmatpush3.bf16.msra.mxu1 %v5049_v29 }
 0x3b7   :  { %4728 = vmatprep.subr.bf16.mxu1 %v5488_v23 }
 0x408   :  { %v2041_v49 = vpop.f32.mrb[16].mxu1 }
 0x409   :  { %v2042_v50 = vadd.f32 %v2041_v49, %v1052_v21  ;;  %v4704_v54 = vpop.f32.mrb[17].mxu1  ;;  %v5021_v49 = vld [vmem:[#allocation13 + $0xe8] sm:$0xff]  }
 0x40a   :  { %v2044_v53 = vpop.f32.mrb[18].mxu1  ;;  %v5026_v54 = vld [vmem:[#allocation13 + $0xb0] sm:$0xff]  }
 0x40b   :  { %v2047_v40 = vadd.f32 %v2042_v50, %v1940_v18  ;;  %v4705_v61 = vpop.f32.mrb[19].mxu1  ;;  %v5022_v18 = vld [vmem:[#allocation13 + $0xa8] sm:$0xff]   ;;  %v5025_v50 = vld [vmem:[#allocation13 + $0xf0] sm:$0xff]   ;;  %v5029_v53 = vld [vmem:[#allocation13 + $0xf8] sm:$0xff]  }
 0x40c   :  { %v5033_v61 = vld [vmem:[#allocation13 + $0x1c0] sm:$0xff]  }
 0x40d   :  { %vm2048_vm4 = vcmp.gt.f32.partialorder %v2047_v40, 0.0  ;;  %v5030_v40 = vld [vmem:[#allocation13 + $0xb8] sm:$0xff]  }
 0x40e   :  { %v4129_v0 = vsel %vm2048_vm4, 1.0, %v5488_v23 }
 0x40f   :  { %v6062_v62 = vsub.f32 %v2844_v60, %v4129_v0  ;;  %v3040_v60 = vpack.c.bf16 %v6053_v12, %v6053_v12  ;;  %v5034_v0 = vld [vmem:[#allocation13 + $0x180] sm:$0xff]  }
 0x410   :  { %v5041_v12 = vld [vmem:[#allocation13 + $0x1e0] sm:$0xff]  }
 0x428   :  { %v4510_v30 = vpop.f32.mrb[20].mxu1 }
 0x429   :  { %v4511_v15 = vpop.f32.mrb[21].mxu1 }
 0x42a   :  { %v4512_v17 = vadd.f32 %v4511_v15, %v4510_v30  ;;  %v4513_v20 = vpop.f32.mrb[22].mxu1  ;;  %v3044_v30 = vpack.c.bf16 %v6070_v2, %v6070_v2  ;;  %v5052_v2 = vld [vmem:[#allocation16 + $0x18] sm:$0xff]  }
 0x42b   :  { %v4514_v22 = vpop.f32.mrb[23].mxu1 }
 0x42c   :  { %v2728_v28 = vadd.f32 %v4512_v17, %v2688_v58  ;;  %v5048_v58 = vld [vmem:[#allocation13 + $0x1b8] sm:$0xff]  }
 0x42e   :  { %v2768_v26 = vadd.f32 %v6023_v42, %v2728_v28 }
 0x448   :  { %v4554_v27 = vpop.f32.mrb[24].mxu1 }
 0x449   :  { %v4555_v45 = vpop.f32.mrb[25].mxu1 }
 0x44a   :  { %v4556_v24 = vadd.f32 %v4555_v45, %v4554_v27  ;;  %v4557_v31 = vpop.f32.mrb[26].mxu1 }
 0x44b   :  { %v4558_v25 = vpop.f32.mrb[27].mxu1 }
 0x44c   :  { %v2808_v21 = vadd.f32 %v4556_v24, %v2768_v26  ;;  %v5050_v25 = vld [vmem:[#allocation16 + $0x8] sm:$0xff]  }
 0x44d   :  { %4729 = vmatpush3.bf16.msra.mxu1 %v5050_v25 }
 0x44e   :  { %v2813_v8 = vadd.f32 %v2808_v21, %v2131_v34  ;;  %v5051_v34 = vld [vmem:[#allocation16 + $0x10] sm:$0xff]   ;;  %4730 = vmatprep.subr.bf16.mxu1 %v5488_v23  ;;  %v5053_v21 = vld [vmem:[#allocation16 + $0x20] sm:$0xff]  }
 0x450   :  { %vm2814_vm5 = vcmp.gt.f32.partialorder %v2813_v8, 0.0  ;;  %v5054_v8 = vld [vmem:[#allocation16 + $0x28] sm:$0xff]  }
 0x451   :  { %v4194_v32 = vsel %vm2814_vm5, 1.0, %v5488_v23  ;;  %4731 = vmatpush3.bf16.msra.mxu1 %v5051_v34 }
 0x452   :  { %v2837_v55 = vmul.f32 6.6666665, %v4194_v32  ;;  %v6086_v33 = vsub.f32 %v3035_v37, %v4194_v32  ;;  %4732 = vmatprep.subr.bf16.mxu1 %v5488_v23  ;;  %v5055_v37 = vld [vmem:[#allocation16 + $0x30] sm:$0xff]   ;;  %v5056_v32 = vld [vmem:[#allocation16 + $0x38] sm:$0xff]  }
 0x454   :  { %v6088_v42 = vadd.f32 %v2837_v55, %v2836_v43  ;;  %3739 = vst [vmem:[#allocation22] sm:$0xff] %v6086_v33  ;;  %v6115_v43 = vld [vmem:[%s6242_s14] sm:$0xff]  ;;  %s5490_s14 = smov [#allocation20]  }
 0x455   :  { %4733 = vmatpush3.bf16.msra.mxu1 %v5052_v2  ;;  %s3883_s30 = sshll.u32 %s5490_s14, 4  ;;  %s3884_s30 = int_to_ptr.vmem [resolvable:$true] %s3883_s30 }
 0x456   :  { %v2841_v36 = vmul.f32 10.0, %v6088_v42  ;;  %4734 = vmatprep.subr.bf16.mxu1 %v5488_v23  ;;  %s5277_s13 = scalar_lea.vmem %s3884_s30, 1024  ;;  %p5282_p11 = scmp.lt.s32.totalorder %s3884_s30, %s3884_s30 }
 0x457   :  { %p5278_p10 = scmp.ne.s32.totalorder %s3884_s30, %s5277_s13  ;;  %p5283_p12 = scmp.lt.s32.totalorder %s5277_s13, %s5277_s13 }
 0x458   :  { %v6093_v56 = vadd.f32 %v2841_v36, %v2840_v35 }
 0x459   :  { %4735 = vmatpush3.bf16.msra.mxu1 %v5053_v21  ;;  %p5284_p13 = por %p5283_p12, %p5282_p11 }
 0x45a   :  { %v2847_v14 = vpack.c.bf16 %v6093_v56, %v6093_v56  ;;  %4736 = vmatprep.subr.bf16.mxu1 %v5488_v23 }
 0x45b   :  { %p5285_p0 = pnand %p5284_p13, %p5278_p10 }
 0x45c   :  { %4723 = vmatmul.mubr.bf16.vlgmr.msra.gmra.mrb[28].mxu0 %v2847_v14 }
 0x45d   :  { %4592 = vmatpush3.bf16.msra.mxu0 %v5002_v46  ;;  %3631 = vmatprep.mubr.bf16.mxu0 %v3041_v39 }
 0x45e   :  { %4593 = vmatprep.subr.bf16.mxu0 %v5005_v41  ;;  %4737 = vmatpush3.bf16.msra.mxu1 %v5054_v8  ;;  %v3750_v41 = vmul.f32 0.65, %v6062_v62 }
 0x45f   :  { %4738 = vmatprep.subr.bf16.mxu1 %v5488_v23 }
 0x461   :  { %4594 = vmatpush3.bf16.msra.mxu0 %v5006_v44 }
 0x462   :  { %4595 = vmatprep.subr.bf16.mxu0 %v5009_v38  ;;  %4739 = vmatpush3.bf16.msra.mxu1 %v5055_v37 }
 0x463   :  { %4740 = vmatprep.subr.bf16.mxu1 %v5488_v23 }
 0x465   :  { %4596 = vmatpush3.bf16.msra.mxu0 %v5010_v52 }
 0x466   :  { %4597 = vmatprep.subr.bf16.mxu0 %v5013_v19  ;;  %4741 = vmatpush3.bf16.msra.mxu1 %v5056_v32 }
 0x468   :  { %v4585_v15 = vpop.f32.mrb[28].mxu1 }
 0x469   :  { %4598 = vmatpush3.bf16.msra.mxu0 %v5014_v59  ;;  %v4586_v17 = vpop.f32.mrb[29].mxu1 }
 0x46a   :  { %4599 = vmatprep.subr.bf16.mxu0 %v5017_v4  ;;  %v4587_v20 = vadd.f32 %v4586_v17, %v4585_v15  ;;  %v4588_v22 = vpop.f32.mrb[30].mxu1 }
 0x46b   :  { %v4589_v28 = vpop.f32.mrb[31].mxu1 }
 0x46c   :  { %v3594_v52 = vadd.f32 %v4587_v20, %v6077_v47  ;;  %v3742_v47 = vmul.f32 0.85, %v6088_v42 }
 0x46d   :  { %4600 = vmatpush3.bf16.msra.mxu0 %v5018_v51 }
 0x46e   :  { %4601 = vmatprep.subr.bf16.mxu0 %v5021_v49 }
 0x471   :  { %4602 = vmatpush3.bf16.msra.mxu0 %v5022_v18 }
 0x472   :  { %4603 = vmatprep.subr.bf16.mxu0 %v5025_v50 }
 0x475   :  { %4604 = vmatpush3.bf16.msra.mxu0 %v5026_v54 }
 0x476   :  { %4605 = vmatprep.subr.bf16.mxu0 %v5029_v53 }
 0x479   :  { %4606 = vmatpush3.bf16.msra.mxu0 %v5030_v40 }
 0x47a   :  { %4635 = vmatprep.subr.bf16.mxu0 %v5033_v61 }
 0x47c   :  { %3632 = vmatmul.mubr.bf16.vlgmr.msra.gmra.mrb[32].mxu0 %v3040_v60 }
 0x47d   :  { %4636 = vmatpush3.bf16.msra.mxu0 %v5034_v0  ;;  %3711 = vmatprep.mubr.bf16.mxu0 %v3045_v3 }
 0x47e   :  { %4637 = vmatprep.subr.bf16.mxu0 %v5035_v63 }
 0x481   :  { %4638 = vmatpush3.bf16.msra.mxu0 %v5036_v9 }
 0x482   :  { %4639 = vmatprep.subr.bf16.mxu0 %v5037_v1 }
 0x485   :  { %4640 = vmatpush3.bf16.msra.mxu0 %v5038_v5  ;;  %v3746_v5 = vmul.f32 0.9, %v6093_v56 }
 0x486   :  { %4641 = vmatprep.subr.bf16.mxu0 %v5039_v57 }
 0x488   :  { %v4629_v26 = vpop.f32.mrb[32].mxu1 }
 0x489   :  { %4642 = vmatpush3.bf16.msra.mxu0 %v5040_v48  ;;  %v4630_v27 = vpop.f32.mrb[33].mxu1 }
 0x48a   :  { %4643 = vmatprep.subr.bf16.mxu0 %v5041_v12  ;;  %v4631_v45 = vadd.f32 %v4630_v27, %v4629_v26  ;;  %v4632_v24 = vpop.f32.mrb[34].mxu1 }
 0x48b   :  { %v4633_v31 = vpop.f32.mrb[35].mxu1 }
 0x48d   :  { %4644 = vmatpush3.bf16.msra.mxu0 %v5042_v7 }
 0x48e   :  { %4645 = vmatprep.subr.bf16.mxu0 %v5043_v6 }
 0x491   :  { %4646 = vmatpush3.bf16.msra.mxu0 %v5044_v16 }
 0x492   :  { %4647 = vmatprep.subr.bf16.mxu0 %v5045_v11 }
 0x495   :  { %4648 = vmatpush3.bf16.msra.mxu0 %v5046_v13 }
 0x496   :  { %4649 = vmatprep.subr.bf16.mxu0 %v5047_v10 }
 0x499   :  { %4650 = vmatpush3.bf16.msra.mxu0 %v5048_v58 }
 0x49c   :  { %3712 = vmatmul.mubr.bf16.vlgmr.msra.gmra.mrb[36].mxu0 %v3044_v30 }
 0x52f   :  { %v2947_v55 = vpop.f32.mrb[28].mxu0 }
 0x530   :  { %v2948_v36 = vadd.f32 %v2947_v55, %v6115_v43  ;;  %v4724_v35 = vpop.f32.mrb[29].mxu0 }
 0x531   :  { %v2950_v46 = vpop.f32.mrb[30].mxu0 }
 0x532   :  { %v2953_v39 = vadd.f32 %v2948_v36, %v6062_v62  ;;  %v4725_v14 = vpop.f32.mrb[31].mxu0 }
 0x534   :  { %vm2954_vm6 = vcmp.gt.f32.partialorder %v2953_v39, 0.0 }
 0x535   :  { %v4203_v44 = vsel %vm2954_vm6, 1.0, %v5488_v23 }
 0x536   :  { %v6121_v38 = vsub.f32 %v3750_v41, %v4203_v44 }
 0x538   :  { %3865 = vst [vmem:[#allocation28] sm:$0xff] %v6121_v38 }
 0x54f   :  { %v4607_v19 = vpop.f32.mrb[32].mxu0 }
 0x550   :  { %v4608_v59 = vpop.f32.mrb[33].mxu0 }
 0x551   :  { %v4609_v4 = vadd.f32 %v4608_v59, %v4607_v19  ;;  %v4610_v51 = vpop.f32.mrb[34].mxu0 }
 0x552   :  { %v4611_v49 = vpop.f32.mrb[35].mxu0 }
 0x553   :  { %v3634_v18 = vadd.f32 %v4609_v4, %v3594_v52 }
 0x555   :  { %v3674_v50 = vadd.f32 %v4631_v45, %v3634_v18 }
 0x56f   :  { %v4651_v54 = vpop.f32.mrb[36].mxu0 }
 0x570   :  { %v4652_v53 = vpop.f32.mrb[37].mxu0 }
 0x571   :  { %v4653_v40 = vadd.f32 %v4652_v53, %v4651_v54  ;;  %v4654_v61 = vpop.f32.mrb[38].mxu0 }
 0x572   :  { %v4655_v62 = vpop.f32.mrb[39].mxu0 }
 0x573   :  { %v3714_v60 = vadd.f32 %v4653_v40, %v3674_v50 }
 0x575   :  { %v3719_v0 = vadd.f32 %v3714_v60, %v6086_v33 }
 0x577   :  { %vm3720_vm7 = vcmp.gt.f32.partialorder %v3719_v0, 0.0 }
 0x578   :  { %v4268_v3 = vsel %vm3720_vm7, 1.0, %v5488_v23 }
 0x579   :  { %v3743_v63 = vmul.f32 6.6666665, %v4268_v3  ;;  %3740 = vst [vmem:[#allocation23] sm:$0xff] %v4268_v3 }
 0x57b   :  { %v3744_v9 = vadd.f32 %v3743_v63, %v3742_v47 }
 0x57d   :  { %v3747_v1 = vmul.f32 10.0, %v3744_v9  ;;  %3863 = vst [vmem:[#allocation26] sm:$0xff] %v3744_v9 }
 0x57f   :  { %v3748_v57 = vadd.f32 %v3747_v1, %v3746_v5 }
 0x581   :  { %v3753_v48 = vpack.c.bf16 %v3748_v57, %v3748_v57  ;;  %3864 = vst [vmem:[#allocation25] sm:$0xff] %v3748_v57 }
 0x583   :  { %4743 = vmatmul.mubr.bf16.vlgmr.msra.gmra.mrb[36].mxu1 %v3753_v48 }
 0x584   :  { %5288 = shalt.err (!%p5285_p0)
}
 0x585   :  { %s5289_s8 = scalar_lea.hbm %s6246_s18, 1024 }
 0x586   :  { %p5290_p1 = scmp.ne.s32.totalorder %s6246_s18, %s5289_s8  ;;  %p5293_p2 = scmp.lt.u32.totalorder %s5289_s8, %s6246_s18 }
 0x588   :  { %p5295_p3 = pnand %p5293_p2, %p5290_p1 }
 0x58a   :  { %5298 = shalt.err (!%p5295_p3)
}
 0x58b   :  { %3886 = dma.vmem_to_hbm [thread:$0]  %s3884_s30, 1024, %s6246_s18, [#allocation21]  }
 0x58c   :  { %s5299_s5 = scalar_lea.vmem %s3904_s6, 128  ;;  %p5304_p5 = scmp.lt.s32.totalorder %s3904_s6, %s3904_s6 }
 0x58d   :  { %p5300_p4 = scmp.ne.s32.totalorder %s3904_s6, %s5299_s5  ;;  %p5305_p6 = scmp.lt.s32.totalorder %s5299_s5, %s5299_s5 }
 0x58f   :  { %p5306_p7 = por %p5305_p6, %p5304_p5 }
 0x591   :  { %p5307_p8 = pnand %p5306_p7, %p5300_p4 }
 0x593   :  { %5310 = shalt.err (!%p5307_p8)
}
 0x594   :  { %s5311_s7 = scalar_lea.hbm %s6248_s20, 128 }
 0x595   :  { %p5312_p9 = scmp.ne.s32.totalorder %s6248_s20, %s5311_s7  ;;  %p5315_p10 = scmp.lt.u32.totalorder %s5311_s7, %s6248_s20 }
 0x597   :  { %p5317_p11 = pnand %p5315_p10, %p5312_p9 }
 0x599   :  { %5320 = shalt.err (!%p5317_p11)
}
 0x59a   :  { %3906 = dma.vmem_to_hbm [thread:$0]  %s3904_s6, 128, %s6248_s20, [#allocation24]  }
 0x59b   :  { %s5492_s14 = smov [#allocation26]   ;;  %s5493_s25 = smov [#allocation19]  }
 0x59c   :  { %s3923_s30 = sshll.u32 %s5492_s14, 4  ;;  %s3873_s13 = sshll.u32 %s5493_s25, 4  ;;  %s3924_s30 = int_to_ptr.vmem [resolvable:$true] %s3923_s30  ;;  %s3874_s13 = int_to_ptr.vmem [resolvable:$true] %s3873_s13 }
 0x59d   :  { %s5321_s1 = scalar_lea.vmem %s3924_s30, 128  ;;  %p5326_p13 = scmp.lt.s32.totalorder %s3924_s30, %s3924_s30 }
 0x59e   :  { %p5322_p12 = scmp.ne.s32.totalorder %s3924_s30, %s5321_s1  ;;  %p5327_p0 = scmp.lt.s32.totalorder %s5321_s1, %s5321_s1 }
 0x5a0   :  { %p5328_p1 = por %p5327_p0, %p5326_p13 }
 0x5a2   :  { %p5329_p2 = pnand %p5328_p1, %p5322_p12 }
 0x5a4   :  { %5332 = shalt.err (!%p5329_p2)
}
 0x5a5   :  { %s5333_s0 = scalar_lea.hbm %s6250_s22, 128 }
 0x5a6   :  { %p5334_p3 = scmp.ne.s32.totalorder %s6250_s22, %s5333_s0  ;;  %p5337_p4 = scmp.lt.u32.totalorder %s5333_s0, %s6250_s22 }
 0x5a8   :  { %p5339_p5 = pnand %p5337_p4, %p5334_p3 }
 0x5aa   :  { %5342 = shalt.err (!%p5339_p5)
}
 0x5ab   :  { %3926 = dma.vmem_to_hbm [thread:$0]  %s3924_s30, 128, %s6250_s22, [#allocation27]  }
 0x5ac   :  { %s5343_s9 = scalar_lea.vmem %s3874_s13, 1024  ;;  %p5348_p7 = scmp.lt.s32.totalorder %s3874_s13, %s3874_s13 }
 0x5ad   :  { %p5344_p6 = scmp.ne.s32.totalorder %s3874_s13, %s5343_s9  ;;  %p5349_p8 = scmp.lt.s32.totalorder %s5343_s9, %s5343_s9 }
 0x5af   :  { %p5350_p9 = por %p5349_p8, %p5348_p7 }
 0x5b1   :  { %p5351_p10 = pnand %p5350_p9, %p5344_p6 }
 0x5b3   :  { %5354 = shalt.err (!%p5351_p10)
}
 0x5b4   :  { %s5355_s28 = scalar_lea.hbm %s6245_s17, 1024 }
 0x5b5   :  { %p5356_p11 = scmp.ne.s32.totalorder %s6245_s17, %s5355_s28  ;;  %p5359_p12 = scmp.lt.u32.totalorder %s5355_s28, %s6245_s17 }
 0x5b7   :  { %p5361_p13 = pnand %p5359_p12, %p5356_p11 }
 0x5b9   :  { %5364 = shalt.err (!%p5361_p13)
}
 0x5ba   :  { %3876 = dma.vmem_to_hbm [thread:$0]  %s3874_s13, 1024, %s6245_s17, [#allocation4]  }
 0x5bb   :  { %s5494_s18 = smov [#allocation22]   ;;  %s5495_s14 = smov [#allocation25]  }
 0x5bc   :  { %s3893_s12 = sshll.u32 %s5494_s18, 4  ;;  %s3913_s30 = sshll.u32 %s5495_s14, 4  ;;  %s3894_s12 = int_to_ptr.vmem [resolvable:$true] %s3893_s12  ;;  %s3914_s30 = int_to_ptr.vmem [resolvable:$true] %s3913_s30 }
 0x5bd   :  { %s5365_s25 = scalar_lea.vmem %s3894_s12, 128  ;;  %p5370_p1 = scmp.lt.s32.totalorder %s3894_s12, %s3894_s12 }
 0x5be   :  { %p5366_p0 = scmp.ne.s32.totalorder %s3894_s12, %s5365_s25  ;;  %p5371_p2 = scmp.lt.s32.totalorder %s5365_s25, %s5365_s25 }
 0x5c0   :  { %p5372_p3 = por %p5371_p2, %p5370_p1 }
 0x5c2   :  { %p5373_p4 = pnand %p5372_p3, %p5366_p0 }
 0x5c4   :  { %5376 = shalt.err (!%p5373_p4)
}
 0x5c5   :  { %s5377_s8 = scalar_lea.hbm %s6247_s19, 128 }
 0x5c6   :  { %p5378_p5 = scmp.ne.s32.totalorder %s6247_s19, %s5377_s8  ;;  %p5381_p6 = scmp.lt.u32.totalorder %s5377_s8, %s6247_s19 }
 0x5c8   :  { %p5383_p7 = pnand %p5381_p6, %p5378_p5 }
 0x5ca   :  { %5386 = shalt.err (!%p5383_p7)
}
 0x5cb   :  { %3896 = dma.vmem_to_hbm [thread:$0]  %s3894_s12, 128, %s6247_s19, [#allocation21]  }
 0x5cc   :  { %s5387_s6 = scalar_lea.vmem %s3914_s30, 128  ;;  %p5392_p9 = scmp.lt.s32.totalorder %s3914_s30, %s3914_s30 }
 0x5cd   :  { %p5388_p8 = scmp.ne.s32.totalorder %s3914_s30, %s5387_s6  ;;  %p5393_p10 = scmp.lt.s32.totalorder %s5387_s6, %s5387_s6 }
 0x5cf   :  { %p5394_p11 = por %p5393_p10, %p5392_p9 }
 0x5d1   :  { %p5395_p12 = pnand %p5394_p11, %p5388_p8 }
 0x5d3   :  { %5398 = shalt.err (!%p5395_p12)
}
 0x5d4   :  { %s5399_s9 = scalar_lea.hbm %s6249_s21, 128 }
 0x5d5   :  { %p5400_p13 = scmp.ne.s32.totalorder %s6249_s21, %s5399_s9  ;;  %p5403_p0 = scmp.lt.u32.totalorder %s5399_s9, %s6249_s21 }
 0x5d7   :  { %p5405_p1 = pnand %p5403_p0, %p5400_p13 }
 0x5d9   :  { %5408 = shalt.err (!%p5405_p1)
}
 0x5da   :  { %3916 = dma.vmem_to_hbm [thread:$0]  %s3914_s30, 128, %s6249_s21, [#allocation24]  }
 0x5db   :  { %s5496_s3 = smov [#allocation28]  }
 0x5dc   :  { %s3933_s16 = sshll.u32 %s5496_s3, 4  ;;  %s3934_s16 = int_to_ptr.vmem [resolvable:$true] %s3933_s16 }
 0x5dd   :  { %s5409_s22 = scalar_lea.vmem %s3934_s16, 128  ;;  %p5414_p3 = scmp.lt.s32.totalorder %s3934_s16, %s3934_s16 }
 0x5de   :  { %p5410_p2 = scmp.ne.s32.totalorder %s3934_s16, %s5409_s22  ;;  %p5415_p4 = scmp.lt.s32.totalorder %s5409_s22, %s5409_s22 }
 0x5e0   :  { %p5416_p5 = por %p5415_p4, %p5414_p3 }
 0x5e2   :  { %p5417_p6 = pnand %p5416_p5, %p5410_p2 }
 0x5e4   :  { %5420 = shalt.err (!%p5417_p6)
}
 0x5e5   :  { %s5421_s12 = scalar_lea.hbm %s6251_s23, 128 }
 0x5e6   :  { %p5422_p7 = scmp.ne.s32.totalorder %s6251_s23, %s5421_s12  ;;  %p5425_p8 = scmp.lt.u32.totalorder %s5421_s12, %s6251_s23 }
 0x5e8   :  { %p5427_p9 = pnand %p5425_p8, %p5422_p7 }
 0x5ea   :  { %5430 = shalt.err (!%p5427_p9)
}
 0x5eb   :  { %3936 = dma.vmem_to_hbm [thread:$0]  %s3934_s16, 128, %s6251_s23, [#allocation27]  }
 0x5ec   :  { %s5497_s8 = smov [#allocation29]  }
 0x5ed   :  { %s3943_s0 = sshll.u32 %s5497_s8, 4  ;;  %s3944_s0 = int_to_ptr.vmem [resolvable:$true] %s3943_s0 }
 0x5ee   :  { %s5431_s11 = scalar_lea.vmem %s3944_s0, 128  ;;  %p5436_p11 = scmp.lt.s32.totalorder %s3944_s0, %s3944_s0 }
 0x5ef   :  { %p5432_p10 = scmp.ne.s32.totalorder %s3944_s0, %s5431_s11  ;;  %p5437_p12 = scmp.lt.s32.totalorder %s5431_s11, %s5431_s11 }
 0x5f1   :  { %p5438_p13 = por %p5437_p12, %p5436_p11 }
 0x5f3   :  { %p5439_p0 = pnand %p5438_p13, %p5432_p10 }
 0x656   :  { %v3853_v33 = vpop.f32.mrb[36].mxu1 }
 0x657   :  { %v3854_v42 = vadd.f32 %v3853_v33, %v6115_v43  ;;  %v4744_v56 = vpop.f32.mrb[37].mxu1 }
 0x658   :  { %v3856_v12 = vpop.f32.mrb[38].mxu1 }
 0x659   :  { %v3859_v7 = vadd.f32 %v3854_v42, %v6121_v38  ;;  %v4745_v6 = vpop.f32.mrb[39].mxu1 }
 0x65b   :  { %vm3860_vm8 = vcmp.gt.f32.partialorder %v3859_v7, 0.0 }
 0x65c   :  { %v4277_v16 = vsel %vm3860_vm8, 1.0, %v5488_v23 }
 0x65d   :  { %3866 = vst [vmem:[#allocation29] sm:$0xff] %v4277_v16 }
 0x65e   :  { %5442 = shalt.err (!%p5439_p0)
}
 0x65f   :  { %s5443_s13 = scalar_lea.hbm %s6252_s24, 128 }
 0x660   :  { %p5444_p1 = scmp.ne.s32.totalorder %s6252_s24, %s5443_s13  ;;  %p5447_p2 = scmp.lt.u32.totalorder %s5443_s13, %s6252_s24 }
 0x662   :  { %p5449_p3 = pnand %p5447_p2, %p5444_p1 }
 0x664   :  { %5452 = shalt.err (!%p5449_p3)
}
 0x665   :  { %3946 = dma.vmem_to_hbm [thread:$0]  %s3944_s0, 128, %s6252_s24, [#allocation30]  }
 0x666   :  { %5465 = dma.done.wait [#allocation4], 1024  }
 0x667   :  { %5466 = vsyncadd [#allocation4], 4294966272 }
 0x668   :  { %5467 = dma.done.wait [#allocation21], 1152  }
 0x669   :  { %5468 = vsyncadd [#allocation21], 4294966144 }
 0x66a   :  { %5469 = dma.done.wait [#allocation24], 256  }
 0x66b   :  { %5470 = vsyncadd [#allocation24], 4294967040 }
 0x66c   :  { %5471 = dma.done.wait [#allocation27], 256  }
 0x66d   :  { %5472 = vsyncadd [#allocation27], 4294967040 }
 0x66e   :  { %5473 = dma.done.wait [#allocation30], 128  }
 0x66f   :  { %5474 = vsyncadd [#allocation30], 4294967168 }
 0x670   :  { %3971 = vsyncpa [#allocation3], 1 }
 0x671   :  { %3972 = vsyncpa [#allocation6], 1 }
 0x672   :  { %3973 = vsyncpa [#allocation9], 1 }
 0x673   :  { %3974 = vsyncpa [#allocation12], 1 }
 0x674   :  { %3975 = vsyncpa [#allocation15], 1 }
 0x675   :  { %3976 = vsyncpa [#allocation18], 1 }
 0x676   :  { %3977 = vsyncpa [#allocation4], 1 }
 0x677   :  { %3978 = vsyncpa [#allocation21], 1 }
 0x678   :  { %3979 = vsyncpa [#allocation24], 1 }
 0x679   :  { %3980 = vsyncpa [#allocation27], 1 }
 0x67a   :  { %3981 = vsyncpa [#allocation30], 1 }

</bundles_post_ra>
